<compile_context>
chip_gen: v5e
topology: v5e:2x2
jax: 0.10.0
libtpu: 0.0.40
codegen_flags: <defaults>
</compile_context>

<pallas_src>
import math

import numpy as np

import jax
import jax.numpy as jnp
from jax.experimental import pallas as pl
from jax.experimental.pallas import tpu as pltpu


# ------------------------------ parameter init ------------------------------

def _init_bn(key, ch):
    k1, k2, k3, k4 = jax.random.split(key, 4)
    gamma = 1.0 + 0.1 * jax.random.normal(k1, (ch,), jnp.float32)
    beta = 0.1 * jax.random.normal(k2, (ch,), jnp.float32)
    mean = 0.1 * jax.random.normal(k3, (ch,), jnp.float32)
    var = jax.random.uniform(k4, (ch,), jnp.float32, 0.5, 1.5)
    scale = gamma / jnp.sqrt(var + 1e-5)
    shift = beta - mean * scale
    return scale, shift


def init_inverted_conv(key, cin, cout, k):
    kb, kw, kbias = jax.random.split(key, 3)
    scale, shift = _init_bn(kb, cin)
    if k == 3:
        w = jax.random.normal(kw, (3, 3, cin, cout), jnp.float32) / math.sqrt(9 * cin)
    else:
        w = jax.random.normal(kw, (cin, cout), jnp.float32) / math.sqrt(cin)
    b = 0.01 * jax.random.normal(kbias, (cout,), jnp.float32)
    return {"scale": scale, "shift": shift, "w": w, "b": b, "k": k}


def init_resblock(key, cin, cout):
    assert cin == cout, "identity-shortcut ResidualBlock3d assumed (cin == cout)"
    k1, k2 = jax.random.split(key, 2)
    return {"conv1": init_inverted_conv(k1, cin, cout, 3),
            "conv2": init_inverted_conv(k2, cout, cout, 3)}


def init_soft_mask_branch(key, in_ch, out_ch, r=1, stage=0):
    assert in_ch == out_ch, "SoftMaskBranch_25d is only shape-consistent for in_ch == out_ch"
    skipconnection = 3 if stage == 0 else (2 if stage == 1 else 1)
    keys = iter(jax.random.split(key, 64))
    params = {"stage": stage, "r": r}
    params["in_res"] = [init_resblock(next(keys), in_ch, out_ch)]
    params["skip0"] = [init_resblock(next(keys), in_ch, out_ch)] + \
                      [init_resblock(next(keys), out_ch, out_ch) for _ in range(r - 1)]
    for i in range(skipconnection):
        if i != 0:
            params[f"skip{i}"] = [init_resblock(next(keys), out_ch, out_ch) for _ in range(r)]
        n_down = r * 2 if i == skipconnection - 1 else r
        params[f"down{i}"] = [init_resblock(next(keys), out_ch, out_ch) for _ in range(n_down)]
        params[f"upres{i}"] = [init_resblock(next(keys), out_ch, out_ch) for _ in range(r)]
    params["out_conv1"] = init_inverted_conv(next(keys), out_ch, out_ch, 1)
    params["out_conv2"] = init_inverted_conv(next(keys), out_ch, out_ch, 1)
    return params


# --------------------- trace-time weight / matrix packing -------------------

def _pack_conv3(w, Hx):
    """(3,3,Cin,Cout) conv -> ONE stacked-D-tap banded matrix (3*Hx*Cin, Hx*Cout)."""
    _, _, cin, cout = w.shape
    M = np.zeros((3, Hx * cin, Hx * cout), np.float32)
    for dd in range(3):
        for dh in range(3):
            for ho in range(Hx):
                hi = ho + dh - 1
                if 0 <= hi < Hx:
                    M[dd, hi * cin:(hi + 1) * cin, ho * cout:(ho + 1) * cout] += w[dd, dh]
    return M.reshape(3 * Hx * cin, Hx * cout)


def _pack_conv1(w, Hx):
    """(Cin,Cout) 1x1 conv -> block-diagonal (Hx*Cin, Hx*Cout)."""
    cin, cout = w.shape
    M = np.zeros((Hx * cin, Hx * cout), np.float32)
    for h in range(Hx):
        M[h * cin:(h + 1) * cin, h * cout:(h + 1) * cout] = w
    return M


def _pool_h_select(Hin, C):
    """Stacked (Hin*C, 3*Ho*C) 0/1 gather of the 3 H taps.
    Missing edge taps duplicate the centre tap (exact for max-pooling)."""
    Ho = (Hin - 1) // 2 + 1
    S = np.zeros((Hin * C, 3 * Ho * C), np.float32)
    eye = np.eye(C, dtype=np.float32)
    for k in range(3):
        for oh in range(Ho):
            hi = 2 * oh - 1 + k
            if not (0 <= hi < Hin):
                hi = 2 * oh
            S[hi * C:(hi + 1) * C, (k * Ho + oh) * C:(k * Ho + oh + 1) * C] = eye
    return S, Ho


def _pool_d_decim(Din):
    """Per-batch stride-2 row decimation (Do, Din)."""
    Do = (Din - 1) // 2 + 1
    M = np.zeros((Do, Din), np.float32)
    for od in range(Do):
        M[od, min(2 * od, Din - 1)] = 1.0
    return M, Do


def _upsample_mats(Ds_, Hs_, Db_, Hb_, C):
    """Nearest-neighbour interpolation: lane matrix U (Hs*C, Hb*C), row matrix P (Db, Ds)."""
    U = np.zeros((Hs_ * C, Hb_ * C), np.float32)
    eye = np.eye(C, dtype=np.float32)
    for hb in range(Hb_):
        hs = (hb * Hs_) // Hb_
        U[hs * C:(hs + 1) * C, hb * C:(hb + 1) * C] = eye
    P = np.zeros((Db_, Ds_), np.float32)
    for db in range(Db_):
        P[db, (db * Ds_) // Db_] = 1.0
    return U, P


# --------------------------- in-kernel building blocks -----------------------

def _affine_relu(x, aff):
    """aff: (3, HC) = [BN scale, BN shift, conv bias]; returns ReLU(x*s + t)."""
    return jnp.maximum(x * aff[0:1, :] + aff[1:2, :], 0.0)


def _conv3(a, w, bias):
    """3x3x1 conv on one batch item.  a: (Dr, HC) f32, w: (3*HC, HCo) bf16."""
    Dr, HC = a.shape
    z = jnp.zeros((1, HC), jnp.float32)
    if Dr > 1:
        a_m1 = jnp.concatenate([z, a[:-1, :]], axis=0)      # input row d-1 (zero pad)
        a_p1 = jnp.concatenate([a[1:, :], z], axis=0)        # input row d+1 (zero pad)
    else:
        a_m1, a_p1 = z, z
    a_stack = jnp.concatenate([a_m1, a, a_p1], axis=1).astype(jnp.bfloat16)
    y = jnp.dot(a_stack, w, preferred_element_type=jnp.float32)   # single MXU GEMM
    return y + bias


def _resblock(x, w_ref, aff_ref, slot):
    """Pre-activation residual block: (BN->ReLU->Conv3x3x1) x2 + identity."""
    aff1 = aff_ref[slot]
    h = _conv3(_affine_relu(x, aff1), w_ref[slot], aff1[2:3, :])
    aff2 = aff_ref[slot + 1]
    y = _conv3(_affine_relu(h, aff2), w_ref[slot + 1], aff2[2:3, :])
    return y + x


def _conv1x1(x, w, aff, sigmoid):
    a = _affine_relu(x, aff).astype(jnp.bfloat16)
    y = jnp.dot(a, w, preferred_element_type=jnp.float32) + aff[2:3, :]
    if sigmoid:
        y = 0.5 * (jnp.tanh(0.5 * y) + 1.0)                 # stable sigmoid (EUP)
    return y


def _maxpool(x, sel, dec, hoc):
    """MaxPool3d([3,3,1],[2,2,1],[1,1,0]) on one batch item (Dr, Hin*C) -> (Do, Ho*C)."""
    h = jnp.dot(x, sel, preferred_element_type=jnp.float32)        # (Dr, 3*Ho*C)
    hp = jnp.maximum(jnp.maximum(h[:, :hoc], h[:, hoc:2 * hoc]), h[:, 2 * hoc:3 * hoc])
    if hp.shape[0] > 1:
        prev = jnp.concatenate([hp[0:1, :], hp[:-1, :]], axis=0)   # edge rows duplicate
        nxt = jnp.concatenate([hp[1:, :], hp[-1:, :]], axis=0)     # centre (exact for max)
        dmax = jnp.maximum(jnp.maximum(prev, hp), nxt)
    else:
        dmax = hp
    if dec is None:                                                # Do == 1
        return dmax[0:1, :]
    return jnp.dot(dec, dmax, preferred_element_type=jnp.float32)


def _upsample(u, U, P, Db):
    """Nearest-neighbour interpolation of one batch item to (Db, Hb*C)."""
    t = jnp.dot(u, U, preferred_element_type=jnp.float32)
    if P is None:                                                  # Ds == 1: replicate row
        return jnp.broadcast_to(t, (Db, t.shape[1]))
    return jnp.dot(P, t, preferred_element_type=jnp.float32)


# ------------------------------ fused forward -------------------------------

def build_soft_mask_branch(params, N, C, D, H, S):
    """Packs weights/constant matrices and returns a jitted forward(x) that runs the
    entire soft-mask branch as ONE pallas_call with a parallel grid over batch*slices."""
    B = N * S
    stage = params["stage"]
    nskip = 3 if stage == 0 else (2 if stage == 1 else 1)
    nlev = nskip + 1

    Dl, Hl = [D], [H]
    for _ in range(nlev):
        Dl.append((Dl[-1] - 1) // 2 + 1)
        Hl.append((Hl[-1] - 1) // 2 + 1)

    assert D % 8 == 0, "per-batch row block (D) must be a multiple of 8 for TPU sublane tiling"

    operands = []

    def add(arr, dtype=None):
        a = jnp.asarray(arr)
        if dtype is not None:
            a = a.astype(dtype)
        operands.append(a)
        return len(operands) - 1

    conv_w = {L: [] for L in range(1, nlev + 1)}
    conv_aff = {L: [] for L in range(1, nlev + 1)}

    def reg_conv3(L, p):
        Hx = Hl[L]
        conv_w[L].append(_pack_conv3(np.asarray(p["w"], np.float32), Hx))
        conv_aff[L].append(np.stack(
            [np.tile(np.asarray(p["scale"], np.float32), Hx),
             np.tile(np.asarray(p["shift"], np.float32), Hx),
             np.tile(np.asarray(p["b"], np.float32), Hx)], 0))

    prog = []

    def blocks_step(src, dst, L, blocks):
        start = len(conv_w[L])
        for blk in blocks:
            reg_conv3(L, blk["conv1"])
            reg_conv3(L, blk["conv2"])
        prog.append(("blocks", src, dst, L, start, len(blocks)))

    def pool_step(src, dst, L_in):
        Smat, Ho = _pool_h_select(Hl[L_in], C)
        Dm, Do = _pool_d_decim(Dl[L_in])
        si = add(Smat)
        di = add(Dm) if Do > 1 else None
        prog.append(("pool", src, dst, si, di, Ho * C))

    def upadd_step(src, dst, L_s, L_b, addA, addB):
        U, P = _upsample_mats(Dl[L_s], Hl[L_s], Dl[L_b], Hl[L_b], C)
        ui = add(U)
        pi = add(P) if Dl[L_s] > 1 else None
        prog.append(("upadd", src, dst, ui, pi, Dl[L_b], addA, addB))

    # ---- forward structure (mirrors the PyTorch module) --------------------
    pool_step("x", "p1", 0)                                   # init_maxpool
    blocks_step("p1", "skip0", 1, params["skip0"])            # skip0
    blocks_step("skip0", "dx", 1, params["in_res"])           # dx = in_res(skip0)
    cur, curL = "skip0", 1
    dnames = []
    for i in range(nskip):
        pool_step(cur, f"pd{i}", curL)                        # down_i = MaxPool + resblocks
        blocks_step(f"pd{i}", f"d{i}", curL + 1, params[f"down{i}"])
        dnames.append(f"d{i}")
        if i + 1 < nskip:
            blocks_step(f"d{i}", f"skip{i + 1}", curL + 1, params[f"skip{i + 1}"])
        cur, curL = f"d{i}", curL + 1
    u, uL = dnames[-1], nskip + 1
    for i in range(nskip - 1, -1, -1):
        addA, addB = (f"skip{i}", dnames[i - 1]) if i >= 1 else ("skip0", "dx")
        upadd_step(u, f"j{i}", uL, uL - 1, addA, addB)        # interp + skip + d
        blocks_step(f"j{i}", f"u{i}", uL - 1, params[f"upres{i}"])
        u, uL = f"u{i}", uL - 1
    upadd_step(u, "uf", 1, 0, None, None)                     # final interp to input size
    prog.append(("outres", "uf", "out"))                      # 2x InvertedConv1x1 + Sigmoid

    # ---- stacked per-level conv operands (bf16 weights, f32 affines) --------
    wk_idx, aff_idx = {}, {}
    for L in range(1, nlev + 1):
        if conv_w[L]:
            wk_idx[L] = add(np.stack(conv_w[L], 0), jnp.bfloat16)
            aff_idx[L] = add(np.stack(conv_aff[L], 0))
    wo = np.stack([_pack_conv1(np.asarray(params["out_conv1"]["w"], np.float32), H),
                   _pack_conv1(np.asarray(params["out_conv2"]["w"], np.float32), H)], 0)
    affo = np.stack([np.stack([np.tile(np.asarray(params[k]["scale"], np.float32), H),
                               np.tile(np.asarray(params[k]["shift"], np.float32), H),
                               np.tile(np.asarray(params[k]["b"], np.float32), H)], 0)
                     for k in ("out_conv1", "out_conv2")], 0)
    wo_idx = add(wo, jnp.bfloat16)
    affo_idx = add(affo)

    HC0 = H * C

    # ---- the single fused kernel --------------------------------------------
    def kernel(*refs):
        x_ref, op, o_ref = refs[0], refs[1:-1], refs[-1]
        acts = {"x": x_ref[...]}
        for step in prog:
            tag = step[0]
            if tag == "pool":
                _, src, dst, si, di, hoc = step
                dec = None if di is None else op[di][...]
                acts[dst] = _maxpool(acts[src], op[si][...], dec, hoc)
            elif tag == "blocks":
                _, src, dst, L, start, nb = step
                v = acts[src]
                for bidx in range(nb):
                    v = _resblock(v, op[wk_idx[L]], op[aff_idx[L]], start + 2 * bidx)
                acts[dst] = v
            elif tag == "upadd":
                _, src, dst, ui, pi, Db, aA, aB = step
                y = _upsample(acts[src], op[ui][...],
                              None if pi is None else op[pi][...], Db)
                if aA is not None:
                    y = y + acts[aA] + acts[aB]
                acts[dst] = y
            else:  # "outres"
                _, src, dst = step
                v = _conv1x1(acts[src], op[wo_idx][0], op[affo_idx][0], sigmoid=False)
                v = _conv1x1(v, op[wo_idx][1], op[affo_idx][1], sigmoid=True)
                acts[dst] = v
        o_ref[...] = acts["out"]

    def _const_map(ndim):
        zeros = (0,) * ndim
        return lambda b: zeros

    in_specs = [pl.BlockSpec((D, HC0), lambda b: (b, 0))]
    in_specs += [pl.BlockSpec(o.shape, _const_map(o.ndim)) for o in operands]

    call = pl.pallas_call(
        kernel,
        out_shape=jax.ShapeDtypeStruct((B * D, HC0), jnp.float32),
        grid=(B,),
        in_specs=in_specs,
        out_specs=pl.BlockSpec((D, HC0), lambda b: (b, 0)),
        compiler_params=pltpu.CompilerParams(dimension_semantics=("parallel",)),
    )

    def forward(x):
        # NCDHW(S) -> per-(batch,slice) row blocks with lane-dense (h, c) packing
        xb = jnp.transpose(x, (0, 4, 2, 3, 1)).astype(jnp.float32).reshape(B * D, HC0)
        out = call(xb, *operands)
        y = out.reshape(N, S, D, H, C)
        return jnp.transpose(y, (0, 4, 2, 3, 1))              # back to (N, C, D, H, S)

    return jax.jit(forward)


# ----------------------------------- main ------------------------------------

if __name__ == "__main__":
    key = jax.random.PRNGKey(0)
    kp, kx = jax.random.split(key)

    in_ch = out_ch = 8
    N, D, H, S = 2, 16, 16, 3                                 # H * C = 128 lanes at level 0
    params = init_soft_mask_branch(kp, in_ch, out_ch, r=1, stage=0)
    fwd = build_soft_mask_branch(params, N, in_ch, D, H, S)

    # PyTorch NCDHW input: batch=2, channels=8, D=H=16, 3 thin slices on the last axis.
    x = jax.random.normal(kx, (N, in_ch, D, H, S), jnp.float32)

    y = fwd(x)
    jax.block_until_ready(y)

    assert y.shape == (N, out_ch, D, H, S), y.shape
    assert bool(jnp.all(jnp.isfinite(y)))
    assert bool(jnp.all((y >= 0.0) & (y <= 1.0)))             # sigmoid output is a [0,1] mask
    print("KERNEL_OK")
</pallas_src>

<mosaic_0001>
module attributes {stable_mosaic.version = 11 : i64} {
  func.func @kernel(%arg0: i32, %arg1: memref<16x128xf32, #tpu.memory_space<vmem>>, %arg2: memref<128x192xf32, #tpu.memory_space<vmem>>, %arg3: memref<8x16xf32, #tpu.memory_space<vmem>>, %arg4: memref<64x96xf32, #tpu.memory_space<vmem>>, %arg5: memref<4x8xf32, #tpu.memory_space<vmem>>, %arg6: memref<32x48xf32, #tpu.memory_space<vmem>>, %arg7: memref<2x4xf32, #tpu.memory_space<vmem>>, %arg8: memref<16x24xf32, #tpu.memory_space<vmem>>, %arg9: memref<8x16xf32, #tpu.memory_space<vmem>>, %arg10: memref<16x32xf32, #tpu.memory_space<vmem>>, %arg11: memref<4x2xf32, #tpu.memory_space<vmem>>, %arg12: memref<32x64xf32, #tpu.memory_space<vmem>>, %arg13: memref<8x4xf32, #tpu.memory_space<vmem>>, %arg14: memref<64x128xf32, #tpu.memory_space<vmem>>, %arg15: memref<16x8xf32, #tpu.memory_space<vmem>>, %arg16: memref<6x192x64xbf16, #tpu.memory_space<vmem>>, %arg17: memref<6x3x64xf32, #tpu.memory_space<vmem>>, %arg18: memref<6x96x32xbf16, #tpu.memory_space<vmem>>, %arg19: memref<6x3x32xf32, #tpu.memory_space<vmem>>, %arg20: memref<6x48x16xbf16, #tpu.memory_space<vmem>>, %arg21: memref<6x3x16xf32, #tpu.memory_space<vmem>>, %arg22: memref<4x24x8xbf16, #tpu.memory_space<vmem>>, %arg23: memref<4x3x8xf32, #tpu.memory_space<vmem>>, %arg24: memref<2x128x128xbf16, #tpu.memory_space<vmem>>, %arg25: memref<2x3x128xf32, #tpu.memory_space<vmem>>, %arg26: memref<16x128xf32, #tpu.memory_space<vmem>>) attributes {dimension_semantics = [#tpu.dimension_semantics<parallel>], iteration_bounds = array<i64: 6>, scalar_prefetch = 0 : i64, scratch_operands = 0 : i64, tpu.core_type = #tpu.core_type<tc>, window_params = [{transform_indices = @transform_0, window_bounds = array<i64: 16, 128>}, {pipeline_mode = #tpu.pipeline_mode<synchronous>, transform_indices = @transform_1, window_bounds = array<i64: 128, 192>}, {pipeline_mode = #tpu.pipeline_mode<synchronous>, transform_indices = @transform_2, window_bounds = array<i64: 8, 16>}, {pipeline_mode = #tpu.pipeline_mode<synchronous>, transform_indices = @transform_3, window_bounds = array<i64: 64, 96>}, {pipeline_mode = #tpu.pipeline_mode<synchronous>, transform_indices = @transform_4, window_bounds = array<i64: 4, 8>}, {pipeline_mode = #tpu.pipeline_mode<synchronous>, transform_indices = @transform_5, window_bounds = array<i64: 32, 48>}, {pipeline_mode = #tpu.pipeline_mode<synchronous>, transform_indices = @transform_6, window_bounds = array<i64: 2, 4>}, {pipeline_mode = #tpu.pipeline_mode<synchronous>, transform_indices = @transform_7, window_bounds = array<i64: 16, 24>}, {pipeline_mode = #tpu.pipeline_mode<synchronous>, transform_indices = @transform_8, window_bounds = array<i64: 8, 16>}, {pipeline_mode = #tpu.pipeline_mode<synchronous>, transform_indices = @transform_9, window_bounds = array<i64: 16, 32>}, {pipeline_mode = #tpu.pipeline_mode<synchronous>, transform_indices = @transform_10, window_bounds = array<i64: 4, 2>}, {pipeline_mode = #tpu.pipeline_mode<synchronous>, transform_indices = @transform_11, window_bounds = array<i64: 32, 64>}, {pipeline_mode = #tpu.pipeline_mode<synchronous>, transform_indices = @transform_12, window_bounds = array<i64: 8, 4>}, {pipeline_mode = #tpu.pipeline_mode<synchronous>, transform_indices = @transform_13, window_bounds = array<i64: 64, 128>}, {pipeline_mode = #tpu.pipeline_mode<synchronous>, transform_indices = @transform_14, window_bounds = array<i64: 16, 8>}, {pipeline_mode = #tpu.pipeline_mode<synchronous>, transform_indices = @transform_15, window_bounds = array<i64: 6, 192, 64>}, {pipeline_mode = #tpu.pipeline_mode<synchronous>, transform_indices = @transform_16, window_bounds = array<i64: 6, 3, 64>}, {pipeline_mode = #tpu.pipeline_mode<synchronous>, transform_indices = @transform_17, window_bounds = array<i64: 6, 96, 32>}, {pipeline_mode = #tpu.pipeline_mode<synchronous>, transform_indices = @transform_18, window_bounds = array<i64: 6, 3, 32>}, {pipeline_mode = #tpu.pipeline_mode<synchronous>, transform_indices = @transform_19, window_bounds = array<i64: 6, 48, 16>}, {pipeline_mode = #tpu.pipeline_mode<synchronous>, transform_indices = @transform_20, window_bounds = array<i64: 6, 3, 16>}, {pipeline_mode = #tpu.pipeline_mode<synchronous>, transform_indices = @transform_21, window_bounds = array<i64: 4, 24, 8>}, {pipeline_mode = #tpu.pipeline_mode<synchronous>, transform_indices = @transform_22, window_bounds = array<i64: 4, 3, 8>}, {pipeline_mode = #tpu.pipeline_mode<synchronous>, transform_indices = @transform_23, window_bounds = array<i64: 2, 128, 128>}, {pipeline_mode = #tpu.pipeline_mode<synchronous>, transform_indices = @transform_24, window_bounds = array<i64: 2, 3, 128>}, {transform_indices = @transform_25, window_bounds = array<i64: 16, 128>}]} {
    %c0 = arith.constant 0 : index
    %c0_0 = arith.constant 0 : index
    %0 = vector.load %arg1[%c0, %c0_0] : memref<16x128xf32, #tpu.memory_space<vmem>>, vector<16x128xf32>
    %c0_1 = arith.constant 0 : index
    %c0_2 = arith.constant 0 : index
    %1 = vector.load %arg3[%c0_1, %c0_2] : memref<8x16xf32, #tpu.memory_space<vmem>>, vector<8x16xf32>
    %c0_3 = arith.constant 0 : index
    %c0_4 = arith.constant 0 : index
    %2 = vector.load %arg2[%c0_3, %c0_4] : memref<128x192xf32, #tpu.memory_space<vmem>>, vector<128x192xf32>
    %cst = arith.constant dense<0.000000e+00> : vector<16x192xf32>
    %3 = tpu.matmul %0, %2, %cst {dimension_numbers = #tpu.dot_dimension_numbers<[1], [0], [0], [1], [0, 0, 1, 1], [], []>} : vector<16x128xf32>, vector<128x192xf32>, vector<16x192xf32> -> vector<16x192xf32>
    %4 = vector.extract_strided_slice %3 {offsets = [0, 0], sizes = [16, 64], strides = [1, 1]} : vector<16x192xf32> to vector<16x64xf32>
    %5 = vector.extract_strided_slice %3 {offsets = [0, 64], sizes = [16, 64], strides = [1, 1]} : vector<16x192xf32> to vector<16x64xf32>
    %6 = arith.maximumf %4, %5 : vector<16x64xf32>
    %7 = vector.extract_strided_slice %3 {offsets = [0, 128], sizes = [16, 64], strides = [1, 1]} : vector<16x192xf32> to vector<16x64xf32>
    %8 = arith.maximumf %6, %7 : vector<16x64xf32>
    %9 = vector.extract_strided_slice %8 {offsets = [0, 0], sizes = [1, 64], strides = [1, 1]} : vector<16x64xf32> to vector<1x64xf32>
    %10 = vector.extract_strided_slice %8 {offsets = [0, 0], sizes = [15, 64], strides = [1, 1]} : vector<16x64xf32> to vector<15x64xf32>
    %11 = tpu.concatenate %9, %10 in 0 : vector<1x64xf32>, vector<15x64xf32> -> vector<16x64xf32>
    %12 = vector.extract_strided_slice %8 {offsets = [1, 0], sizes = [15, 64], strides = [1, 1]} : vector<16x64xf32> to vector<15x64xf32>
    %13 = vector.extract_strided_slice %8 {offsets = [15, 0], sizes = [1, 64], strides = [1, 1]} : vector<16x64xf32> to vector<1x64xf32>
    %14 = tpu.concatenate %12, %13 in 0 : vector<15x64xf32>, vector<1x64xf32> -> vector<16x64xf32>
    %15 = arith.maximumf %11, %8 : vector<16x64xf32>
    %16 = arith.maximumf %15, %14 : vector<16x64xf32>
    %cst_5 = arith.constant dense<0.000000e+00> : vector<8x64xf32>
    %17 = tpu.matmul %1, %16, %cst_5 {dimension_numbers = #tpu.dot_dimension_numbers<[1], [0], [0], [1], [0, 0, 1, 1], [], []>} : vector<8x16xf32>, vector<16x64xf32>, vector<8x64xf32> -> vector<8x64xf32>
    %c0_6 = arith.constant 0 : index
    %c0_7 = arith.constant 0 : index
    %c0_8 = arith.constant 0 : index
    %18 = vector.load %arg17[%c0_6, %c0_7, %c0_8] : memref<6x3x64xf32, #tpu.memory_space<vmem>>, vector<1x3x64xf32>
    %19 = vector.shape_cast %18 : vector<1x3x64xf32> to vector<3x64xf32>
    %20 = vector.extract_strided_slice %19 {offsets = [0, 0], sizes = [1, 64], strides = [1, 1]} : vector<3x64xf32> to vector<1x64xf32>
    %21 = vector.broadcast %20 : vector<1x64xf32> to vector<8x64xf32>
    %22 = arith.mulf %17, %21 : vector<8x64xf32>
    %23 = vector.extract_strided_slice %19 {offsets = [1, 0], sizes = [1, 64], strides = [1, 1]} : vector<3x64xf32> to vector<1x64xf32>
    %24 = vector.broadcast %23 : vector<1x64xf32> to vector<8x64xf32>
    %25 = arith.addf %22, %24 : vector<8x64xf32>
    %cst_9 = arith.constant 0.000000e+00 : f32
    %26 = vector.broadcast %cst_9 : f32 to vector<8x64xf32>
    %27 = arith.maximumf %25, %26 : vector<8x64xf32>
    %c0_10 = arith.constant 0 : index
    %c0_11 = arith.constant 0 : index
    %c0_12 = arith.constant 0 : index
    %28 = vector.load %arg16[%c0_10, %c0_11, %c0_12] : memref<6x192x64xbf16, #tpu.memory_space<vmem>>, vector<1x192x64xbf16>
    %29 = vector.shape_cast %28 : vector<1x192x64xbf16> to vector<192x64xbf16>
    %30 = vector.extract_strided_slice %19 {offsets = [2, 0], sizes = [1, 64], strides = [1, 1]} : vector<3x64xf32> to vector<1x64xf32>
    %cst_13 = arith.constant 0.000000e+00 : f32
    %31 = vector.broadcast %cst_13 : f32 to vector<1x64xf32>
    %32 = vector.extract_strided_slice %27 {offsets = [0, 0], sizes = [7, 64], strides = [1, 1]} : vector<8x64xf32> to vector<7x64xf32>
    %33 = tpu.concatenate %31, %32 in 0 : vector<1x64xf32>, vector<7x64xf32> -> vector<8x64xf32>
    %34 = vector.extract_strided_slice %27 {offsets = [1, 0], sizes = [7, 64], strides = [1, 1]} : vector<8x64xf32> to vector<7x64xf32>
    %35 = tpu.concatenate %34, %31 in 0 : vector<7x64xf32>, vector<1x64xf32> -> vector<8x64xf32>
    %36 = tpu.concatenate %33, %27, %35 in 1 : vector<8x64xf32>, vector<8x64xf32>, vector<8x64xf32> -> vector<8x192xf32>
    %37 = arith.truncf %36 : vector<8x192xf32> to vector<8x192xbf16>
    %cst_14 = arith.constant dense<0.000000e+00> : vector<8x64xf32>
    %38 = tpu.matmul %37, %29, %cst_14 {dimension_numbers = #tpu.dot_dimension_numbers<[1], [0], [0], [1], [0, 0, 1, 1], [], []>} : vector<8x192xbf16>, vector<192x64xbf16>, vector<8x64xf32> -> vector<8x64xf32>
    %39 = vector.broadcast %30 : vector<1x64xf32> to vector<8x64xf32>
    %40 = arith.addf %38, %39 : vector<8x64xf32>
    %c1 = arith.constant 1 : index
    %c0_15 = arith.constant 0 : index
    %c0_16 = arith.constant 0 : index
    %41 = vector.load %arg17[%c1, %c0_15, %c0_16] : memref<6x3x64xf32, #tpu.memory_space<vmem>>, vector<1x3x64xf32>
    %42 = vector.shape_cast %41 : vector<1x3x64xf32> to vector<3x64xf32>
    %43 = vector.extract_strided_slice %42 {offsets = [0, 0], sizes = [1, 64], strides = [1, 1]} : vector<3x64xf32> to vector<1x64xf32>
    %44 = vector.broadcast %43 : vector<1x64xf32> to vector<8x64xf32>
    %45 = arith.mulf %40, %44 : vector<8x64xf32>
    %46 = vector.extract_strided_slice %42 {offsets = [1, 0], sizes = [1, 64], strides = [1, 1]} : vector<3x64xf32> to vector<1x64xf32>
    %47 = vector.broadcast %46 : vector<1x64xf32> to vector<8x64xf32>
    %48 = arith.addf %45, %47 : vector<8x64xf32>
    %cst_17 = arith.constant 0.000000e+00 : f32
    %49 = vector.broadcast %cst_17 : f32 to vector<8x64xf32>
    %50 = arith.maximumf %48, %49 : vector<8x64xf32>
    %c1_18 = arith.constant 1 : index
    %c0_19 = arith.constant 0 : index
    %c0_20 = arith.constant 0 : index
    %51 = vector.load %arg16[%c1_18, %c0_19, %c0_20] : memref<6x192x64xbf16, #tpu.memory_space<vmem>>, vector<1x192x64xbf16>
    %52 = vector.shape_cast %51 : vector<1x192x64xbf16> to vector<192x64xbf16>
    %53 = vector.extract_strided_slice %42 {offsets = [2, 0], sizes = [1, 64], strides = [1, 1]} : vector<3x64xf32> to vector<1x64xf32>
    %cst_21 = arith.constant 0.000000e+00 : f32
    %54 = vector.broadcast %cst_21 : f32 to vector<1x64xf32>
    %55 = vector.extract_strided_slice %50 {offsets = [0, 0], sizes = [7, 64], strides = [1, 1]} : vector<8x64xf32> to vector<7x64xf32>
    %56 = tpu.concatenate %54, %55 in 0 : vector<1x64xf32>, vector<7x64xf32> -> vector<8x64xf32>
    %57 = vector.extract_strided_slice %50 {offsets = [1, 0], sizes = [7, 64], strides = [1, 1]} : vector<8x64xf32> to vector<7x64xf32>
    %58 = tpu.concatenate %57, %54 in 0 : vector<7x64xf32>, vector<1x64xf32> -> vector<8x64xf32>
    %59 = tpu.concatenate %56, %50, %58 in 1 : vector<8x64xf32>, vector<8x64xf32>, vector<8x64xf32> -> vector<8x192xf32>
    %60 = arith.truncf %59 : vector<8x192xf32> to vector<8x192xbf16>
    %cst_22 = arith.constant dense<0.000000e+00> : vector<8x64xf32>
    %61 = tpu.matmul %60, %52, %cst_22 {dimension_numbers = #tpu.dot_dimension_numbers<[1], [0], [0], [1], [0, 0, 1, 1], [], []>} : vector<8x192xbf16>, vector<192x64xbf16>, vector<8x64xf32> -> vector<8x64xf32>
    %62 = vector.broadcast %53 : vector<1x64xf32> to vector<8x64xf32>
    %63 = arith.addf %61, %62 : vector<8x64xf32>
    %64 = arith.addf %63, %17 : vector<8x64xf32>
    %c2 = arith.constant 2 : index
    %c0_23 = arith.constant 0 : index
    %c0_24 = arith.constant 0 : index
    %65 = vector.load %arg17[%c2, %c0_23, %c0_24] : memref<6x3x64xf32, #tpu.memory_space<vmem>>, vector<1x3x64xf32>
    %66 = vector.shape_cast %65 : vector<1x3x64xf32> to vector<3x64xf32>
    %67 = vector.extract_strided_slice %66 {offsets = [0, 0], sizes = [1, 64], strides = [1, 1]} : vector<3x64xf32> to vector<1x64xf32>
    %68 = vector.broadcast %67 : vector<1x64xf32> to vector<8x64xf32>
    %69 = arith.mulf %64, %68 : vector<8x64xf32>
    %70 = vector.extract_strided_slice %66 {offsets = [1, 0], sizes = [1, 64], strides = [1, 1]} : vector<3x64xf32> to vector<1x64xf32>
    %71 = vector.broadcast %70 : vector<1x64xf32> to vector<8x64xf32>
    %72 = arith.addf %69, %71 : vector<8x64xf32>
    %cst_25 = arith.constant 0.000000e+00 : f32
    %73 = vector.broadcast %cst_25 : f32 to vector<8x64xf32>
    %74 = arith.maximumf %72, %73 : vector<8x64xf32>
    %c2_26 = arith.constant 2 : index
    %c0_27 = arith.constant 0 : index
    %c0_28 = arith.constant 0 : index
    %75 = vector.load %arg16[%c2_26, %c0_27, %c0_28] : memref<6x192x64xbf16, #tpu.memory_space<vmem>>, vector<1x192x64xbf16>
    %76 = vector.shape_cast %75 : vector<1x192x64xbf16> to vector<192x64xbf16>
    %77 = vector.extract_strided_slice %66 {offsets = [2, 0], sizes = [1, 64], strides = [1, 1]} : vector<3x64xf32> to vector<1x64xf32>
    %cst_29 = arith.constant 0.000000e+00 : f32
    %78 = vector.broadcast %cst_29 : f32 to vector<1x64xf32>
    %79 = vector.extract_strided_slice %74 {offsets = [0, 0], sizes = [7, 64], strides = [1, 1]} : vector<8x64xf32> to vector<7x64xf32>
    %80 = tpu.concatenate %78, %79 in 0 : vector<1x64xf32>, vector<7x64xf32> -> vector<8x64xf32>
    %81 = vector.extract_strided_slice %74 {offsets = [1, 0], sizes = [7, 64], strides = [1, 1]} : vector<8x64xf32> to vector<7x64xf32>
    %82 = tpu.concatenate %81, %78 in 0 : vector<7x64xf32>, vector<1x64xf32> -> vector<8x64xf32>
    %83 = tpu.concatenate %80, %74, %82 in 1 : vector<8x64xf32>, vector<8x64xf32>, vector<8x64xf32> -> vector<8x192xf32>
    %84 = arith.truncf %83 : vector<8x192xf32> to vector<8x192xbf16>
    %cst_30 = arith.constant dense<0.000000e+00> : vector<8x64xf32>
    %85 = tpu.matmul %84, %76, %cst_30 {dimension_numbers = #tpu.dot_dimension_numbers<[1], [0], [0], [1], [0, 0, 1, 1], [], []>} : vector<8x192xbf16>, vector<192x64xbf16>, vector<8x64xf32> -> vector<8x64xf32>
    %86 = vector.broadcast %77 : vector<1x64xf32> to vector<8x64xf32>
    %87 = arith.addf %85, %86 : vector<8x64xf32>
    %c3 = arith.constant 3 : index
    %c0_31 = arith.constant 0 : index
    %c0_32 = arith.constant 0 : index
    %88 = vector.load %arg17[%c3, %c0_31, %c0_32] : memref<6x3x64xf32, #tpu.memory_space<vmem>>, vector<1x3x64xf32>
    %89 = vector.shape_cast %88 : vector<1x3x64xf32> to vector<3x64xf32>
    %90 = vector.extract_strided_slice %89 {offsets = [0, 0], sizes = [1, 64], strides = [1, 1]} : vector<3x64xf32> to vector<1x64xf32>
    %91 = vector.broadcast %90 : vector<1x64xf32> to vector<8x64xf32>
    %92 = arith.mulf %87, %91 : vector<8x64xf32>
    %93 = vector.extract_strided_slice %89 {offsets = [1, 0], sizes = [1, 64], strides = [1, 1]} : vector<3x64xf32> to vector<1x64xf32>
    %94 = vector.broadcast %93 : vector<1x64xf32> to vector<8x64xf32>
    %95 = arith.addf %92, %94 : vector<8x64xf32>
    %cst_33 = arith.constant 0.000000e+00 : f32
    %96 = vector.broadcast %cst_33 : f32 to vector<8x64xf32>
    %97 = arith.maximumf %95, %96 : vector<8x64xf32>
    %c3_34 = arith.constant 3 : index
    %c0_35 = arith.constant 0 : index
    %c0_36 = arith.constant 0 : index
    %98 = vector.load %arg16[%c3_34, %c0_35, %c0_36] : memref<6x192x64xbf16, #tpu.memory_space<vmem>>, vector<1x192x64xbf16>
    %99 = vector.shape_cast %98 : vector<1x192x64xbf16> to vector<192x64xbf16>
    %100 = vector.extract_strided_slice %89 {offsets = [2, 0], sizes = [1, 64], strides = [1, 1]} : vector<3x64xf32> to vector<1x64xf32>
    %cst_37 = arith.constant 0.000000e+00 : f32
    %101 = vector.broadcast %cst_37 : f32 to vector<1x64xf32>
    %102 = vector.extract_strided_slice %97 {offsets = [0, 0], sizes = [7, 64], strides = [1, 1]} : vector<8x64xf32> to vector<7x64xf32>
    %103 = tpu.concatenate %101, %102 in 0 : vector<1x64xf32>, vector<7x64xf32> -> vector<8x64xf32>
    %104 = vector.extract_strided_slice %97 {offsets = [1, 0], sizes = [7, 64], strides = [1, 1]} : vector<8x64xf32> to vector<7x64xf32>
    %105 = tpu.concatenate %104, %101 in 0 : vector<7x64xf32>, vector<1x64xf32> -> vector<8x64xf32>
    %106 = tpu.concatenate %103, %97, %105 in 1 : vector<8x64xf32>, vector<8x64xf32>, vector<8x64xf32> -> vector<8x192xf32>
    %107 = arith.truncf %106 : vector<8x192xf32> to vector<8x192xbf16>
    %cst_38 = arith.constant dense<0.000000e+00> : vector<8x64xf32>
    %108 = tpu.matmul %107, %99, %cst_38 {dimension_numbers = #tpu.dot_dimension_numbers<[1], [0], [0], [1], [0, 0, 1, 1], [], []>} : vector<8x192xbf16>, vector<192x64xbf16>, vector<8x64xf32> -> vector<8x64xf32>
    %109 = vector.broadcast %100 : vector<1x64xf32> to vector<8x64xf32>
    %110 = arith.addf %108, %109 : vector<8x64xf32>
    %111 = arith.addf %110, %64 : vector<8x64xf32>
    %c0_39 = arith.constant 0 : index
    %c0_40 = arith.constant 0 : index
    %112 = vector.load %arg5[%c0_39, %c0_40] : memref<4x8xf32, #tpu.memory_space<vmem>>, vector<4x8xf32>
    %c0_41 = arith.constant 0 : index
    %c0_42 = arith.constant 0 : index
    %113 = vector.load %arg4[%c0_41, %c0_42] : memref<64x96xf32, #tpu.memory_space<vmem>>, vector<64x96xf32>
    %cst_43 = arith.constant dense<0.000000e+00> : vector<8x96xf32>
    %114 = tpu.matmul %64, %113, %cst_43 {dimension_numbers = #tpu.dot_dimension_numbers<[1], [0], [0], [1], [0, 0, 1, 1], [], []>} : vector<8x64xf32>, vector<64x96xf32>, vector<8x96xf32> -> vector<8x96xf32>
    %115 = vector.extract_strided_slice %114 {offsets = [0, 0], sizes = [8, 32], strides = [1, 1]} : vector<8x96xf32> to vector<8x32xf32>
    %116 = vector.extract_strided_slice %114 {offsets = [0, 32], sizes = [8, 32], strides = [1, 1]} : vector<8x96xf32> to vector<8x32xf32>
    %117 = arith.maximumf %115, %116 : vector<8x32xf32>
    %118 = vector.extract_strided_slice %114 {offsets = [0, 64], sizes = [8, 32], strides = [1, 1]} : vector<8x96xf32> to vector<8x32xf32>
    %119 = arith.maximumf %117, %118 : vector<8x32xf32>
    %120 = vector.extract_strided_slice %119 {offsets = [0, 0], sizes = [1, 32], strides = [1, 1]} : vector<8x32xf32> to vector<1x32xf32>
    %121 = vector.extract_strided_slice %119 {offsets = [0, 0], sizes = [7, 32], strides = [1, 1]} : vector<8x32xf32> to vector<7x32xf32>
    %122 = tpu.concatenate %120, %121 in 0 : vector<1x32xf32>, vector<7x32xf32> -> vector<8x32xf32>
    %123 = vector.extract_strided_slice %119 {offsets = [1, 0], sizes = [7, 32], strides = [1, 1]} : vector<8x32xf32> to vector<7x32xf32>
    %124 = vector.extract_strided_slice %119 {offsets = [7, 0], sizes = [1, 32], strides = [1, 1]} : vector<8x32xf32> to vector<1x32xf32>
    %125 = tpu.concatenate %123, %124 in 0 : vector<7x32xf32>, vector<1x32xf32> -> vector<8x32xf32>
    %126 = arith.maximumf %122, %119 : vector<8x32xf32>
    %127 = arith.maximumf %126, %125 : vector<8x32xf32>
    %cst_44 = arith.constant dense<0.000000e+00> : vector<4x32xf32>
    %128 = tpu.matmul %112, %127, %cst_44 {dimension_numbers = #tpu.dot_dimension_numbers<[1], [0], [0], [1], [0, 0, 1, 1], [], []>} : vector<4x8xf32>, vector<8x32xf32>, vector<4x32xf32> -> vector<4x32xf32>
    %c0_45 = arith.constant 0 : index
    %c0_46 = arith.constant 0 : index
    %c0_47 = arith.constant 0 : index
    %129 = vector.load %arg19[%c0_45, %c0_46, %c0_47] : memref<6x3x32xf32, #tpu.memory_space<vmem>>, vector<1x3x32xf32>
    %130 = vector.shape_cast %129 : vector<1x3x32xf32> to vector<3x32xf32>
    %131 = vector.extract_strided_slice %130 {offsets = [0, 0], sizes = [1, 32], strides = [1, 1]} : vector<3x32xf32> to vector<1x32xf32>
    %132 = vector.broadcast %131 : vector<1x32xf32> to vector<4x32xf32>
    %133 = arith.mulf %128, %132 : vector<4x32xf32>
    %134 = vector.extract_strided_slice %130 {offsets = [1, 0], sizes = [1, 32], strides = [1, 1]} : vector<3x32xf32> to vector<1x32xf32>
    %135 = vector.broadcast %134 : vector<1x32xf32> to vector<4x32xf32>
    %136 = arith.addf %133, %135 : vector<4x32xf32>
    %cst_48 = arith.constant 0.000000e+00 : f32
    %137 = vector.broadcast %cst_48 : f32 to vector<4x32xf32>
    %138 = arith.maximumf %136, %137 : vector<4x32xf32>
    %c0_49 = arith.constant 0 : index
    %c0_50 = arith.constant 0 : index
    %c0_51 = arith.constant 0 : index
    %139 = vector.load %arg18[%c0_49, %c0_50, %c0_51] : memref<6x96x32xbf16, #tpu.memory_space<vmem>>, vector<1x96x32xbf16>
    %140 = vector.shape_cast %139 : vector<1x96x32xbf16> to vector<96x32xbf16>
    %141 = vector.extract_strided_slice %130 {offsets = [2, 0], sizes = [1, 32], strides = [1, 1]} : vector<3x32xf32> to vector<1x32xf32>
    %cst_52 = arith.constant 0.000000e+00 : f32
    %142 = vector.broadcast %cst_52 : f32 to vector<1x32xf32>
    %143 = vector.extract_strided_slice %138 {offsets = [0, 0], sizes = [3, 32], strides = [1, 1]} : vector<4x32xf32> to vector<3x32xf32>
    %144 = tpu.concatenate %142, %143 in 0 : vector<1x32xf32>, vector<3x32xf32> -> vector<4x32xf32>
    %145 = vector.extract_strided_slice %138 {offsets = [1, 0], sizes = [3, 32], strides = [1, 1]} : vector<4x32xf32> to vector<3x32xf32>
    %146 = tpu.concatenate %145, %142 in 0 : vector<3x32xf32>, vector<1x32xf32> -> vector<4x32xf32>
    %147 = tpu.concatenate %144, %138, %146 in 1 : vector<4x32xf32>, vector<4x32xf32>, vector<4x32xf32> -> vector<4x96xf32>
    %148 = arith.truncf %147 : vector<4x96xf32> to vector<4x96xbf16>
    %cst_53 = arith.constant dense<0.000000e+00> : vector<4x32xf32>
    %149 = tpu.matmul %148, %140, %cst_53 {dimension_numbers = #tpu.dot_dimension_numbers<[1], [0], [0], [1], [0, 0, 1, 1], [], []>} : vector<4x96xbf16>, vector<96x32xbf16>, vector<4x32xf32> -> vector<4x32xf32>
    %150 = vector.broadcast %141 : vector<1x32xf32> to vector<4x32xf32>
    %151 = arith.addf %149, %150 : vector<4x32xf32>
    %c1_54 = arith.constant 1 : index
    %c0_55 = arith.constant 0 : index
    %c0_56 = arith.constant 0 : index
    %152 = vector.load %arg19[%c1_54, %c0_55, %c0_56] : memref<6x3x32xf32, #tpu.memory_space<vmem>>, vector<1x3x32xf32>
    %153 = vector.shape_cast %152 : vector<1x3x32xf32> to vector<3x32xf32>
    %154 = vector.extract_strided_slice %153 {offsets = [0, 0], sizes = [1, 32], strides = [1, 1]} : vector<3x32xf32> to vector<1x32xf32>
    %155 = vector.broadcast %154 : vector<1x32xf32> to vector<4x32xf32>
    %156 = arith.mulf %151, %155 : vector<4x32xf32>
    %157 = vector.extract_strided_slice %153 {offsets = [1, 0], sizes = [1, 32], strides = [1, 1]} : vector<3x32xf32> to vector<1x32xf32>
    %158 = vector.broadcast %157 : vector<1x32xf32> to vector<4x32xf32>
    %159 = arith.addf %156, %158 : vector<4x32xf32>
    %cst_57 = arith.constant 0.000000e+00 : f32
    %160 = vector.broadcast %cst_57 : f32 to vector<4x32xf32>
    %161 = arith.maximumf %159, %160 : vector<4x32xf32>
    %c1_58 = arith.constant 1 : index
    %c0_59 = arith.constant 0 : index
    %c0_60 = arith.constant 0 : index
    %162 = vector.load %arg18[%c1_58, %c0_59, %c0_60] : memref<6x96x32xbf16, #tpu.memory_space<vmem>>, vector<1x96x32xbf16>
    %163 = vector.shape_cast %162 : vector<1x96x32xbf16> to vector<96x32xbf16>
    %164 = vector.extract_strided_slice %153 {offsets = [2, 0], sizes = [1, 32], strides = [1, 1]} : vector<3x32xf32> to vector<1x32xf32>
    %cst_61 = arith.constant 0.000000e+00 : f32
    %165 = vector.broadcast %cst_61 : f32 to vector<1x32xf32>
    %166 = vector.extract_strided_slice %161 {offsets = [0, 0], sizes = [3, 32], strides = [1, 1]} : vector<4x32xf32> to vector<3x32xf32>
    %167 = tpu.concatenate %165, %166 in 0 : vector<1x32xf32>, vector<3x32xf32> -> vector<4x32xf32>
    %168 = vector.extract_strided_slice %161 {offsets = [1, 0], sizes = [3, 32], strides = [1, 1]} : vector<4x32xf32> to vector<3x32xf32>
    %169 = tpu.concatenate %168, %165 in 0 : vector<3x32xf32>, vector<1x32xf32> -> vector<4x32xf32>
    %170 = tpu.concatenate %167, %161, %169 in 1 : vector<4x32xf32>, vector<4x32xf32>, vector<4x32xf32> -> vector<4x96xf32>
    %171 = arith.truncf %170 : vector<4x96xf32> to vector<4x96xbf16>
    %cst_62 = arith.constant dense<0.000000e+00> : vector<4x32xf32>
    %172 = tpu.matmul %171, %163, %cst_62 {dimension_numbers = #tpu.dot_dimension_numbers<[1], [0], [0], [1], [0, 0, 1, 1], [], []>} : vector<4x96xbf16>, vector<96x32xbf16>, vector<4x32xf32> -> vector<4x32xf32>
    %173 = vector.broadcast %164 : vector<1x32xf32> to vector<4x32xf32>
    %174 = arith.addf %172, %173 : vector<4x32xf32>
    %175 = arith.addf %174, %128 : vector<4x32xf32>
    %c2_63 = arith.constant 2 : index
    %c0_64 = arith.constant 0 : index
    %c0_65 = arith.constant 0 : index
    %176 = vector.load %arg19[%c2_63, %c0_64, %c0_65] : memref<6x3x32xf32, #tpu.memory_space<vmem>>, vector<1x3x32xf32>
    %177 = vector.shape_cast %176 : vector<1x3x32xf32> to vector<3x32xf32>
    %178 = vector.extract_strided_slice %177 {offsets = [0, 0], sizes = [1, 32], strides = [1, 1]} : vector<3x32xf32> to vector<1x32xf32>
    %179 = vector.broadcast %178 : vector<1x32xf32> to vector<4x32xf32>
    %180 = arith.mulf %175, %179 : vector<4x32xf32>
    %181 = vector.extract_strided_slice %177 {offsets = [1, 0], sizes = [1, 32], strides = [1, 1]} : vector<3x32xf32> to vector<1x32xf32>
    %182 = vector.broadcast %181 : vector<1x32xf32> to vector<4x32xf32>
    %183 = arith.addf %180, %182 : vector<4x32xf32>
    %cst_66 = arith.constant 0.000000e+00 : f32
    %184 = vector.broadcast %cst_66 : f32 to vector<4x32xf32>
    %185 = arith.maximumf %183, %184 : vector<4x32xf32>
    %c2_67 = arith.constant 2 : index
    %c0_68 = arith.constant 0 : index
    %c0_69 = arith.constant 0 : index
    %186 = vector.load %arg18[%c2_67, %c0_68, %c0_69] : memref<6x96x32xbf16, #tpu.memory_space<vmem>>, vector<1x96x32xbf16>
    %187 = vector.shape_cast %186 : vector<1x96x32xbf16> to vector<96x32xbf16>
    %188 = vector.extract_strided_slice %177 {offsets = [2, 0], sizes = [1, 32], strides = [1, 1]} : vector<3x32xf32> to vector<1x32xf32>
    %cst_70 = arith.constant 0.000000e+00 : f32
    %189 = vector.broadcast %cst_70 : f32 to vector<1x32xf32>
    %190 = vector.extract_strided_slice %185 {offsets = [0, 0], sizes = [3, 32], strides = [1, 1]} : vector<4x32xf32> to vector<3x32xf32>
    %191 = tpu.concatenate %189, %190 in 0 : vector<1x32xf32>, vector<3x32xf32> -> vector<4x32xf32>
    %192 = vector.extract_strided_slice %185 {offsets = [1, 0], sizes = [3, 32], strides = [1, 1]} : vector<4x32xf32> to vector<3x32xf32>
    %193 = tpu.concatenate %192, %189 in 0 : vector<3x32xf32>, vector<1x32xf32> -> vector<4x32xf32>
    %194 = tpu.concatenate %191, %185, %193 in 1 : vector<4x32xf32>, vector<4x32xf32>, vector<4x32xf32> -> vector<4x96xf32>
    %195 = arith.truncf %194 : vector<4x96xf32> to vector<4x96xbf16>
    %cst_71 = arith.constant dense<0.000000e+00> : vector<4x32xf32>
    %196 = tpu.matmul %195, %187, %cst_71 {dimension_numbers = #tpu.dot_dimension_numbers<[1], [0], [0], [1], [0, 0, 1, 1], [], []>} : vector<4x96xbf16>, vector<96x32xbf16>, vector<4x32xf32> -> vector<4x32xf32>
    %197 = vector.broadcast %188 : vector<1x32xf32> to vector<4x32xf32>
    %198 = arith.addf %196, %197 : vector<4x32xf32>
    %c3_72 = arith.constant 3 : index
    %c0_73 = arith.constant 0 : index
    %c0_74 = arith.constant 0 : index
    %199 = vector.load %arg19[%c3_72, %c0_73, %c0_74] : memref<6x3x32xf32, #tpu.memory_space<vmem>>, vector<1x3x32xf32>
    %200 = vector.shape_cast %199 : vector<1x3x32xf32> to vector<3x32xf32>
    %201 = vector.extract_strided_slice %200 {offsets = [0, 0], sizes = [1, 32], strides = [1, 1]} : vector<3x32xf32> to vector<1x32xf32>
    %202 = vector.broadcast %201 : vector<1x32xf32> to vector<4x32xf32>
    %203 = arith.mulf %198, %202 : vector<4x32xf32>
    %204 = vector.extract_strided_slice %200 {offsets = [1, 0], sizes = [1, 32], strides = [1, 1]} : vector<3x32xf32> to vector<1x32xf32>
    %205 = vector.broadcast %204 : vector<1x32xf32> to vector<4x32xf32>
    %206 = arith.addf %203, %205 : vector<4x32xf32>
    %cst_75 = arith.constant 0.000000e+00 : f32
    %207 = vector.broadcast %cst_75 : f32 to vector<4x32xf32>
    %208 = arith.maximumf %206, %207 : vector<4x32xf32>
    %c3_76 = arith.constant 3 : index
    %c0_77 = arith.constant 0 : index
    %c0_78 = arith.constant 0 : index
    %209 = vector.load %arg18[%c3_76, %c0_77, %c0_78] : memref<6x96x32xbf16, #tpu.memory_space<vmem>>, vector<1x96x32xbf16>
    %210 = vector.shape_cast %209 : vector<1x96x32xbf16> to vector<96x32xbf16>
    %211 = vector.extract_strided_slice %200 {offsets = [2, 0], sizes = [1, 32], strides = [1, 1]} : vector<3x32xf32> to vector<1x32xf32>
    %cst_79 = arith.constant 0.000000e+00 : f32
    %212 = vector.broadcast %cst_79 : f32 to vector<1x32xf32>
    %213 = vector.extract_strided_slice %208 {offsets = [0, 0], sizes = [3, 32], strides = [1, 1]} : vector<4x32xf32> to vector<3x32xf32>
    %214 = tpu.concatenate %212, %213 in 0 : vector<1x32xf32>, vector<3x32xf32> -> vector<4x32xf32>
    %215 = vector.extract_strided_slice %208 {offsets = [1, 0], sizes = [3, 32], strides = [1, 1]} : vector<4x32xf32> to vector<3x32xf32>
    %216 = tpu.concatenate %215, %212 in 0 : vector<3x32xf32>, vector<1x32xf32> -> vector<4x32xf32>
    %217 = tpu.concatenate %214, %208, %216 in 1 : vector<4x32xf32>, vector<4x32xf32>, vector<4x32xf32> -> vector<4x96xf32>
    %218 = arith.truncf %217 : vector<4x96xf32> to vector<4x96xbf16>
    %cst_80 = arith.constant dense<0.000000e+00> : vector<4x32xf32>
    %219 = tpu.matmul %218, %210, %cst_80 {dimension_numbers = #tpu.dot_dimension_numbers<[1], [0], [0], [1], [0, 0, 1, 1], [], []>} : vector<4x96xbf16>, vector<96x32xbf16>, vector<4x32xf32> -> vector<4x32xf32>
    %220 = vector.broadcast %211 : vector<1x32xf32> to vector<4x32xf32>
    %221 = arith.addf %219, %220 : vector<4x32xf32>
    %222 = arith.addf %221, %175 : vector<4x32xf32>
    %c0_81 = arith.constant 0 : index
    %c0_82 = arith.constant 0 : index
    %223 = vector.load %arg7[%c0_81, %c0_82] : memref<2x4xf32, #tpu.memory_space<vmem>>, vector<2x4xf32>
    %c0_83 = arith.constant 0 : index
    %c0_84 = arith.constant 0 : index
    %224 = vector.load %arg6[%c0_83, %c0_84] : memref<32x48xf32, #tpu.memory_space<vmem>>, vector<32x48xf32>
    %cst_85 = arith.constant dense<0.000000e+00> : vector<4x48xf32>
    %225 = tpu.matmul %175, %224, %cst_85 {dimension_numbers = #tpu.dot_dimension_numbers<[1], [0], [0], [1], [0, 0, 1, 1], [], []>} : vector<4x32xf32>, vector<32x48xf32>, vector<4x48xf32> -> vector<4x48xf32>
    %226 = vector.extract_strided_slice %225 {offsets = [0, 0], sizes = [4, 16], strides = [1, 1]} : vector<4x48xf32> to vector<4x16xf32>
    %227 = vector.extract_strided_slice %225 {offsets = [0, 16], sizes = [4, 16], strides = [1, 1]} : vector<4x48xf32> to vector<4x16xf32>
    %228 = arith.maximumf %226, %227 : vector<4x16xf32>
    %229 = vector.extract_strided_slice %225 {offsets = [0, 32], sizes = [4, 16], strides = [1, 1]} : vector<4x48xf32> to vector<4x16xf32>
    %230 = arith.maximumf %228, %229 : vector<4x16xf32>
    %231 = vector.extract_strided_slice %230 {offsets = [0, 0], sizes = [1, 16], strides = [1, 1]} : vector<4x16xf32> to vector<1x16xf32>
    %232 = vector.extract_strided_slice %230 {offsets = [0, 0], sizes = [3, 16], strides = [1, 1]} : vector<4x16xf32> to vector<3x16xf32>
    %233 = tpu.concatenate %231, %232 in 0 : vector<1x16xf32>, vector<3x16xf32> -> vector<4x16xf32>
    %234 = vector.extract_strided_slice %230 {offsets = [1, 0], sizes = [3, 16], strides = [1, 1]} : vector<4x16xf32> to vector<3x16xf32>
    %235 = vector.extract_strided_slice %230 {offsets = [3, 0], sizes = [1, 16], strides = [1, 1]} : vector<4x16xf32> to vector<1x16xf32>
    %236 = tpu.concatenate %234, %235 in 0 : vector<3x16xf32>, vector<1x16xf32> -> vector<4x16xf32>
    %237 = arith.maximumf %233, %230 : vector<4x16xf32>
    %238 = arith.maximumf %237, %236 : vector<4x16xf32>
    %cst_86 = arith.constant dense<0.000000e+00> : vector<2x16xf32>
    %239 = tpu.matmul %223, %238, %cst_86 {dimension_numbers = #tpu.dot_dimension_numbers<[1], [0], [0], [1], [0, 0, 1, 1], [], []>} : vector<2x4xf32>, vector<4x16xf32>, vector<2x16xf32> -> vector<2x16xf32>
    %c0_87 = arith.constant 0 : index
    %c0_88 = arith.constant 0 : index
    %c0_89 = arith.constant 0 : index
    %240 = vector.load %arg21[%c0_87, %c0_88, %c0_89] : memref<6x3x16xf32, #tpu.memory_space<vmem>>, vector<1x3x16xf32>
    %241 = vector.shape_cast %240 : vector<1x3x16xf32> to vector<3x16xf32>
    %242 = vector.extract_strided_slice %241 {offsets = [0, 0], sizes = [1, 16], strides = [1, 1]} : vector<3x16xf32> to vector<1x16xf32>
    %243 = vector.broadcast %242 : vector<1x16xf32> to vector<2x16xf32>
    %244 = arith.mulf %239, %243 : vector<2x16xf32>
    %245 = vector.extract_strided_slice %241 {offsets = [1, 0], sizes = [1, 16], strides = [1, 1]} : vector<3x16xf32> to vector<1x16xf32>
    %246 = vector.broadcast %245 : vector<1x16xf32> to vector<2x16xf32>
    %247 = arith.addf %244, %246 : vector<2x16xf32>
    %cst_90 = arith.constant 0.000000e+00 : f32
    %248 = vector.broadcast %cst_90 : f32 to vector<2x16xf32>
    %249 = arith.maximumf %247, %248 : vector<2x16xf32>
    %c0_91 = arith.constant 0 : index
    %c0_92 = arith.constant 0 : index
    %c0_93 = arith.constant 0 : index
    %250 = vector.load %arg20[%c0_91, %c0_92, %c0_93] : memref<6x48x16xbf16, #tpu.memory_space<vmem>>, vector<1x48x16xbf16>
    %251 = vector.shape_cast %250 : vector<1x48x16xbf16> to vector<48x16xbf16>
    %252 = vector.extract_strided_slice %241 {offsets = [2, 0], sizes = [1, 16], strides = [1, 1]} : vector<3x16xf32> to vector<1x16xf32>
    %cst_94 = arith.constant 0.000000e+00 : f32
    %253 = vector.broadcast %cst_94 : f32 to vector<1x16xf32>
    %254 = vector.extract_strided_slice %249 {offsets = [0, 0], sizes = [1, 16], strides = [1, 1]} : vector<2x16xf32> to vector<1x16xf32>
    %255 = tpu.concatenate %253, %254 in 0 : vector<1x16xf32>, vector<1x16xf32> -> vector<2x16xf32>
    %256 = vector.extract_strided_slice %249 {offsets = [1, 0], sizes = [1, 16], strides = [1, 1]} : vector<2x16xf32> to vector<1x16xf32>
    %257 = tpu.concatenate %256, %253 in 0 : vector<1x16xf32>, vector<1x16xf32> -> vector<2x16xf32>
    %258 = tpu.concatenate %255, %249, %257 in 1 : vector<2x16xf32>, vector<2x16xf32>, vector<2x16xf32> -> vector<2x48xf32>
    %259 = arith.truncf %258 : vector<2x48xf32> to vector<2x48xbf16>
    %cst_95 = arith.constant dense<0.000000e+00> : vector<2x16xf32>
    %260 = tpu.matmul %259, %251, %cst_95 {dimension_numbers = #tpu.dot_dimension_numbers<[1], [0], [0], [1], [0, 0, 1, 1], [], []>} : vector<2x48xbf16>, vector<48x16xbf16>, vector<2x16xf32> -> vector<2x16xf32>
    %261 = vector.broadcast %252 : vector<1x16xf32> to vector<2x16xf32>
    %262 = arith.addf %260, %261 : vector<2x16xf32>
    %c1_96 = arith.constant 1 : index
    %c0_97 = arith.constant 0 : index
    %c0_98 = arith.constant 0 : index
    %263 = vector.load %arg21[%c1_96, %c0_97, %c0_98] : memref<6x3x16xf32, #tpu.memory_space<vmem>>, vector<1x3x16xf32>
    %264 = vector.shape_cast %263 : vector<1x3x16xf32> to vector<3x16xf32>
    %265 = vector.extract_strided_slice %264 {offsets = [0, 0], sizes = [1, 16], strides = [1, 1]} : vector<3x16xf32> to vector<1x16xf32>
    %266 = vector.broadcast %265 : vector<1x16xf32> to vector<2x16xf32>
    %267 = arith.mulf %262, %266 : vector<2x16xf32>
    %268 = vector.extract_strided_slice %264 {offsets = [1, 0], sizes = [1, 16], strides = [1, 1]} : vector<3x16xf32> to vector<1x16xf32>
    %269 = vector.broadcast %268 : vector<1x16xf32> to vector<2x16xf32>
    %270 = arith.addf %267, %269 : vector<2x16xf32>
    %cst_99 = arith.constant 0.000000e+00 : f32
    %271 = vector.broadcast %cst_99 : f32 to vector<2x16xf32>
    %272 = arith.maximumf %270, %271 : vector<2x16xf32>
    %c1_100 = arith.constant 1 : index
    %c0_101 = arith.constant 0 : index
    %c0_102 = arith.constant 0 : index
    %273 = vector.load %arg20[%c1_100, %c0_101, %c0_102] : memref<6x48x16xbf16, #tpu.memory_space<vmem>>, vector<1x48x16xbf16>
    %274 = vector.shape_cast %273 : vector<1x48x16xbf16> to vector<48x16xbf16>
    %275 = vector.extract_strided_slice %264 {offsets = [2, 0], sizes = [1, 16], strides = [1, 1]} : vector<3x16xf32> to vector<1x16xf32>
    %cst_103 = arith.constant 0.000000e+00 : f32
    %276 = vector.broadcast %cst_103 : f32 to vector<1x16xf32>
    %277 = vector.extract_strided_slice %272 {offsets = [0, 0], sizes = [1, 16], strides = [1, 1]} : vector<2x16xf32> to vector<1x16xf32>
    %278 = tpu.concatenate %276, %277 in 0 : vector<1x16xf32>, vector<1x16xf32> -> vector<2x16xf32>
    %279 = vector.extract_strided_slice %272 {offsets = [1, 0], sizes = [1, 16], strides = [1, 1]} : vector<2x16xf32> to vector<1x16xf32>
    %280 = tpu.concatenate %279, %276 in 0 : vector<1x16xf32>, vector<1x16xf32> -> vector<2x16xf32>
    %281 = tpu.concatenate %278, %272, %280 in 1 : vector<2x16xf32>, vector<2x16xf32>, vector<2x16xf32> -> vector<2x48xf32>
    %282 = arith.truncf %281 : vector<2x48xf32> to vector<2x48xbf16>
    %cst_104 = arith.constant dense<0.000000e+00> : vector<2x16xf32>
    %283 = tpu.matmul %282, %274, %cst_104 {dimension_numbers = #tpu.dot_dimension_numbers<[1], [0], [0], [1], [0, 0, 1, 1], [], []>} : vector<2x48xbf16>, vector<48x16xbf16>, vector<2x16xf32> -> vector<2x16xf32>
    %284 = vector.broadcast %275 : vector<1x16xf32> to vector<2x16xf32>
    %285 = arith.addf %283, %284 : vector<2x16xf32>
    %286 = arith.addf %285, %239 : vector<2x16xf32>
    %c2_105 = arith.constant 2 : index
    %c0_106 = arith.constant 0 : index
    %c0_107 = arith.constant 0 : index
    %287 = vector.load %arg21[%c2_105, %c0_106, %c0_107] : memref<6x3x16xf32, #tpu.memory_space<vmem>>, vector<1x3x16xf32>
    %288 = vector.shape_cast %287 : vector<1x3x16xf32> to vector<3x16xf32>
    %289 = vector.extract_strided_slice %288 {offsets = [0, 0], sizes = [1, 16], strides = [1, 1]} : vector<3x16xf32> to vector<1x16xf32>
    %290 = vector.broadcast %289 : vector<1x16xf32> to vector<2x16xf32>
    %291 = arith.mulf %286, %290 : vector<2x16xf32>
    %292 = vector.extract_strided_slice %288 {offsets = [1, 0], sizes = [1, 16], strides = [1, 1]} : vector<3x16xf32> to vector<1x16xf32>
    %293 = vector.broadcast %292 : vector<1x16xf32> to vector<2x16xf32>
    %294 = arith.addf %291, %293 : vector<2x16xf32>
    %cst_108 = arith.constant 0.000000e+00 : f32
    %295 = vector.broadcast %cst_108 : f32 to vector<2x16xf32>
    %296 = arith.maximumf %294, %295 : vector<2x16xf32>
    %c2_109 = arith.constant 2 : index
    %c0_110 = arith.constant 0 : index
    %c0_111 = arith.constant 0 : index
    %297 = vector.load %arg20[%c2_109, %c0_110, %c0_111] : memref<6x48x16xbf16, #tpu.memory_space<vmem>>, vector<1x48x16xbf16>
    %298 = vector.shape_cast %297 : vector<1x48x16xbf16> to vector<48x16xbf16>
    %299 = vector.extract_strided_slice %288 {offsets = [2, 0], sizes = [1, 16], strides = [1, 1]} : vector<3x16xf32> to vector<1x16xf32>
    %cst_112 = arith.constant 0.000000e+00 : f32
    %300 = vector.broadcast %cst_112 : f32 to vector<1x16xf32>
    %301 = vector.extract_strided_slice %296 {offsets = [0, 0], sizes = [1, 16], strides = [1, 1]} : vector<2x16xf32> to vector<1x16xf32>
    %302 = tpu.concatenate %300, %301 in 0 : vector<1x16xf32>, vector<1x16xf32> -> vector<2x16xf32>
    %303 = vector.extract_strided_slice %296 {offsets = [1, 0], sizes = [1, 16], strides = [1, 1]} : vector<2x16xf32> to vector<1x16xf32>
    %304 = tpu.concatenate %303, %300 in 0 : vector<1x16xf32>, vector<1x16xf32> -> vector<2x16xf32>
    %305 = tpu.concatenate %302, %296, %304 in 1 : vector<2x16xf32>, vector<2x16xf32>, vector<2x16xf32> -> vector<2x48xf32>
    %306 = arith.truncf %305 : vector<2x48xf32> to vector<2x48xbf16>
    %cst_113 = arith.constant dense<0.000000e+00> : vector<2x16xf32>
    %307 = tpu.matmul %306, %298, %cst_113 {dimension_numbers = #tpu.dot_dimension_numbers<[1], [0], [0], [1], [0, 0, 1, 1], [], []>} : vector<2x48xbf16>, vector<48x16xbf16>, vector<2x16xf32> -> vector<2x16xf32>
    %308 = vector.broadcast %299 : vector<1x16xf32> to vector<2x16xf32>
    %309 = arith.addf %307, %308 : vector<2x16xf32>
    %c3_114 = arith.constant 3 : index
    %c0_115 = arith.constant 0 : index
    %c0_116 = arith.constant 0 : index
    %310 = vector.load %arg21[%c3_114, %c0_115, %c0_116] : memref<6x3x16xf32, #tpu.memory_space<vmem>>, vector<1x3x16xf32>
    %311 = vector.shape_cast %310 : vector<1x3x16xf32> to vector<3x16xf32>
    %312 = vector.extract_strided_slice %311 {offsets = [0, 0], sizes = [1, 16], strides = [1, 1]} : vector<3x16xf32> to vector<1x16xf32>
    %313 = vector.broadcast %312 : vector<1x16xf32> to vector<2x16xf32>
    %314 = arith.mulf %309, %313 : vector<2x16xf32>
    %315 = vector.extract_strided_slice %311 {offsets = [1, 0], sizes = [1, 16], strides = [1, 1]} : vector<3x16xf32> to vector<1x16xf32>
    %316 = vector.broadcast %315 : vector<1x16xf32> to vector<2x16xf32>
    %317 = arith.addf %314, %316 : vector<2x16xf32>
    %cst_117 = arith.constant 0.000000e+00 : f32
    %318 = vector.broadcast %cst_117 : f32 to vector<2x16xf32>
    %319 = arith.maximumf %317, %318 : vector<2x16xf32>
    %c3_118 = arith.constant 3 : index
    %c0_119 = arith.constant 0 : index
    %c0_120 = arith.constant 0 : index
    %320 = vector.load %arg20[%c3_118, %c0_119, %c0_120] : memref<6x48x16xbf16, #tpu.memory_space<vmem>>, vector<1x48x16xbf16>
    %321 = vector.shape_cast %320 : vector<1x48x16xbf16> to vector<48x16xbf16>
    %322 = vector.extract_strided_slice %311 {offsets = [2, 0], sizes = [1, 16], strides = [1, 1]} : vector<3x16xf32> to vector<1x16xf32>
    %cst_121 = arith.constant 0.000000e+00 : f32
    %323 = vector.broadcast %cst_121 : f32 to vector<1x16xf32>
    %324 = vector.extract_strided_slice %319 {offsets = [0, 0], sizes = [1, 16], strides = [1, 1]} : vector<2x16xf32> to vector<1x16xf32>
    %325 = tpu.concatenate %323, %324 in 0 : vector<1x16xf32>, vector<1x16xf32> -> vector<2x16xf32>
    %326 = vector.extract_strided_slice %319 {offsets = [1, 0], sizes = [1, 16], strides = [1, 1]} : vector<2x16xf32> to vector<1x16xf32>
    %327 = tpu.concatenate %326, %323 in 0 : vector<1x16xf32>, vector<1x16xf32> -> vector<2x16xf32>
    %328 = tpu.concatenate %325, %319, %327 in 1 : vector<2x16xf32>, vector<2x16xf32>, vector<2x16xf32> -> vector<2x48xf32>
    %329 = arith.truncf %328 : vector<2x48xf32> to vector<2x48xbf16>
    %cst_122 = arith.constant dense<0.000000e+00> : vector<2x16xf32>
    %330 = tpu.matmul %329, %321, %cst_122 {dimension_numbers = #tpu.dot_dimension_numbers<[1], [0], [0], [1], [0, 0, 1, 1], [], []>} : vector<2x48xbf16>, vector<48x16xbf16>, vector<2x16xf32> -> vector<2x16xf32>
    %331 = vector.broadcast %322 : vector<1x16xf32> to vector<2x16xf32>
    %332 = arith.addf %330, %331 : vector<2x16xf32>
    %333 = arith.addf %332, %286 : vector<2x16xf32>
    %c0_123 = arith.constant 0 : index
    %c0_124 = arith.constant 0 : index
    %334 = vector.load %arg8[%c0_123, %c0_124] : memref<16x24xf32, #tpu.memory_space<vmem>>, vector<16x24xf32>
    %cst_125 = arith.constant dense<0.000000e+00> : vector<2x24xf32>
    %335 = tpu.matmul %286, %334, %cst_125 {dimension_numbers = #tpu.dot_dimension_numbers<[1], [0], [0], [1], [0, 0, 1, 1], [], []>} : vector<2x16xf32>, vector<16x24xf32>, vector<2x24xf32> -> vector<2x24xf32>
    %336 = vector.extract_strided_slice %335 {offsets = [0, 0], sizes = [2, 8], strides = [1, 1]} : vector<2x24xf32> to vector<2x8xf32>
    %337 = vector.extract_strided_slice %335 {offsets = [0, 8], sizes = [2, 8], strides = [1, 1]} : vector<2x24xf32> to vector<2x8xf32>
    %338 = arith.maximumf %336, %337 : vector<2x8xf32>
    %339 = vector.extract_strided_slice %335 {offsets = [0, 16], sizes = [2, 8], strides = [1, 1]} : vector<2x24xf32> to vector<2x8xf32>
    %340 = arith.maximumf %338, %339 : vector<2x8xf32>
    %341 = vector.extract_strided_slice %340 {offsets = [0, 0], sizes = [1, 8], strides = [1, 1]} : vector<2x8xf32> to vector<1x8xf32>
    %342 = vector.extract_strided_slice %340 {offsets = [0, 0], sizes = [1, 8], strides = [1, 1]} : vector<2x8xf32> to vector<1x8xf32>
    %343 = tpu.concatenate %341, %342 in 0 : vector<1x8xf32>, vector<1x8xf32> -> vector<2x8xf32>
    %344 = vector.extract_strided_slice %340 {offsets = [1, 0], sizes = [1, 8], strides = [1, 1]} : vector<2x8xf32> to vector<1x8xf32>
    %345 = vector.extract_strided_slice %340 {offsets = [1, 0], sizes = [1, 8], strides = [1, 1]} : vector<2x8xf32> to vector<1x8xf32>
    %346 = tpu.concatenate %344, %345 in 0 : vector<1x8xf32>, vector<1x8xf32> -> vector<2x8xf32>
    %347 = arith.maximumf %343, %340 : vector<2x8xf32>
    %348 = arith.maximumf %347, %346 : vector<2x8xf32>
    %349 = vector.extract_strided_slice %348 {offsets = [0, 0], sizes = [1, 8], strides = [1, 1]} : vector<2x8xf32> to vector<1x8xf32>
    %c0_126 = arith.constant 0 : index
    %c0_127 = arith.constant 0 : index
    %c0_128 = arith.constant 0 : index
    %350 = vector.load %arg23[%c0_126, %c0_127, %c0_128] : memref<4x3x8xf32, #tpu.memory_space<vmem>>, vector<1x3x8xf32>
    %351 = vector.shape_cast %350 : vector<1x3x8xf32> to vector<3x8xf32>
    %352 = vector.extract_strided_slice %351 {offsets = [0, 0], sizes = [1, 8], strides = [1, 1]} : vector<3x8xf32> to vector<1x8xf32>
    %353 = arith.mulf %349, %352 : vector<1x8xf32>
    %354 = vector.extract_strided_slice %351 {offsets = [1, 0], sizes = [1, 8], strides = [1, 1]} : vector<3x8xf32> to vector<1x8xf32>
    %355 = arith.addf %353, %354 : vector<1x8xf32>
    %cst_129 = arith.constant 0.000000e+00 : f32
    %356 = vector.broadcast %cst_129 : f32 to vector<1x8xf32>
    %357 = arith.maximumf %355, %356 : vector<1x8xf32>
    %c0_130 = arith.constant 0 : index
    %c0_131 = arith.constant 0 : index
    %c0_132 = arith.constant 0 : index
    %358 = vector.load %arg22[%c0_130, %c0_131, %c0_132] : memref<4x24x8xbf16, #tpu.memory_space<vmem>>, vector<1x24x8xbf16>
    %359 = vector.shape_cast %358 : vector<1x24x8xbf16> to vector<24x8xbf16>
    %360 = vector.extract_strided_slice %351 {offsets = [2, 0], sizes = [1, 8], strides = [1, 1]} : vector<3x8xf32> to vector<1x8xf32>
    %cst_133 = arith.constant 0.000000e+00 : f32
    %361 = vector.broadcast %cst_133 : f32 to vector<1x8xf32>
    %362 = tpu.concatenate %361, %357, %361 in 1 : vector<1x8xf32>, vector<1x8xf32>, vector<1x8xf32> -> vector<1x24xf32>
    %363 = arith.truncf %362 : vector<1x24xf32> to vector<1x24xbf16>
    %cst_134 = arith.constant dense<0.000000e+00> : vector<1x8xf32>
    %364 = tpu.matmul %363, %359, %cst_134 {dimension_numbers = #tpu.dot_dimension_numbers<[1], [0], [0], [1], [0, 0, 1, 1], [], []>} : vector<1x24xbf16>, vector<24x8xbf16>, vector<1x8xf32> -> vector<1x8xf32>
    %365 = arith.addf %364, %360 : vector<1x8xf32>
    %c1_135 = arith.constant 1 : index
    %c0_136 = arith.constant 0 : index
    %c0_137 = arith.constant 0 : index
    %366 = vector.load %arg23[%c1_135, %c0_136, %c0_137] : memref<4x3x8xf32, #tpu.memory_space<vmem>>, vector<1x3x8xf32>
    %367 = vector.shape_cast %366 : vector<1x3x8xf32> to vector<3x8xf32>
    %368 = vector.extract_strided_slice %367 {offsets = [0, 0], sizes = [1, 8], strides = [1, 1]} : vector<3x8xf32> to vector<1x8xf32>
    %369 = arith.mulf %365, %368 : vector<1x8xf32>
    %370 = vector.extract_strided_slice %367 {offsets = [1, 0], sizes = [1, 8], strides = [1, 1]} : vector<3x8xf32> to vector<1x8xf32>
    %371 = arith.addf %369, %370 : vector<1x8xf32>
    %cst_138 = arith.constant 0.000000e+00 : f32
    %372 = vector.broadcast %cst_138 : f32 to vector<1x8xf32>
    %373 = arith.maximumf %371, %372 : vector<1x8xf32>
    %c1_139 = arith.constant 1 : index
    %c0_140 = arith.constant 0 : index
    %c0_141 = arith.constant 0 : index
    %374 = vector.load %arg22[%c1_139, %c0_140, %c0_141] : memref<4x24x8xbf16, #tpu.memory_space<vmem>>, vector<1x24x8xbf16>
    %375 = vector.shape_cast %374 : vector<1x24x8xbf16> to vector<24x8xbf16>
    %376 = vector.extract_strided_slice %367 {offsets = [2, 0], sizes = [1, 8], strides = [1, 1]} : vector<3x8xf32> to vector<1x8xf32>
    %cst_142 = arith.constant 0.000000e+00 : f32
    %377 = vector.broadcast %cst_142 : f32 to vector<1x8xf32>
    %378 = tpu.concatenate %377, %373, %377 in 1 : vector<1x8xf32>, vector<1x8xf32>, vector<1x8xf32> -> vector<1x24xf32>
    %379 = arith.truncf %378 : vector<1x24xf32> to vector<1x24xbf16>
    %cst_143 = arith.constant dense<0.000000e+00> : vector<1x8xf32>
    %380 = tpu.matmul %379, %375, %cst_143 {dimension_numbers = #tpu.dot_dimension_numbers<[1], [0], [0], [1], [0, 0, 1, 1], [], []>} : vector<1x24xbf16>, vector<24x8xbf16>, vector<1x8xf32> -> vector<1x8xf32>
    %381 = arith.addf %380, %376 : vector<1x8xf32>
    %382 = arith.addf %381, %349 : vector<1x8xf32>
    %c2_144 = arith.constant 2 : index
    %c0_145 = arith.constant 0 : index
    %c0_146 = arith.constant 0 : index
    %383 = vector.load %arg23[%c2_144, %c0_145, %c0_146] : memref<4x3x8xf32, #tpu.memory_space<vmem>>, vector<1x3x8xf32>
    %384 = vector.shape_cast %383 : vector<1x3x8xf32> to vector<3x8xf32>
    %385 = vector.extract_strided_slice %384 {offsets = [0, 0], sizes = [1, 8], strides = [1, 1]} : vector<3x8xf32> to vector<1x8xf32>
    %386 = arith.mulf %382, %385 : vector<1x8xf32>
    %387 = vector.extract_strided_slice %384 {offsets = [1, 0], sizes = [1, 8], strides = [1, 1]} : vector<3x8xf32> to vector<1x8xf32>
    %388 = arith.addf %386, %387 : vector<1x8xf32>
    %cst_147 = arith.constant 0.000000e+00 : f32
    %389 = vector.broadcast %cst_147 : f32 to vector<1x8xf32>
    %390 = arith.maximumf %388, %389 : vector<1x8xf32>
    %c2_148 = arith.constant 2 : index
    %c0_149 = arith.constant 0 : index
    %c0_150 = arith.constant 0 : index
    %391 = vector.load %arg22[%c2_148, %c0_149, %c0_150] : memref<4x24x8xbf16, #tpu.memory_space<vmem>>, vector<1x24x8xbf16>
    %392 = vector.shape_cast %391 : vector<1x24x8xbf16> to vector<24x8xbf16>
    %393 = vector.extract_strided_slice %384 {offsets = [2, 0], sizes = [1, 8], strides = [1, 1]} : vector<3x8xf32> to vector<1x8xf32>
    %cst_151 = arith.constant 0.000000e+00 : f32
    %394 = vector.broadcast %cst_151 : f32 to vector<1x8xf32>
    %395 = tpu.concatenate %394, %390, %394 in 1 : vector<1x8xf32>, vector<1x8xf32>, vector<1x8xf32> -> vector<1x24xf32>
    %396 = arith.truncf %395 : vector<1x24xf32> to vector<1x24xbf16>
    %cst_152 = arith.constant dense<0.000000e+00> : vector<1x8xf32>
    %397 = tpu.matmul %396, %392, %cst_152 {dimension_numbers = #tpu.dot_dimension_numbers<[1], [0], [0], [1], [0, 0, 1, 1], [], []>} : vector<1x24xbf16>, vector<24x8xbf16>, vector<1x8xf32> -> vector<1x8xf32>
    %398 = arith.addf %397, %393 : vector<1x8xf32>
    %c3_153 = arith.constant 3 : index
    %c0_154 = arith.constant 0 : index
    %c0_155 = arith.constant 0 : index
    %399 = vector.load %arg23[%c3_153, %c0_154, %c0_155] : memref<4x3x8xf32, #tpu.memory_space<vmem>>, vector<1x3x8xf32>
    %400 = vector.shape_cast %399 : vector<1x3x8xf32> to vector<3x8xf32>
    %401 = vector.extract_strided_slice %400 {offsets = [0, 0], sizes = [1, 8], strides = [1, 1]} : vector<3x8xf32> to vector<1x8xf32>
    %402 = arith.mulf %398, %401 : vector<1x8xf32>
    %403 = vector.extract_strided_slice %400 {offsets = [1, 0], sizes = [1, 8], strides = [1, 1]} : vector<3x8xf32> to vector<1x8xf32>
    %404 = arith.addf %402, %403 : vector<1x8xf32>
    %cst_156 = arith.constant 0.000000e+00 : f32
    %405 = vector.broadcast %cst_156 : f32 to vector<1x8xf32>
    %406 = arith.maximumf %404, %405 : vector<1x8xf32>
    %c3_157 = arith.constant 3 : index
    %c0_158 = arith.constant 0 : index
    %c0_159 = arith.constant 0 : index
    %407 = vector.load %arg22[%c3_157, %c0_158, %c0_159] : memref<4x24x8xbf16, #tpu.memory_space<vmem>>, vector<1x24x8xbf16>
    %408 = vector.shape_cast %407 : vector<1x24x8xbf16> to vector<24x8xbf16>
    %409 = vector.extract_strided_slice %400 {offsets = [2, 0], sizes = [1, 8], strides = [1, 1]} : vector<3x8xf32> to vector<1x8xf32>
    %cst_160 = arith.constant 0.000000e+00 : f32
    %410 = vector.broadcast %cst_160 : f32 to vector<1x8xf32>
    %411 = tpu.concatenate %410, %406, %410 in 1 : vector<1x8xf32>, vector<1x8xf32>, vector<1x8xf32> -> vector<1x24xf32>
    %412 = arith.truncf %411 : vector<1x24xf32> to vector<1x24xbf16>
    %cst_161 = arith.constant dense<0.000000e+00> : vector<1x8xf32>
    %413 = tpu.matmul %412, %408, %cst_161 {dimension_numbers = #tpu.dot_dimension_numbers<[1], [0], [0], [1], [0, 0, 1, 1], [], []>} : vector<1x24xbf16>, vector<24x8xbf16>, vector<1x8xf32> -> vector<1x8xf32>
    %414 = arith.addf %413, %409 : vector<1x8xf32>
    %415 = arith.addf %414, %382 : vector<1x8xf32>
    %c0_162 = arith.constant 0 : index
    %c0_163 = arith.constant 0 : index
    %416 = vector.load %arg9[%c0_162, %c0_163] : memref<8x16xf32, #tpu.memory_space<vmem>>, vector<8x16xf32>
    %cst_164 = arith.constant dense<0.000000e+00> : vector<1x16xf32>
    %417 = tpu.matmul %415, %416, %cst_164 {dimension_numbers = #tpu.dot_dimension_numbers<[1], [0], [0], [1], [0, 0, 1, 1], [], []>} : vector<1x8xf32>, vector<8x16xf32>, vector<1x16xf32> -> vector<1x16xf32>
    %418 = vector.shape_cast %417 : vector<1x16xf32> to vector<1x16xf32>
    %419 = vector.broadcast %418 : vector<1x16xf32> to vector<2x16xf32>
    %420 = arith.addf %419, %333 : vector<2x16xf32>
    %421 = arith.addf %420, %286 : vector<2x16xf32>
    %c4 = arith.constant 4 : index
    %c0_165 = arith.constant 0 : index
    %c0_166 = arith.constant 0 : index
    %422 = vector.load %arg21[%c4, %c0_165, %c0_166] : memref<6x3x16xf32, #tpu.memory_space<vmem>>, vector<1x3x16xf32>
    %423 = vector.shape_cast %422 : vector<1x3x16xf32> to vector<3x16xf32>
    %424 = vector.extract_strided_slice %423 {offsets = [0, 0], sizes = [1, 16], strides = [1, 1]} : vector<3x16xf32> to vector<1x16xf32>
    %425 = vector.broadcast %424 : vector<1x16xf32> to vector<2x16xf32>
    %426 = arith.mulf %421, %425 : vector<2x16xf32>
    %427 = vector.extract_strided_slice %423 {offsets = [1, 0], sizes = [1, 16], strides = [1, 1]} : vector<3x16xf32> to vector<1x16xf32>
    %428 = vector.broadcast %427 : vector<1x16xf32> to vector<2x16xf32>
    %429 = arith.addf %426, %428 : vector<2x16xf32>
    %cst_167 = arith.constant 0.000000e+00 : f32
    %430 = vector.broadcast %cst_167 : f32 to vector<2x16xf32>
    %431 = arith.maximumf %429, %430 : vector<2x16xf32>
    %c4_168 = arith.constant 4 : index
    %c0_169 = arith.constant 0 : index
    %c0_170 = arith.constant 0 : index
    %432 = vector.load %arg20[%c4_168, %c0_169, %c0_170] : memref<6x48x16xbf16, #tpu.memory_space<vmem>>, vector<1x48x16xbf16>
    %433 = vector.shape_cast %432 : vector<1x48x16xbf16> to vector<48x16xbf16>
    %434 = vector.extract_strided_slice %423 {offsets = [2, 0], sizes = [1, 16], strides = [1, 1]} : vector<3x16xf32> to vector<1x16xf32>
    %cst_171 = arith.constant 0.000000e+00 : f32
    %435 = vector.broadcast %cst_171 : f32 to vector<1x16xf32>
    %436 = vector.extract_strided_slice %431 {offsets = [0, 0], sizes = [1, 16], strides = [1, 1]} : vector<2x16xf32> to vector<1x16xf32>
    %437 = tpu.concatenate %435, %436 in 0 : vector<1x16xf32>, vector<1x16xf32> -> vector<2x16xf32>
    %438 = vector.extract_strided_slice %431 {offsets = [1, 0], sizes = [1, 16], strides = [1, 1]} : vector<2x16xf32> to vector<1x16xf32>
    %439 = tpu.concatenate %438, %435 in 0 : vector<1x16xf32>, vector<1x16xf32> -> vector<2x16xf32>
    %440 = tpu.concatenate %437, %431, %439 in 1 : vector<2x16xf32>, vector<2x16xf32>, vector<2x16xf32> -> vector<2x48xf32>
    %441 = arith.truncf %440 : vector<2x48xf32> to vector<2x48xbf16>
    %cst_172 = arith.constant dense<0.000000e+00> : vector<2x16xf32>
    %442 = tpu.matmul %441, %433, %cst_172 {dimension_numbers = #tpu.dot_dimension_numbers<[1], [0], [0], [1], [0, 0, 1, 1], [], []>} : vector<2x48xbf16>, vector<48x16xbf16>, vector<2x16xf32> -> vector<2x16xf32>
    %443 = vector.broadcast %434 : vector<1x16xf32> to vector<2x16xf32>
    %444 = arith.addf %442, %443 : vector<2x16xf32>
    %c5 = arith.constant 5 : index
    %c0_173 = arith.constant 0 : index
    %c0_174 = arith.constant 0 : index
    %445 = vector.load %arg21[%c5, %c0_173, %c0_174] : memref<6x3x16xf32, #tpu.memory_space<vmem>>, vector<1x3x16xf32>
    %446 = vector.shape_cast %445 : vector<1x3x16xf32> to vector<3x16xf32>
    %447 = vector.extract_strided_slice %446 {offsets = [0, 0], sizes = [1, 16], strides = [1, 1]} : vector<3x16xf32> to vector<1x16xf32>
    %448 = vector.broadcast %447 : vector<1x16xf32> to vector<2x16xf32>
    %449 = arith.mulf %444, %448 : vector<2x16xf32>
    %450 = vector.extract_strided_slice %446 {offsets = [1, 0], sizes = [1, 16], strides = [1, 1]} : vector<3x16xf32> to vector<1x16xf32>
    %451 = vector.broadcast %450 : vector<1x16xf32> to vector<2x16xf32>
    %452 = arith.addf %449, %451 : vector<2x16xf32>
    %cst_175 = arith.constant 0.000000e+00 : f32
    %453 = vector.broadcast %cst_175 : f32 to vector<2x16xf32>
    %454 = arith.maximumf %452, %453 : vector<2x16xf32>
    %c5_176 = arith.constant 5 : index
    %c0_177 = arith.constant 0 : index
    %c0_178 = arith.constant 0 : index
    %455 = vector.load %arg20[%c5_176, %c0_177, %c0_178] : memref<6x48x16xbf16, #tpu.memory_space<vmem>>, vector<1x48x16xbf16>
    %456 = vector.shape_cast %455 : vector<1x48x16xbf16> to vector<48x16xbf16>
    %457 = vector.extract_strided_slice %446 {offsets = [2, 0], sizes = [1, 16], strides = [1, 1]} : vector<3x16xf32> to vector<1x16xf32>
    %cst_179 = arith.constant 0.000000e+00 : f32
    %458 = vector.broadcast %cst_179 : f32 to vector<1x16xf32>
    %459 = vector.extract_strided_slice %454 {offsets = [0, 0], sizes = [1, 16], strides = [1, 1]} : vector<2x16xf32> to vector<1x16xf32>
    %460 = tpu.concatenate %458, %459 in 0 : vector<1x16xf32>, vector<1x16xf32> -> vector<2x16xf32>
    %461 = vector.extract_strided_slice %454 {offsets = [1, 0], sizes = [1, 16], strides = [1, 1]} : vector<2x16xf32> to vector<1x16xf32>
    %462 = tpu.concatenate %461, %458 in 0 : vector<1x16xf32>, vector<1x16xf32> -> vector<2x16xf32>
    %463 = tpu.concatenate %460, %454, %462 in 1 : vector<2x16xf32>, vector<2x16xf32>, vector<2x16xf32> -> vector<2x48xf32>
    %464 = arith.truncf %463 : vector<2x48xf32> to vector<2x48xbf16>
    %cst_180 = arith.constant dense<0.000000e+00> : vector<2x16xf32>
    %465 = tpu.matmul %464, %456, %cst_180 {dimension_numbers = #tpu.dot_dimension_numbers<[1], [0], [0], [1], [0, 0, 1, 1], [], []>} : vector<2x48xbf16>, vector<48x16xbf16>, vector<2x16xf32> -> vector<2x16xf32>
    %466 = vector.broadcast %457 : vector<1x16xf32> to vector<2x16xf32>
    %467 = arith.addf %465, %466 : vector<2x16xf32>
    %468 = arith.addf %467, %421 : vector<2x16xf32>
    %c0_181 = arith.constant 0 : index
    %c0_182 = arith.constant 0 : index
    %469 = vector.load %arg10[%c0_181, %c0_182] : memref<16x32xf32, #tpu.memory_space<vmem>>, vector<16x32xf32>
    %c0_183 = arith.constant 0 : index
    %c0_184 = arith.constant 0 : index
    %470 = vector.load %arg11[%c0_183, %c0_184] : memref<4x2xf32, #tpu.memory_space<vmem>>, vector<4x2xf32>
    %cst_185 = arith.constant dense<0.000000e+00> : vector<2x32xf32>
    %471 = tpu.matmul %468, %469, %cst_185 {dimension_numbers = #tpu.dot_dimension_numbers<[1], [0], [0], [1], [0, 0, 1, 1], [], []>} : vector<2x16xf32>, vector<16x32xf32>, vector<2x32xf32> -> vector<2x32xf32>
    %cst_186 = arith.constant dense<0.000000e+00> : vector<4x32xf32>
    %472 = tpu.matmul %470, %471, %cst_186 {dimension_numbers = #tpu.dot_dimension_numbers<[1], [0], [0], [1], [0, 0, 1, 1], [], []>} : vector<4x2xf32>, vector<2x32xf32>, vector<4x32xf32> -> vector<4x32xf32>
    %473 = arith.addf %472, %222 : vector<4x32xf32>
    %474 = arith.addf %473, %175 : vector<4x32xf32>
    %c4_187 = arith.constant 4 : index
    %c0_188 = arith.constant 0 : index
    %c0_189 = arith.constant 0 : index
    %475 = vector.load %arg19[%c4_187, %c0_188, %c0_189] : memref<6x3x32xf32, #tpu.memory_space<vmem>>, vector<1x3x32xf32>
    %476 = vector.shape_cast %475 : vector<1x3x32xf32> to vector<3x32xf32>
    %477 = vector.extract_strided_slice %476 {offsets = [0, 0], sizes = [1, 32], strides = [1, 1]} : vector<3x32xf32> to vector<1x32xf32>
    %478 = vector.broadcast %477 : vector<1x32xf32> to vector<4x32xf32>
    %479 = arith.mulf %474, %478 : vector<4x32xf32>
    %480 = vector.extract_strided_slice %476 {offsets = [1, 0], sizes = [1, 32], strides = [1, 1]} : vector<3x32xf32> to vector<1x32xf32>
    %481 = vector.broadcast %480 : vector<1x32xf32> to vector<4x32xf32>
    %482 = arith.addf %479, %481 : vector<4x32xf32>
    %cst_190 = arith.constant 0.000000e+00 : f32
    %483 = vector.broadcast %cst_190 : f32 to vector<4x32xf32>
    %484 = arith.maximumf %482, %483 : vector<4x32xf32>
    %c4_191 = arith.constant 4 : index
    %c0_192 = arith.constant 0 : index
    %c0_193 = arith.constant 0 : index
    %485 = vector.load %arg18[%c4_191, %c0_192, %c0_193] : memref<6x96x32xbf16, #tpu.memory_space<vmem>>, vector<1x96x32xbf16>
    %486 = vector.shape_cast %485 : vector<1x96x32xbf16> to vector<96x32xbf16>
    %487 = vector.extract_strided_slice %476 {offsets = [2, 0], sizes = [1, 32], strides = [1, 1]} : vector<3x32xf32> to vector<1x32xf32>
    %cst_194 = arith.constant 0.000000e+00 : f32
    %488 = vector.broadcast %cst_194 : f32 to vector<1x32xf32>
    %489 = vector.extract_strided_slice %484 {offsets = [0, 0], sizes = [3, 32], strides = [1, 1]} : vector<4x32xf32> to vector<3x32xf32>
    %490 = tpu.concatenate %488, %489 in 0 : vector<1x32xf32>, vector<3x32xf32> -> vector<4x32xf32>
    %491 = vector.extract_strided_slice %484 {offsets = [1, 0], sizes = [3, 32], strides = [1, 1]} : vector<4x32xf32> to vector<3x32xf32>
    %492 = tpu.concatenate %491, %488 in 0 : vector<3x32xf32>, vector<1x32xf32> -> vector<4x32xf32>
    %493 = tpu.concatenate %490, %484, %492 in 1 : vector<4x32xf32>, vector<4x32xf32>, vector<4x32xf32> -> vector<4x96xf32>
    %494 = arith.truncf %493 : vector<4x96xf32> to vector<4x96xbf16>
    %cst_195 = arith.constant dense<0.000000e+00> : vector<4x32xf32>
    %495 = tpu.matmul %494, %486, %cst_195 {dimension_numbers = #tpu.dot_dimension_numbers<[1], [0], [0], [1], [0, 0, 1, 1], [], []>} : vector<4x96xbf16>, vector<96x32xbf16>, vector<4x32xf32> -> vector<4x32xf32>
    %496 = vector.broadcast %487 : vector<1x32xf32> to vector<4x32xf32>
    %497 = arith.addf %495, %496 : vector<4x32xf32>
    %c5_196 = arith.constant 5 : index
    %c0_197 = arith.constant 0 : index
    %c0_198 = arith.constant 0 : index
    %498 = vector.load %arg19[%c5_196, %c0_197, %c0_198] : memref<6x3x32xf32, #tpu.memory_space<vmem>>, vector<1x3x32xf32>
    %499 = vector.shape_cast %498 : vector<1x3x32xf32> to vector<3x32xf32>
    %500 = vector.extract_strided_slice %499 {offsets = [0, 0], sizes = [1, 32], strides = [1, 1]} : vector<3x32xf32> to vector<1x32xf32>
    %501 = vector.broadcast %500 : vector<1x32xf32> to vector<4x32xf32>
    %502 = arith.mulf %497, %501 : vector<4x32xf32>
    %503 = vector.extract_strided_slice %499 {offsets = [1, 0], sizes = [1, 32], strides = [1, 1]} : vector<3x32xf32> to vector<1x32xf32>
    %504 = vector.broadcast %503 : vector<1x32xf32> to vector<4x32xf32>
    %505 = arith.addf %502, %504 : vector<4x32xf32>
    %cst_199 = arith.constant 0.000000e+00 : f32
    %506 = vector.broadcast %cst_199 : f32 to vector<4x32xf32>
    %507 = arith.maximumf %505, %506 : vector<4x32xf32>
    %c5_200 = arith.constant 5 : index
    %c0_201 = arith.constant 0 : index
    %c0_202 = arith.constant 0 : index
    %508 = vector.load %arg18[%c5_200, %c0_201, %c0_202] : memref<6x96x32xbf16, #tpu.memory_space<vmem>>, vector<1x96x32xbf16>
    %509 = vector.shape_cast %508 : vector<1x96x32xbf16> to vector<96x32xbf16>
    %510 = vector.extract_strided_slice %499 {offsets = [2, 0], sizes = [1, 32], strides = [1, 1]} : vector<3x32xf32> to vector<1x32xf32>
    %cst_203 = arith.constant 0.000000e+00 : f32
    %511 = vector.broadcast %cst_203 : f32 to vector<1x32xf32>
    %512 = vector.extract_strided_slice %507 {offsets = [0, 0], sizes = [3, 32], strides = [1, 1]} : vector<4x32xf32> to vector<3x32xf32>
    %513 = tpu.concatenate %511, %512 in 0 : vector<1x32xf32>, vector<3x32xf32> -> vector<4x32xf32>
    %514 = vector.extract_strided_slice %507 {offsets = [1, 0], sizes = [3, 32], strides = [1, 1]} : vector<4x32xf32> to vector<3x32xf32>
    %515 = tpu.concatenate %514, %511 in 0 : vector<3x32xf32>, vector<1x32xf32> -> vector<4x32xf32>
    %516 = tpu.concatenate %513, %507, %515 in 1 : vector<4x32xf32>, vector<4x32xf32>, vector<4x32xf32> -> vector<4x96xf32>
    %517 = arith.truncf %516 : vector<4x96xf32> to vector<4x96xbf16>
    %cst_204 = arith.constant dense<0.000000e+00> : vector<4x32xf32>
    %518 = tpu.matmul %517, %509, %cst_204 {dimension_numbers = #tpu.dot_dimension_numbers<[1], [0], [0], [1], [0, 0, 1, 1], [], []>} : vector<4x96xbf16>, vector<96x32xbf16>, vector<4x32xf32> -> vector<4x32xf32>
    %519 = vector.broadcast %510 : vector<1x32xf32> to vector<4x32xf32>
    %520 = arith.addf %518, %519 : vector<4x32xf32>
    %521 = arith.addf %520, %474 : vector<4x32xf32>
    %c0_205 = arith.constant 0 : index
    %c0_206 = arith.constant 0 : index
    %522 = vector.load %arg12[%c0_205, %c0_206] : memref<32x64xf32, #tpu.memory_space<vmem>>, vector<32x64xf32>
    %c0_207 = arith.constant 0 : index
    %c0_208 = arith.constant 0 : index
    %523 = vector.load %arg13[%c0_207, %c0_208] : memref<8x4xf32, #tpu.memory_space<vmem>>, vector<8x4xf32>
    %cst_209 = arith.constant dense<0.000000e+00> : vector<4x64xf32>
    %524 = tpu.matmul %521, %522, %cst_209 {dimension_numbers = #tpu.dot_dimension_numbers<[1], [0], [0], [1], [0, 0, 1, 1], [], []>} : vector<4x32xf32>, vector<32x64xf32>, vector<4x64xf32> -> vector<4x64xf32>
    %cst_210 = arith.constant dense<0.000000e+00> : vector<8x64xf32>
    %525 = tpu.matmul %523, %524, %cst_210 {dimension_numbers = #tpu.dot_dimension_numbers<[1], [0], [0], [1], [0, 0, 1, 1], [], []>} : vector<8x4xf32>, vector<4x64xf32>, vector<8x64xf32> -> vector<8x64xf32>
    %526 = arith.addf %525, %64 : vector<8x64xf32>
    %527 = arith.addf %526, %111 : vector<8x64xf32>
    %c4_211 = arith.constant 4 : index
    %c0_212 = arith.constant 0 : index
    %c0_213 = arith.constant 0 : index
    %528 = vector.load %arg17[%c4_211, %c0_212, %c0_213] : memref<6x3x64xf32, #tpu.memory_space<vmem>>, vector<1x3x64xf32>
    %529 = vector.shape_cast %528 : vector<1x3x64xf32> to vector<3x64xf32>
    %530 = vector.extract_strided_slice %529 {offsets = [0, 0], sizes = [1, 64], strides = [1, 1]} : vector<3x64xf32> to vector<1x64xf32>
    %531 = vector.broadcast %530 : vector<1x64xf32> to vector<8x64xf32>
    %532 = arith.mulf %527, %531 : vector<8x64xf32>
    %533 = vector.extract_strided_slice %529 {offsets = [1, 0], sizes = [1, 64], strides = [1, 1]} : vector<3x64xf32> to vector<1x64xf32>
    %534 = vector.broadcast %533 : vector<1x64xf32> to vector<8x64xf32>
    %535 = arith.addf %532, %534 : vector<8x64xf32>
    %cst_214 = arith.constant 0.000000e+00 : f32
    %536 = vector.broadcast %cst_214 : f32 to vector<8x64xf32>
    %537 = arith.maximumf %535, %536 : vector<8x64xf32>
    %c4_215 = arith.constant 4 : index
    %c0_216 = arith.constant 0 : index
    %c0_217 = arith.constant 0 : index
    %538 = vector.load %arg16[%c4_215, %c0_216, %c0_217] : memref<6x192x64xbf16, #tpu.memory_space<vmem>>, vector<1x192x64xbf16>
    %539 = vector.shape_cast %538 : vector<1x192x64xbf16> to vector<192x64xbf16>
    %540 = vector.extract_strided_slice %529 {offsets = [2, 0], sizes = [1, 64], strides = [1, 1]} : vector<3x64xf32> to vector<1x64xf32>
    %cst_218 = arith.constant 0.000000e+00 : f32
    %541 = vector.broadcast %cst_218 : f32 to vector<1x64xf32>
    %542 = vector.extract_strided_slice %537 {offsets = [0, 0], sizes = [7, 64], strides = [1, 1]} : vector<8x64xf32> to vector<7x64xf32>
    %543 = tpu.concatenate %541, %542 in 0 : vector<1x64xf32>, vector<7x64xf32> -> vector<8x64xf32>
    %544 = vector.extract_strided_slice %537 {offsets = [1, 0], sizes = [7, 64], strides = [1, 1]} : vector<8x64xf32> to vector<7x64xf32>
    %545 = tpu.concatenate %544, %541 in 0 : vector<7x64xf32>, vector<1x64xf32> -> vector<8x64xf32>
    %546 = tpu.concatenate %543, %537, %545 in 1 : vector<8x64xf32>, vector<8x64xf32>, vector<8x64xf32> -> vector<8x192xf32>
    %547 = arith.truncf %546 : vector<8x192xf32> to vector<8x192xbf16>
    %cst_219 = arith.constant dense<0.000000e+00> : vector<8x64xf32>
    %548 = tpu.matmul %547, %539, %cst_219 {dimension_numbers = #tpu.dot_dimension_numbers<[1], [0], [0], [1], [0, 0, 1, 1], [], []>} : vector<8x192xbf16>, vector<192x64xbf16>, vector<8x64xf32> -> vector<8x64xf32>
    %549 = vector.broadcast %540 : vector<1x64xf32> to vector<8x64xf32>
    %550 = arith.addf %548, %549 : vector<8x64xf32>
    %c5_220 = arith.constant 5 : index
    %c0_221 = arith.constant 0 : index
    %c0_222 = arith.constant 0 : index
    %551 = vector.load %arg17[%c5_220, %c0_221, %c0_222] : memref<6x3x64xf32, #tpu.memory_space<vmem>>, vector<1x3x64xf32>
    %552 = vector.shape_cast %551 : vector<1x3x64xf32> to vector<3x64xf32>
    %553 = vector.extract_strided_slice %552 {offsets = [0, 0], sizes = [1, 64], strides = [1, 1]} : vector<3x64xf32> to vector<1x64xf32>
    %554 = vector.broadcast %553 : vector<1x64xf32> to vector<8x64xf32>
    %555 = arith.mulf %550, %554 : vector<8x64xf32>
    %556 = vector.extract_strided_slice %552 {offsets = [1, 0], sizes = [1, 64], strides = [1, 1]} : vector<3x64xf32> to vector<1x64xf32>
    %557 = vector.broadcast %556 : vector<1x64xf32> to vector<8x64xf32>
    %558 = arith.addf %555, %557 : vector<8x64xf32>
    %cst_223 = arith.constant 0.000000e+00 : f32
    %559 = vector.broadcast %cst_223 : f32 to vector<8x64xf32>
    %560 = arith.maximumf %558, %559 : vector<8x64xf32>
    %c5_224 = arith.constant 5 : index
    %c0_225 = arith.constant 0 : index
    %c0_226 = arith.constant 0 : index
    %561 = vector.load %arg16[%c5_224, %c0_225, %c0_226] : memref<6x192x64xbf16, #tpu.memory_space<vmem>>, vector<1x192x64xbf16>
    %562 = vector.shape_cast %561 : vector<1x192x64xbf16> to vector<192x64xbf16>
    %563 = vector.extract_strided_slice %552 {offsets = [2, 0], sizes = [1, 64], strides = [1, 1]} : vector<3x64xf32> to vector<1x64xf32>
    %cst_227 = arith.constant 0.000000e+00 : f32
    %564 = vector.broadcast %cst_227 : f32 to vector<1x64xf32>
    %565 = vector.extract_strided_slice %560 {offsets = [0, 0], sizes = [7, 64], strides = [1, 1]} : vector<8x64xf32> to vector<7x64xf32>
    %566 = tpu.concatenate %564, %565 in 0 : vector<1x64xf32>, vector<7x64xf32> -> vector<8x64xf32>
    %567 = vector.extract_strided_slice %560 {offsets = [1, 0], sizes = [7, 64], strides = [1, 1]} : vector<8x64xf32> to vector<7x64xf32>
    %568 = tpu.concatenate %567, %564 in 0 : vector<7x64xf32>, vector<1x64xf32> -> vector<8x64xf32>
    %569 = tpu.concatenate %566, %560, %568 in 1 : vector<8x64xf32>, vector<8x64xf32>, vector<8x64xf32> -> vector<8x192xf32>
    %570 = arith.truncf %569 : vector<8x192xf32> to vector<8x192xbf16>
    %cst_228 = arith.constant dense<0.000000e+00> : vector<8x64xf32>
    %571 = tpu.matmul %570, %562, %cst_228 {dimension_numbers = #tpu.dot_dimension_numbers<[1], [0], [0], [1], [0, 0, 1, 1], [], []>} : vector<8x192xbf16>, vector<192x64xbf16>, vector<8x64xf32> -> vector<8x64xf32>
    %572 = vector.broadcast %563 : vector<1x64xf32> to vector<8x64xf32>
    %573 = arith.addf %571, %572 : vector<8x64xf32>
    %574 = arith.addf %573, %527 : vector<8x64xf32>
    %c0_229 = arith.constant 0 : index
    %c0_230 = arith.constant 0 : index
    %575 = vector.load %arg14[%c0_229, %c0_230] : memref<64x128xf32, #tpu.memory_space<vmem>>, vector<64x128xf32>
    %c0_231 = arith.constant 0 : index
    %c0_232 = arith.constant 0 : index
    %576 = vector.load %arg15[%c0_231, %c0_232] : memref<16x8xf32, #tpu.memory_space<vmem>>, vector<16x8xf32>
    %cst_233 = arith.constant dense<0.000000e+00> : vector<8x128xf32>
    %577 = tpu.matmul %574, %575, %cst_233 {dimension_numbers = #tpu.dot_dimension_numbers<[1], [0], [0], [1], [0, 0, 1, 1], [], []>} : vector<8x64xf32>, vector<64x128xf32>, vector<8x128xf32> -> vector<8x128xf32>
    %cst_234 = arith.constant dense<0.000000e+00> : vector<16x128xf32>
    %578 = tpu.matmul %576, %577, %cst_234 {dimension_numbers = #tpu.dot_dimension_numbers<[1], [0], [0], [1], [0, 0, 1, 1], [], []>} : vector<16x8xf32>, vector<8x128xf32>, vector<16x128xf32> -> vector<16x128xf32>
    %c0_235 = arith.constant 0 : index
    %c0_236 = arith.constant 0 : index
    %c0_237 = arith.constant 0 : index
    %579 = vector.load %arg24[%c0_235, %c0_236, %c0_237] : memref<2x128x128xbf16, #tpu.memory_space<vmem>>, vector<1x128x128xbf16>
    %580 = vector.shape_cast %579 : vector<1x128x128xbf16> to vector<128x128xbf16>
    %c0_238 = arith.constant 0 : index
    %c0_239 = arith.constant 0 : index
    %c0_240 = arith.constant 0 : index
    %581 = vector.load %arg25[%c0_238, %c0_239, %c0_240] : memref<2x3x128xf32, #tpu.memory_space<vmem>>, vector<1x3x128xf32>
    %582 = vector.shape_cast %581 : vector<1x3x128xf32> to vector<3x128xf32>
    %583 = vector.extract_strided_slice %582 {offsets = [0, 0], sizes = [1, 128], strides = [1, 1]} : vector<3x128xf32> to vector<1x128xf32>
    %584 = vector.broadcast %583 : vector<1x128xf32> to vector<16x128xf32>
    %585 = arith.mulf %578, %584 : vector<16x128xf32>
    %586 = vector.extract_strided_slice %582 {offsets = [1, 0], sizes = [1, 128], strides = [1, 1]} : vector<3x128xf32> to vector<1x128xf32>
    %587 = vector.broadcast %586 : vector<1x128xf32> to vector<16x128xf32>
    %588 = arith.addf %585, %587 : vector<16x128xf32>
    %cst_241 = arith.constant 0.000000e+00 : f32
    %589 = vector.broadcast %cst_241 : f32 to vector<16x128xf32>
    %590 = arith.maximumf %588, %589 : vector<16x128xf32>
    %591 = arith.truncf %590 : vector<16x128xf32> to vector<16x128xbf16>
    %cst_242 = arith.constant dense<0.000000e+00> : vector<16x128xf32>
    %592 = tpu.matmul %591, %580, %cst_242 {dimension_numbers = #tpu.dot_dimension_numbers<[1], [0], [0], [1], [0, 0, 1, 1], [], []>} : vector<16x128xbf16>, vector<128x128xbf16>, vector<16x128xf32> -> vector<16x128xf32>
    %593 = vector.extract_strided_slice %582 {offsets = [2, 0], sizes = [1, 128], strides = [1, 1]} : vector<3x128xf32> to vector<1x128xf32>
    %594 = vector.broadcast %593 : vector<1x128xf32> to vector<16x128xf32>
    %595 = arith.addf %592, %594 : vector<16x128xf32>
    %c1_243 = arith.constant 1 : index
    %c0_244 = arith.constant 0 : index
    %c0_245 = arith.constant 0 : index
    %596 = vector.load %arg24[%c1_243, %c0_244, %c0_245] : memref<2x128x128xbf16, #tpu.memory_space<vmem>>, vector<1x128x128xbf16>
    %597 = vector.shape_cast %596 : vector<1x128x128xbf16> to vector<128x128xbf16>
    %c1_246 = arith.constant 1 : index
    %c0_247 = arith.constant 0 : index
    %c0_248 = arith.constant 0 : index
    %598 = vector.load %arg25[%c1_246, %c0_247, %c0_248] : memref<2x3x128xf32, #tpu.memory_space<vmem>>, vector<1x3x128xf32>
    %599 = vector.shape_cast %598 : vector<1x3x128xf32> to vector<3x128xf32>
    %600 = vector.extract_strided_slice %599 {offsets = [0, 0], sizes = [1, 128], strides = [1, 1]} : vector<3x128xf32> to vector<1x128xf32>
    %601 = vector.broadcast %600 : vector<1x128xf32> to vector<16x128xf32>
    %602 = arith.mulf %595, %601 : vector<16x128xf32>
    %603 = vector.extract_strided_slice %599 {offsets = [1, 0], sizes = [1, 128], strides = [1, 1]} : vector<3x128xf32> to vector<1x128xf32>
    %604 = vector.broadcast %603 : vector<1x128xf32> to vector<16x128xf32>
    %605 = arith.addf %602, %604 : vector<16x128xf32>
    %cst_249 = arith.constant 0.000000e+00 : f32
    %606 = vector.broadcast %cst_249 : f32 to vector<16x128xf32>
    %607 = arith.maximumf %605, %606 : vector<16x128xf32>
    %608 = arith.truncf %607 : vector<16x128xf32> to vector<16x128xbf16>
    %cst_250 = arith.constant dense<0.000000e+00> : vector<16x128xf32>
    %609 = tpu.matmul %608, %597, %cst_250 {dimension_numbers = #tpu.dot_dimension_numbers<[1], [0], [0], [1], [0, 0, 1, 1], [], []>} : vector<16x128xbf16>, vector<128x128xbf16>, vector<16x128xf32> -> vector<16x128xf32>
    %610 = vector.extract_strided_slice %599 {offsets = [2, 0], sizes = [1, 128], strides = [1, 1]} : vector<3x128xf32> to vector<1x128xf32>
    %611 = vector.broadcast %610 : vector<1x128xf32> to vector<16x128xf32>
    %612 = arith.addf %609, %611 : vector<16x128xf32>
    %cst_251 = arith.constant 5.000000e-01 : f32
    %613 = vector.broadcast %cst_251 : f32 to vector<16x128xf32>
    %614 = arith.mulf %613, %612 : vector<16x128xf32>
    %615 = math.tanh %614 : vector<16x128xf32>
    %cst_252 = arith.constant 1.000000e+00 : f32
    %616 = vector.broadcast %cst_252 : f32 to vector<16x128xf32>
    %617 = arith.addf %615, %616 : vector<16x128xf32>
    %cst_253 = arith.constant 5.000000e-01 : f32
    %618 = vector.broadcast %cst_253 : f32 to vector<16x128xf32>
    %619 = arith.mulf %618, %617 : vector<16x128xf32>
    %c0_254 = arith.constant 0 : index
    %c0_255 = arith.constant 0 : index
    %620 = vector.load %arg26[%c0_254, %c0_255] : memref<16x128xf32, #tpu.memory_space<vmem>>, vector<16x128xf32>
    tpu.vector_store %arg26[%c0_254, %c0_255], %619 {strides = array<i32>} : memref<16x128xf32, #tpu.memory_space<vmem>>, vector<16x128xf32>,
    return
  }
  func.func @transform_0(%arg0: i32) -> (i32, i32) {
    %c0_i32 = arith.constant 0 : i32
    %c0_i32_0 = arith.constant 0 : i32
    return %arg0, %c0_i32 : i32, i32
  }
  func.func @transform_1(%arg0: i32) -> (i32, i32) {
    %c0_i32 = arith.constant 0 : i32
    %c0_i32_0 = arith.constant 0 : i32
    %c0_i32_1 = arith.constant 0 : i32
    return %c0_i32, %c0_i32_0 : i32, i32
  }
  func.func @transform_2(%arg0: i32) -> (i32, i32) {
    %c0_i32 = arith.constant 0 : i32
    %c0_i32_0 = arith.constant 0 : i32
    %c0_i32_1 = arith.constant 0 : i32
    return %c0_i32, %c0_i32_0 : i32, i32
  }
  func.func @transform_3(%arg0: i32) -> (i32, i32) {
    %c0_i32 = arith.constant 0 : i32
    %c0_i32_0 = arith.constant 0 : i32
    %c0_i32_1 = arith.constant 0 : i32
    return %c0_i32, %c0_i32_0 : i32, i32
  }
  func.func @transform_4(%arg0: i32) -> (i32, i32) {
    %c0_i32 = arith.constant 0 : i32
    %c0_i32_0 = arith.constant 0 : i32
    %c0_i32_1 = arith.constant 0 : i32
    return %c0_i32, %c0_i32_0 : i32, i32
  }
  func.func @transform_5(%arg0: i32) -> (i32, i32) {
    %c0_i32 = arith.constant 0 : i32
    %c0_i32_0 = arith.constant 0 : i32
    %c0_i32_1 = arith.constant 0 : i32
    return %c0_i32, %c0_i32_0 : i32, i32
  }
  func.func @transform_6(%arg0: i32) -> (i32, i32) {
    %c0_i32 = arith.constant 0 : i32
    %c0_i32_0 = arith.constant 0 : i32
    %c0_i32_1 = arith.constant 0 : i32
    return %c0_i32, %c0_i32_0 : i32, i32
  }
  func.func @transform_7(%arg0: i32) -> (i32, i32) {
    %c0_i32 = arith.constant 0 : i32
    %c0_i32_0 = arith.constant 0 : i32
    %c0_i32_1 = arith.constant 0 : i32
    return %c0_i32, %c0_i32_0 : i32, i32
  }
  func.func @transform_8(%arg0: i32) -> (i32, i32) {
    %c0_i32 = arith.constant 0 : i32
    %c0_i32_0 = arith.constant 0 : i32
    %c0_i32_1 = arith.constant 0 : i32
    return %c0_i32, %c0_i32_0 : i32, i32
  }
  func.func @transform_9(%arg0: i32) -> (i32, i32) {
    %c0_i32 = arith.constant 0 : i32
    %c0_i32_0 = arith.constant 0 : i32
    %c0_i32_1 = arith.constant 0 : i32
    return %c0_i32, %c0_i32_0 : i32, i32
  }
  func.func @transform_10(%arg0: i32) -> (i32, i32) {
    %c0_i32 = arith.constant 0 : i32
    %c0_i32_0 = arith.constant 0 : i32
    %c0_i32_1 = arith.constant 0 : i32
    return %c0_i32, %c0_i32_0 : i32, i32
  }
  func.func @transform_11(%arg0: i32) -> (i32, i32) {
    %c0_i32 = arith.constant 0 : i32
    %c0_i32_0 = arith.constant 0 : i32
    %c0_i32_1 = arith.constant 0 : i32
    return %c0_i32, %c0_i32_0 : i32, i32
  }
  func.func @transform_12(%arg0: i32) -> (i32, i32) {
    %c0_i32 = arith.constant 0 : i32
    %c0_i32_0 = arith.constant 0 : i32
    %c0_i32_1 = arith.constant 0 : i32
    return %c0_i32, %c0_i32_0 : i32, i32
  }
  func.func @transform_13(%arg0: i32) -> (i32, i32) {
    %c0_i32 = arith.constant 0 : i32
    %c0_i32_0 = arith.constant 0 : i32
    %c0_i32_1 = arith.constant 0 : i32
    return %c0_i32, %c0_i32_0 : i32, i32
  }
  func.func @transform_14(%arg0: i32) -> (i32, i32) {
    %c0_i32 = arith.constant 0 : i32
    %c0_i32_0 = arith.constant 0 : i32
    %c0_i32_1 = arith.constant 0 : i32
    return %c0_i32, %c0_i32_0 : i32, i32
  }
  func.func @transform_15(%arg0: i32) -> (i32, i32, i32) {
    %c0_i32 = arith.constant 0 : i32
    %c0_i32_0 = arith.constant 0 : i32
    %c0_i32_1 = arith.constant 0 : i32
    %c0_i32_2 = arith.constant 0 : i32
    return %c0_i32, %c0_i32_0, %c0_i32_1 : i32, i32, i32
  }
  func.func @transform_16(%arg0: i32) -> (i32, i32, i32) {
    %c0_i32 = arith.constant 0 : i32
    %c0_i32_0 = arith.constant 0 : i32
    %c0_i32_1 = arith.constant 0 : i32
    %c0_i32_2 = arith.constant 0 : i32
    return %c0_i32, %c0_i32_0, %c0_i32_1 : i32, i32, i32
  }
  func.func @transform_17(%arg0: i32) -> (i32, i32, i32) {
    %c0_i32 = arith.constant 0 : i32
    %c0_i32_0 = arith.constant 0 : i32
    %c0_i32_1 = arith.constant 0 : i32
    %c0_i32_2 = arith.constant 0 : i32
    return %c0_i32, %c0_i32_0, %c0_i32_1 : i32, i32, i32
  }
  func.func @transform_18(%arg0: i32) -> (i32, i32, i32) {
    %c0_i32 = arith.constant 0 : i32
    %c0_i32_0 = arith.constant 0 : i32
    %c0_i32_1 = arith.constant 0 : i32
    %c0_i32_2 = arith.constant 0 : i32
    return %c0_i32, %c0_i32_0, %c0_i32_1 : i32, i32, i32
  }
  func.func @transform_19(%arg0: i32) -> (i32, i32, i32) {
    %c0_i32 = arith.constant 0 : i32
    %c0_i32_0 = arith.constant 0 : i32
    %c0_i32_1 = arith.constant 0 : i32
    %c0_i32_2 = arith.constant 0 : i32
    return %c0_i32, %c0_i32_0, %c0_i32_1 : i32, i32, i32
  }
  func.func @transform_20(%arg0: i32) -> (i32, i32, i32) {
    %c0_i32 = arith.constant 0 : i32
    %c0_i32_0 = arith.constant 0 : i32
    %c0_i32_1 = arith.constant 0 : i32
    %c0_i32_2 = arith.constant 0 : i32
    return %c0_i32, %c0_i32_0, %c0_i32_1 : i32, i32, i32
  }
  func.func @transform_21(%arg0: i32) -> (i32, i32, i32) {
    %c0_i32 = arith.constant 0 : i32
    %c0_i32_0 = arith.constant 0 : i32
    %c0_i32_1 = arith.constant 0 : i32
    %c0_i32_2 = arith.constant 0 : i32
    return %c0_i32, %c0_i32_0, %c0_i32_1 : i32, i32, i32
  }
  func.func @transform_22(%arg0: i32) -> (i32, i32, i32) {
    %c0_i32 = arith.constant 0 : i32
    %c0_i32_0 = arith.constant 0 : i32
    %c0_i32_1 = arith.constant 0 : i32
    %c0_i32_2 = arith.constant 0 : i32
    return %c0_i32, %c0_i32_0, %c0_i32_1 : i32, i32, i32
  }
  func.func @transform_23(%arg0: i32) -> (i32, i32, i32) {
    %c0_i32 = arith.constant 0 : i32
    %c0_i32_0 = arith.constant 0 : i32
    %c0_i32_1 = arith.constant 0 : i32
    %c0_i32_2 = arith.constant 0 : i32
    return %c0_i32, %c0_i32_0, %c0_i32_1 : i32, i32, i32
  }
  func.func @transform_24(%arg0: i32) -> (i32, i32, i32) {
    %c0_i32 = arith.constant 0 : i32
    %c0_i32_0 = arith.constant 0 : i32
    %c0_i32_1 = arith.constant 0 : i32
    %c0_i32_2 = arith.constant 0 : i32
    return %c0_i32, %c0_i32_0, %c0_i32_1 : i32, i32, i32
  }
  func.func @transform_25(%arg0: i32) -> (i32, i32) {
    %c0_i32 = arith.constant 0 : i32
    %c0_i32_0 = arith.constant 0 : i32
    return %arg0, %c0_i32 : i32, i32
  }
}

</mosaic_0001>

<bundles_post_ra>
// kernel: forward.1
= control target key start
LH: loop header
LB: loop body
LE: loop exit
PB: predicated region body
PF: predicated region fallthrough
CT: control target
= control target key end

     0   :  { %s4769_s29 = smov 0   ;;  %s5777_s0 = inlined_call_operand.vmem [shape: f32[96,128], index: 0, kind: input, shape index: {}]   ;;  %s5778_s1 = inlined_call_operand.vmem [shape: f32[128,192], index: 1, kind: input, shape index: {}]   ;;  %s5779_s2 = inlined_call_operand.vmem [shape: f32[8,16], index: 2, kind: input, shape index: {}]   ;;  %s5780_s3 = inlined_call_operand.vmem [shape: f32[64,96], index: 3, kind: input, shape index: {}]   ;;  %s5781_s4 = inlined_call_operand.vmem [shape: f32[4,8], index: 4, kind: input, shape index: {}]   ;;  %s5782_s5 = inlined_call_operand.vmem [shape: f32[32,48], index: 5, kind: input, shape index: {}]   ;;  %s5783_s6 = inlined_call_operand.vmem [shape: f32[2,4], index: 6, kind: input, shape index: {}]   ;;  %s5784_s7 = inlined_call_operand.vmem [shape: f32[16,24], index: 7, kind: input, shape index: {}]   ;;  %s5785_s8 = inlined_call_operand.vmem [shape: f32[8,16], index: 8, kind: input, shape index: {}]   ;;  %s5786_s9 = inlined_call_operand.vmem [shape: f32[16,32], index: 9, kind: input, shape index: {}]   ;;  %s5787_s10 = inlined_call_operand.vmem [shape: f32[4,2], index: 10, kind: input, shape index: {}]   ;;  %s5788_s11 = inlined_call_operand.vmem [shape: f32[32,64], index: 11, kind: input, shape index: {}]   ;;  %s5789_s12 = inlined_call_operand.vmem [shape: f32[8,4], index: 12, kind: input, shape index: {}]   ;;  %s5790_s13 = inlined_call_operand.vmem [shape: f32[64,128], index: 13, kind: input, shape index: {}]   ;;  %s5791_s14 = inlined_call_operand.vmem [shape: f32[16,8], index: 14, kind: input, shape index: {}]   ;;  %s5792_s15 = inlined_call_operand.vmem [shape: bf16[6,192,64], index: 15, kind: input, shape index: {}]   ;;  %s5793_s16 = inlined_call_operand.vmem [shape: f32[6,3,64], index: 16, kind: input, shape index: {}]   ;;  %s5794_s17 = inlined_call_operand.vmem [shape: bf16[6,96,32], index: 17, kind: input, shape index: {}]   ;;  %s5795_s18 = inlined_call_operand.vmem [shape: f32[6,3,32], index: 18, kind: input, shape index: {}]   ;;  %s5796_s19 = inlined_call_operand.vmem [shape: bf16[6,48,16], index: 19, kind: input, shape index: {}]   ;;  %s5797_s20 = inlined_call_operand.vmem [shape: f32[6,3,16], index: 20, kind: input, shape index: {}]   ;;  %s5798_s21 = inlined_call_operand.vmem [shape: bf16[4,24,8], index: 21, kind: input, shape index: {}]   ;;  %s5799_s22 = inlined_call_operand.vmem [shape: f32[4,3,8], index: 22, kind: input, shape index: {}]   ;;  %s5800_s23 = inlined_call_operand.vmem [shape: bf16[2,128,128], index: 23, kind: input, shape index: {}]   ;;  %s5801_s24 = inlined_call_operand.vmem [shape: f32[2,3,128], index: 24, kind: input, shape index: {}]   ;;  %s5802_s25 = inlined_call_operand.vmem [shape: f32[96,128], index: 25, kind: output, shape index: {}]  }
   0x1   :  { %5822 = sst [smem:[#allocation3_spill]] %s5777_s0 }
   0x2   :  { %5823 = sst [smem:[#allocation4_spill]] %s5778_s1 }
   0x3   :  { %5824 = sst [smem:[#allocation5_spill]] %s5779_s2 }
   0x4   :  { %5825 = sst [smem:[#allocation6_spill]] %s5780_s3 }
   0x5   :  { %5826 = sst [smem:[#allocation7_spill]] %s5781_s4 }
   0x6   :  { %5827 = sst [smem:[#allocation8_spill]] %s5782_s5 }
   0x7   :  { %5828 = sst [smem:[#allocation9_spill]] %s5783_s6 }
   0x8   :  { %5829 = sst [smem:[#allocation10_spill]] %s5784_s7 }
   0x9   :  { %5830 = sst [smem:[#allocation11_spill]] %s5785_s8 }
   0xa   :  { %5831 = sst [smem:[#allocation12_spill]] %s5786_s9 }
   0xb LB: > { %5832 = sst [smem:[#allocation2_spill]] %s4630_s29  ;;  %s3565_s2 = sadd.s32 4294967295, %s4630_s29   ;;  %s4630_s29 = sphi %s4769_s29, %s35_s29  }
   0xc   : > { %p3569_p0 = scmp.ge.s32.totalorder %s4630_s29, 1  ;;  %p688_p1 = scmp.lt.s32.totalorder %s4630_s29, 7 }
   0xe   : > { %p689_p2 = pnand %p3569_p0, %p688_p1 }
   0xf   : > { %s5833_s7 = sld [smem:[#allocation4_spill]] (!%p689_p2)  ;;  %s3570_s5 = sshll.u32 (!%p689_p2), %s3565_s2, 1 }
  0x10   : > { %692 = sbr.rel (%p689_p2) target bundleno = 6926 (0x1b0e), region = 120  ;;  %p757_p3 = scmp.lt.s32.totalorder (!%p689_p2), %s3570_s5, 11 }
  0x11   : > { %s5834_s27 = sld [smem:[#allocation3_spill]] (!%p689_p2)  ;;  %s5811_s0 = smov (!%p689_p2), 64  }
  0x12   : > { %s5835_s30 = sld [smem:[#allocation5_spill]] (!%p689_p2)  ;;  %s5810_s29 = smov (!%p689_p2), 96  }
  0x13   : > { %s5837_s8 = sld [smem:[#allocation7_spill]] (!%p689_p2)  ;;  %s5815_s9 = smov (!%p689_p2), 16  }
  0x14   : > { %s5838_s1 = sld [smem:[#allocation8_spill]] (!%p689_p2)  ;;  %s5845_s3 = smov (!%p689_p2), 8  }
  0x15   : > { %v802_v0 = vld [vmem:[%s5833_s7 + $0xf0] sm:$0xff]  ;;  %v800_v1 = vld [vmem:[%s5833_s7 + $0xe0] sm:$0xff]  ;;  %v803_v6 = vld [vmem:[%s5833_s7 + $0xf8] sm:$0xff]  ;;  %s5851_s5 = smov (!%p757_p3, %s3570_s5), 11  ;;  %vm864_vm0 = vcmask 1040384   ;;  %vm871_vm1 = vcmask 1046528  }
  0x16   : > { %804 = vmatpush.msra.mxu0 %v802_v0  ;;  %v798_v2 = vld [vmem:[%s5833_s7 + $0xd0] sm:$0xff]  ;;  %v796_v3 = vld [vmem:[%s5833_s7 + $0xc0] sm:$0xff]  ;;  %v801_v7 = vld [vmem:[%s5833_s7 + $0xe8] sm:$0xff]  ;;  %827 = vmatpush.msra.mxu1 %v803_v6  ;;  %s5809_s28 = sshll.u32 %s5851_s5, 3  ;;  %vm882_vm2 = vcmask 130048   ;;  %vm946_vm3 = vcmask 523264  }
  0x17   : > { %v794_v4 = vld [vmem:[%s5833_s7 + $0xb0] sm:$0xff]  ;;  %v792_v5 = vld [vmem:[%s5833_s7 + $0xa0] sm:$0xff]  ;;  %v799_v9 = vld [vmem:[%s5833_s7 + $0xd8] sm:$0xff]  ;;  %s760_s2 = scalar_lea.vmem %s5834_s27, %s5809_s28  ;;  %vm1545_vm4 = vcmask 64512   ;;  %vm1593_vm5 = vcmask 1042432   ;;  %s5813_s27 = smov 32  }
  0x18   : > { %805 = vmatpush.msra.mxu0 %v800_v1  ;;  %v790_v8 = vld [vmem:[%s5833_s7 + $0x90] sm:$0xff]  ;;  %828 = vmatpush.msra.mxu1 %v801_v7  ;;  %v788_v10 = vld [vmem:[%s5833_s7 + $0x80] sm:$0xff]  ;;  %v797_v11 = vld [vmem:[%s5833_s7 + $0xc8] sm:$0xff]  ;;  %vm1602_vm6 = vcmask 261120   ;;  %vm1643_vm7 = vcmask 785408   ;;  %vm1982_vm8 = vcmask 1043456  }
  0x19   : > { %v786_v12 = vld [vmem:[%s5833_s7 + $0x70] sm:$0xff]  ;;  %v795_v13 = vld [vmem:[%s5833_s7 + $0xb8] sm:$0xff]  ;;  %v784_v14 = vld [vmem:[%s5833_s7 + $0x60] sm:$0xff]  ;;  %s5840_s26 = sld [smem:[#allocation9_spill]]  ;;  %vm1978_vm9 = vcmask 31744   ;;  %vm2054_vm10 = vcmask 392192  }
  0x1a   : > { %806 = vmatpush.msra.mxu0 %v798_v2  ;;  %829 = vmatpush.msra.mxu1 %v799_v9  ;;  %v793_v15 = vld [vmem:[%s5833_s7 + $0xa8] sm:$0xff]  ;;  %v782_v16 = vld [vmem:[%s5833_s7 + $0x50] sm:$0xff]  ;;  %v791_v17 = vld [vmem:[%s5833_s7 + $0x98] sm:$0xff]  ;;  %s5841_s28 = sld [smem:[#allocation10_spill]]  ;;  %vm2342_vm11 = vcmask 195584   ;;  %vm2701_vm12 = vcmask 1041408  }
  0x1b   : > { %v780_v18 = vld [vmem:[%s5833_s7 + $0x40] sm:$0xff]  ;;  %v789_v19 = vld [vmem:[%s5833_s7 + $0x88] sm:$0xff]  ;;  %v778_v20 = vld [vmem:[%s5833_s7 + $0x30] sm:$0xff]  ;;  %s5847_s6 = sld [smem:[#allocation12_spill]]  ;;  %vm2697_vm13 = vcmask 15360  }
  0x1c   : > { %807 = vmatpush.msra.mxu0 %v796_v3  ;;  %830 = vmatpush.msra.mxu1 %v797_v11  ;;  %v787_v21 = vld [vmem:[%s5833_s7 + $0x78] sm:$0xff]  ;;  %v776_v22 = vld [vmem:[%s5833_s7 + $0x20] sm:$0xff]  ;;  %v785_v23 = vld [vmem:[%s5833_s7 + $0x68] sm:$0xff] }
  0x1d   : > { %v774_v24 = vld [vmem:[%s5833_s7 + $0x10] sm:$0xff]  ;;  %v783_v25 = vld [vmem:[%s5833_s7 + $0x58] sm:$0xff]  ;;  %v772_v26 = vld [vmem:[%s5833_s7] sm:$0xff] }
  0x1e   : > { %808 = vmatpush.msra.mxu0 %v794_v4  ;;  %831 = vmatpush.msra.mxu1 %v795_v13  ;;  %v781_v27 = vld [vmem:[%s5833_s7 + $0x48] sm:$0xff]  ;;  %v769_v28 = vld [vmem:[%s760_s2] sm:$0xff]  ;;  %v779_v29 = vld [vmem:[%s5833_s7 + $0x38] sm:$0xff] }
  0x1f   : > { %v777_v30 = vld [vmem:[%s5833_s7 + $0x28] sm:$0xff]  ;;  %v775_v31 = vld [vmem:[%s5833_s7 + $0x18] sm:$0xff]  ;;  %v771_v58 = vld [vmem:[%s5835_s30] sm:$0xff]  ;;  %s5836_s30 = sld [smem:[#allocation6_spill]] }
  0x20   : > { %809 = vmatpush.msra.mxu0 %v792_v5  ;;  %832 = vmatpush.msra.mxu1 %v793_v15  ;;  %v773_v32 = vld [vmem:[%s5833_s7 + $0x8] sm:$0xff]  ;;  %v4464_v59 = vld [vmem:[%s5792_s15 + $0x58] sm:$0xff]  ;;  %v4463_v60 = vld [vmem:[%s5792_s15 + $0x50] sm:$0xff]  ;;  %s5846_s7 = sld [smem:[#allocation11_spill]] }
  0x21   : > { %v770_v33 = vld [vmem:[%s760_s2 + $0x8] sm:$0xff]  ;;  %v4461_v62 = vld [vmem:[%s5792_s15 + $0x40] sm:$0xff]  ;;  %v4460_v63 = vld [vmem:[%s5792_s15 + $0x38] sm:$0xff]  ;;  %s4635_s2 = smov 112  }
  0x22   : > { %810 = vmatpush.msra.mxu0 %v790_v8  ;;  %833 = vmatpush.msra.mxu1 %v791_v17  ;;  %v4462_v61 = vld [vmem:[%s5792_s15 + $0x48] sm:$0xff]  ;;  %v4459_v0 = vld [vmem:[%s5792_s15 + $0x30] sm:$0xff]  ;;  %v4457_v2 = vld [vmem:[%s5792_s15 + $0x20] sm:$0xff] }
  0x23   : > { %1026 = vmatpush.bf16.msra.mxu3 %v4460_v63  ;;  %v4458_v1 = vld [vmem:[%s5792_s15 + $0x28] sm:$0xff]  ;;  %v906_v3 = vld [vmem:[%s5793_s16] sm:$0x7]  ;;  %v4456_v4 = vld [vmem:[%s5792_s15 + $0x18] sm:$0xff] }
  0x24   : > { %811 = vmatpush.msra.mxu0 %v788_v10  ;;  %834 = vmatpush.msra.mxu1 %v789_v19  ;;  %v907_v5 = vperm.slane %v906_v3, 0  ;;  %v4455_v6 = vld [vmem:[%s5792_s15 + $0x10] sm:$0xff]  ;;  %v909_v7 = vperm.slane %v906_v3, 1  ;;  %v4454_v10 = vld [vmem:[%s5792_s15 + $0x8] sm:$0xff]  ;;  %v4488_v63 = vld [vmem:[%s5792_s15 + $0x118] sm:$0xff] }
  0x26   : > { %812 = vmatpush.msra.mxu0 %v786_v12  ;;  %835 = vmatpush.msra.mxu1 %v787_v21 }
  0x27   : > { %1027 = vmatpush.bf16.msra.mxu3 %v4459_v0  ;;  %v1497_v0 = vld [vmem:[%s5836_s30 + $0x8] sm:$0xff] }
  0x28   : > { %813 = vmatpush.msra.mxu0 %v784_v14  ;;  %836 = vmatpush.msra.mxu1 %v785_v23 }
  0x2a   : > { %814 = vmatpush.msra.mxu0 %v782_v16  ;;  %837 = vmatpush.msra.mxu1 %v783_v25  ;;  %v4453_v16 = vld [vmem:[%s5792_s15] sm:$0xff]  ;;  %v4475_v25 = vld [vmem:[%s5792_s15 + $0xb0] sm:$0xff] }
  0x2b   : > { %1028 = vmatpush.bf16.msra.mxu3 %v4458_v1  ;;  %v1496_v1 = vld [vmem:[%s5836_s30] sm:$0xff] }
  0x2c   : > { %815 = vmatpush.msra.mxu0 %v780_v18  ;;  %838 = vmatpush.msra.mxu1 %v781_v27  ;;  %v4473_v27 = vld [vmem:[%s5792_s15 + $0xa0] sm:$0xff] }
  0x2e   : > { %816 = vmatpush.msra.mxu0 %v778_v20  ;;  %839 = vmatpush.msra.mxu1 %v779_v29  ;;  %v4471_v29 = vld [vmem:[%s5792_s15 + $0x90] sm:$0xff] }
  0x2f   : > { %1029 = vmatpush.bf16.msra.mxu3 %v4457_v2  ;;  %v4487_v2 = vld [vmem:[%s5792_s15 + $0x110] sm:$0xff] }
  0x30   : > { %817 = vmatpush.msra.mxu0 %v776_v22  ;;  %840 = vmatpush.msra.mxu1 %v777_v30  ;;  %v4470_v30 = vld [vmem:[%s5792_s15 + $0x88] sm:$0xff] }
  0x32   : > { %818 = vmatpush.msra.mxu0 %v774_v24  ;;  %841 = vmatpush.msra.mxu1 %v775_v31  ;;  %v4476_v24 = vld [vmem:[%s5792_s15 + $0xb8] sm:$0xff]  ;;  %v4469_v31 = vld [vmem:[%s5792_s15 + $0x80] sm:$0xff] }
  0x33   : > { %1030 = vmatpush.bf16.msra.mxu3 %v4456_v4  ;;  %v4485_v4 = vld [vmem:[%s5792_s15 + $0x100] sm:$0xff] }
  0x34   : > { %819 = vmatpush.msra.mxu0 %v772_v26  ;;  %842 = vmatpush.msra.mxu1 %v773_v32  ;;  %v4474_v26 = vld [vmem:[%s5792_s15 + $0xa8] sm:$0xff]  ;;  %v950_v32 = vperm.slane %v906_v3, 2 }
  0x35   : > { %820 = vmatmul.f32.vlgmr.msra.gmra.mxu0 %v769_v28  ;;  %843 = vmatmul.f32.vlgmr.msra.gmra.mxu1 %v769_v28  ;;  %v4472_v28 = vld [vmem:[%s5792_s15 + $0x98] sm:$0xff]  ;;  %v4486_v3 = vld [vmem:[%s5792_s15 + $0x108] sm:$0xff] }
  0x37   : > { %1031 = vmatpush.bf16.msra.mxu3 %v4455_v6 }
  0x3b   : > { %1032 = vmatpush.bf16.msra.mxu3 %v4454_v10 }
  0x3d   : > { %823 = vmatmul.f32.gmra.mxu0 %v770_v33  ;;  %846 = vmatmul.f32.gmra.mxu1 %v770_v33  ;;  %v3624_v33 = vld [vmem:[%s5793_s16 + $0x4] sm:$0x7] }
  0x3f   : > { %1033 = vmatpush.bf16.msra.mxu3 %v4453_v16 }
  0x43   : > { %1190 = vmatpush.bf16.msrb.mxu3 %v4476_v24 }
  0x47   : > { %1191 = vmatpush.bf16.msrb.mxu3 %v4475_v25  ;;  %v4480_v25 = vld [vmem:[%s5792_s15 + $0xd8] sm:$0xff] }
  0x4b   : > { %1192 = vmatpush.bf16.msrb.mxu3 %v4474_v26 }
  0x4f   : > { %1193 = vmatpush.bf16.msrb.mxu3 %v4473_v27 }
  0xb2   : > { %v821_v34 = vpop.f32.mrf.mxu0  ;;  %v844_v37 = vpop.f32.mrf.mxu1 }
  0xba   : > { %v824_v35 = vpop.f32.mrf.mxu0  ;;  %v847_v41 = vpop.f32.mrf.mxu1 }
  0xbb   : > { %v4614_v36 = vpack.i.bf16 %v824_v35, %v821_v34 }
  0xbd   : > { %4615 = vrot.lane.b32.xlu0 %v4614_v36, %s5811_s0 }
 0x12f   : > { %v4616_v38 = vpop.permute.xlu0 %4615 }
 0x130   : > { %v4618_v39 = vunpack.i.h.bf16 %v4616_v38  ;;  %v4617_v40 = vunpack.i.l.bf16 %v4616_v38  ;;  %v4467_v38 = vld [vmem:[%s5792_s15 + $0x70] sm:$0xff] }
 0x132   : > { %v858_v42 = vmax.f32 %v821_v34, %v4617_v40  ;;  %v859_v43 = vmax.f32 %v824_v35, %v4618_v39  ;;  %v4468_v34 = vld [vmem:[%s5792_s15 + $0x78] sm:$0xff]  ;;  %v1056_v40 = vperm.slane %v3624_v33, 1 }
 0x134   : > { %v860_v44 = vmax.f32 %v858_v42, %v844_v37  ;;  %v861_v45 = vmax.f32 %v859_v43, %v847_v41  ;;  %v1054_v37 = vperm.slane %v3624_v33, 0  ;;  %v4466_v42 = vld [vmem:[%s5792_s15 + $0x68] sm:$0xff] }
 0x136   : > { %v865_v46 = vrot.slane %v860_v44, 7  ;;  %v866_v47 = vrot.slane %v861_v45, 7  ;;  %v873_v48 = vrot.slane %v861_v45, 1  ;;  %v872_v51 = vrot.slane %v860_v44, 1 }
 0x138   : > { %v867_v49 = vsel %vm864_vm0, %v865_v46, %v866_v47  ;;  %v870_v50 = vsel %vm864_vm0, %v860_v44, %v865_v46  ;;  %v877_v54 = vsel %vm871_vm1, %v873_v48, %v861_v45  ;;  %v874_v56 = vsel %vm871_vm1, %v872_v51, %v873_v48  ;;  %v1503_v51 = vld [vmem:[%s5836_s30 + $0x38] sm:$0xff] }
 0x139   : > { %v879_v52 = vmax.f32 %v867_v49, %v861_v45  ;;  %v878_v53 = vmax.f32 %v870_v50, %v860_v44  ;;  %v4465_v49 = vld [vmem:[%s5792_s15 + $0x60] sm:$0xff] }
 0x13b   : > { %v881_v55 = vmax.f32 %v879_v52, %v877_v54  ;;  %v880_v57 = vmax.f32 %v878_v53, %v874_v56  ;;  %v1502_v52 = vld [vmem:[%s5836_s30 + $0x30] sm:$0xff] }
 0x13d   : > { %900 = vmatpush.msra.mxu2 %v881_v55  ;;  %v1501_v55 = vld [vmem:[%s5836_s30 + $0x28] sm:$0xff] }
 0x13f   : > { %901 = vmatpush.msra.mxu2 %v880_v57 }
 0x140   : > { %3574 = vmatmul.msk.f32.vlgmr.msra.gmra.mxu2 %vm882_vm2, %v771_v58  ;;  %v1500_v58 = vld [vmem:[%s5836_s30 + $0x20] sm:$0xff] }
 0x141   : > { %1043 = vmatpush.bf16.msrb.mxu2 %v4464_v59 }
 0x145   : > { %1044 = vmatpush.bf16.msrb.mxu2 %v4463_v60 }
 0x149   : > { %1045 = vmatpush.bf16.msrb.mxu2 %v4462_v61  ;;  %v1499_v61 = vld [vmem:[%s5836_s30 + $0x18] sm:$0xff] }
 0x14d   : > { %1046 = vmatpush.bf16.msrb.mxu2 %v4461_v62  ;;  %v1498_v62 = vld [vmem:[%s5836_s30 + $0x10] sm:$0xff] }
 0x151   : > { %1173 = vmatpush.bf16.msra.mxu2 %v4472_v28  ;;  %v4479_v28 = vld [vmem:[%s5792_s15 + $0xd0] sm:$0xff] }
 0x155   : > { %1174 = vmatpush.bf16.msra.mxu2 %v4471_v29  ;;  %v4478_v29 = vld [vmem:[%s5792_s15 + $0xc8] sm:$0xff] }
 0x159   : > { %1175 = vmatpush.bf16.msra.mxu2 %v4470_v30  ;;  %v4477_v30 = vld [vmem:[%s5792_s15 + $0xc0] sm:$0xff] }
 0x15d   : > { %1176 = vmatpush.bf16.msra.mxu2 %v4469_v31 }
 0x161   : > { %1177 = vmatpush.bf16.msra.mxu2 %v4468_v34 }
 0x165   : > { %1178 = vmatpush.bf16.msra.mxu2 %v4467_v38 }
 0x169   : > { %1179 = vmatpush.bf16.msra.mxu2 %v4466_v42 }
 0x16d   : > { %1180 = vmatpush.bf16.msra.mxu2 %v4465_v49  ;;  %v4498_v49 = vld [vmem:[%s5792_s15 + $0x168] sm:$0xff] }
 0x1c3   : > { %v4923_v8 = vpop.f32.mrf.mxu2 }
 0x1c4   : > { %v908_v9 = vmul.f32 %v907_v5, %v4923_v8  ;;  %v1097_v5 = vperm.slane %v3624_v33, 2 }
 0x1c6   : > { %v910_v11 = vadd.f32 %v909_v7, %v908_v9  ;;  %v5020_v7 = vld [vmem:[%s5793_s16 + $0x8] sm:$0x7] }
 0x1c8   : > { %v911_v12 = vmax.f32 %v910_v11, 0.0  ;;  %v1202_v11 = vperm.slane %v5020_v7, 0 }
 0x1ca   : > { %943 = vrot.lane.b32.xlu0 %v911_v12, %s5811_s0  ;;  %v940_v13 = vrot.slane %v911_v12, 1  ;;  %v937_v17 = vrot.slane %v911_v12, 7 }
 0x1cc   : > { %v942_v14 = vsel %vm871_vm1, %v940_v13, 0.0  ;;  %v939_v19 = vsel %vm864_vm0, 0.0, %v937_v17  ;;  %v1204_v13 = vperm.slane %v5020_v7, 1 }
 0x1cd   : > { %v949_v15 = vpack.c.bf16 %v942_v14, %v942_v14 }
 0x1cf   : > { %3623 = vmatmul.msk.bf16.vlgmr.msrb.gmra.mxu2 %vm946_vm3, %v949_v15 }
 0x1d0   : > { %1515 = vmatpush.msrb.mxu2 %v1503_v51  ;;  %v1245_v51 = vperm.slane %v5020_v7, 2 }
 0x1d2   : > { %1516 = vmatpush.msrb.mxu2 %v1502_v52  ;;  %v3772_v52 = vld [vmem:[%s5793_s16 + $0xc] sm:$0x7] }
 0x1d4   : > { %1517 = vmatpush.msrb.mxu2 %v1501_v55  ;;  %v1349_v55 = vperm.slane %v3772_v52, 0 }
 0x1d6   : > { %1518 = vmatpush.msrb.mxu2 %v1500_v58 }
 0x1d8   : > { %1519 = vmatpush.msrb.mxu2 %v1499_v61 }
 0x1da   : > { %1520 = vmatpush.msrb.mxu2 %v1498_v62  ;;  %v4506_v62 = vld [vmem:[%s5794_s17 + $0x28] sm:$0xff] }
 0x1dc   : > { %1521 = vmatpush.msrb.mxu2 %v1497_v0  ;;  %v4505_v0 = vld [vmem:[%s5794_s17 + $0x20] sm:$0xff] }
 0x1de   : > { %1522 = vmatpush.msrb.mxu2 %v1496_v1 }
 0x23c   : > { %v944_v18 = vpop.permute.xlu0 %943 }
 0x23d   : > { %v947_v20 = vsel %vm946_vm3, %v939_v19, %v944_v18 }
 0x23e   : > { %v948_v21 = vpack.c.bf16 %v947_v20, %v947_v20 }
 0x240   : > { %1034 = vmatmul.bf16.vlgmr.msra.gmra.mxu3 %v948_v21  ;;  %v4483_v21 = vld [vmem:[%s5792_s15 + $0xf0] sm:$0xff] }
 0x241   : > { %1338 = vmatpush.bf16.msra.mxu3 %v4488_v63 }
 0x245   : > { %1339 = vmatpush.bf16.msra.mxu3 %v4487_v2 }
 0x249   : > { %1340 = vmatpush.bf16.msra.mxu3 %v4486_v3  ;;  %v4504_v3 = vld [vmem:[%s5794_s17 + $0x18] sm:$0xff] }
 0x24d   : > { %1341 = vmatpush.bf16.msra.mxu3 %v4485_v4  ;;  %v1569_v4 = vld [vmem:[%s5795_s18] sm:$0x7] }
 0x252   : > { %v1048_v22 = vpop.f32.mrf.mxu2 }
 0x25a   : > { %v1050_v23 = vpop.f32.mrf.mxu2 }
 0x25b   : > { %v4481_v23 = vld [vmem:[%s5792_s15 + $0xe0] sm:$0xff] }
 0x2c3   : > { %v1035_v35 = vpop.f32.mrf.mxu3 }
 0x2c4   : > { %v1036_v36 = vadd.f32 %v1035_v35, %v950_v32 }
 0x2c6   : > { %v1049_v39 = vadd.f32 %v1048_v22, %v1036_v36  ;;  %v4482_v22 = vld [vmem:[%s5792_s15 + $0xe8] sm:$0xff] }
 0x2c8   : > { %v1055_v41 = vmul.f32 %v1054_v37, %v1049_v39 }
 0x2ca   : > { %v1057_v43 = vadd.f32 %v1056_v40, %v1055_v41 }
 0x2cb   : > { %v1037_v44 = vpop.f32.mrf.mxu3 }
 0x2cc   : > { %v1058_v45 = vmax.f32 %v1057_v43, 0.0 }
 0x2ce   : > { %1091 = vrot.lane.b32.xlu1 %v1058_v45, %s5811_s0  ;;  %v1088_v46 = vrot.slane %v1058_v45, 1  ;;  %v1085_v50 = vrot.slane %v1058_v45, 7 }
 0x2d0   : > { %v1090_v47 = vsel %vm871_vm1, %v1088_v46, 0.0  ;;  %v1087_v54 = vsel %vm864_vm0, 0.0, %v1085_v50  ;;  %v1495_v46 = vld [vmem:[%s5837_s8] sm:$0xf]  ;;  %s5819_s8 = smov 8  }
 0x2d1   : > { %v1096_v48 = vpack.c.bf16 %v1090_v47, %v1090_v47  ;;  %v4500_v47 = vld [vmem:[%s5792_s15 + $0x178] sm:$0xff]  ;;  %v4497_v50 = vld [vmem:[%s5792_s15 + $0x160] sm:$0xff] }
 0x2d3   : > { %3697 = vmatmul.msk.bf16.vlgmr.msrb.gmra.mxu3 %vm946_vm3, %v1096_v48  ;;  %v4499_v48 = vld [vmem:[%s5792_s15 + $0x170] sm:$0xff] }
 0x2d4   : > { %1485 = vmatpush.bf16.msrb.mxu3 %v4500_v47 }
 0x2d8   : > { %1486 = vmatpush.bf16.msrb.mxu3 %v4499_v48 }
 0x2dc   : > { %1487 = vmatpush.bf16.msrb.mxu3 %v4498_v49 }
 0x2e0   : > { %1488 = vmatpush.bf16.msrb.mxu3 %v4497_v50 }
 0x340   : > { %v1092_v53 = vpop.permute.xlu1 %1091 }
 0x341   : > { %v1094_v56 = vsel %vm946_vm3, %v1087_v54, %v1092_v53 }
 0x342   : > { %v1095_v57 = vpack.c.bf16 %v1094_v56, %v1094_v56 }
 0x344   : > { %1181 = vmatmul.bf16.vlgmr.msra.gmra.mxu2 %v1095_v57  ;;  %v1351_v57 = vperm.slane %v3772_v52, 1  ;;  %v5152_v52 = vld [vmem:[%s5795_s18 + $0x8] sm:$0x7] }
 0x356   : > { %v1195_v59 = vpop.f32.mrf.mxu3 }
 0x35e   : > { %v1197_v60 = vpop.f32.mrf.mxu3 }
 0x3c7   : > { %v1182_v6 = vpop.f32.mrf.mxu2 }
 0x3c8   : > { %v1183_v9 = vadd.f32 %v1182_v6, %v1097_v5  ;;  %v1570_v5 = vperm.slane %v1569_v4, 0  ;;  %v1572_v6 = vperm.slane %v1569_v4, 1 }
 0x3ca   : > { %v1196_v10 = vadd.f32 %v1195_v59, %v1183_v9 }
 0x3cc   : > { %v5024_v12 = vadd.f32 %v1196_v10, %v4923_v8  ;;  %v4484_v8 = vld [vmem:[%s5792_s15 + $0xf8] sm:$0xff] }
 0x3cd   : > { %1321 = vmatpush.bf16.msrb.mxu1 %v4484_v8 }
 0x3ce   : > { %v1203_v14 = vmul.f32 %v1202_v11, %v5024_v12  ;;  %3846 = vmatmul.msk.f32.vlgmr.msrb.gmra.mxu2 %vm946_vm3, %v5024_v12 }
 0x3cf   : > { %v1184_v15 = vpop.f32.mrf.mxu2 }
 0x3d0   : > { %v1205_v16 = vadd.f32 %v1204_v13, %v1203_v14  ;;  %v4503_v15 = vld [vmem:[%s5794_s17 + $0x10] sm:$0xff] }
 0x3d1   : > { %1322 = vmatpush.bf16.msrb.mxu1 %v4483_v21 }
 0x3d2   : > { %v1206_v17 = vmax.f32 %v1205_v16, 0.0  ;;  %v4502_v16 = vld [vmem:[%s5794_s17 + $0x8] sm:$0xff] }
 0x3d4   : > { %v1236_v18 = vrot.slane %v1206_v17, 1  ;;  %v1233_v32 = vrot.slane %v1206_v17, 7 }
 0x3d5   : > { %1323 = vmatpush.bf16.msrb.mxu1 %v4482_v22 }
 0x3d6   : > { %v1238_v19 = vsel %vm871_vm1, %v1236_v18, 0.0  ;;  %v1235_v34 = vsel %vm864_vm0, 0.0, %v1233_v32 }
 0x3d7   : > { %v1244_v20 = vpack.c.bf16 %v1238_v19, %v1238_v19 }
 0x3d9   : > { %3771 = vmatmul.msk.bf16.vlgmr.msra.gmra.mxu3 %vm946_vm3, %v1244_v20  ;;  %1324 = vmatpush.bf16.msrb.mxu1 %v4481_v23 }
 0x3dd   : > { %1325 = vmatpush.bf16.msrb.mxu1 %v4480_v25 }
 0x3e1   : > { %1326 = vmatpush.bf16.msrb.mxu1 %v4479_v28 }
 0x3e5   : > { %1327 = vmatpush.bf16.msrb.mxu1 %v4478_v29 }
 0x3e9   : > { %1328 = vmatpush.bf16.msrb.mxu1 %v4477_v30 }
 0x3ed   : > { %1649 = vmatpush.bf16.msra.mxu1 %v4506_v62 }
 0x3f1   : > { %1650 = vmatpush.bf16.msra.mxu1 %v4505_v0 }
 0x3f5   : > { %1651 = vmatpush.bf16.msra.mxu1 %v4504_v3  ;;  %v4516_v3 = vld [vmem:[%s5794_s17 + $0x78] sm:$0xff] }
 0x3f9   : > { %1652 = vmatpush.bf16.msra.mxu1 %v4503_v15 }
 0x3fd   : > { %1653 = vmatpush.bf16.msra.mxu1 %v4502_v16 }
 0x451   : > { %v1524_v24 = vpop.f32.mrf.mxu2 }
 0x452   : > { %1532 = vrot.lane.b32.xlu2 %v1524_v24, %s5811_s0  ;;  %1528 = vrot.lane.b32.xlu1 %v1524_v24, %s5810_s29 }
 0x45a   : > { %1239 = vrot.lane.b32.xlu2 %v1206_v17, %s5811_s0  ;;  %v4501_v17 = vld [vmem:[%s5794_s17] sm:$0xff] }
 0x45b   : > { %1654 = vmatpush.bf16.msra.mxu1 %v4501_v17 }
 0x45c   : > { %v1343_v26 = vpop.f32.mrf.mxu3 }
 0x464   : > { %v1345_v27 = vpop.f32.mrf.mxu3 }
 0x465   : > { %v1606_v27 = vperm.slane %v1569_v4, 2  ;;  %v4515_v4 = vld [vmem:[%s5794_s17 + $0x70] sm:$0xff] }
 0x4ac   : > { %v1533_v31 = vpop.permute.xlu2 %1532 }
 0x4b4   : > { %v1240_v33 = vpop.permute.xlu2 %1239 }
 0x4b5   : > { %v1242_v35 = vsel %vm946_vm3, %v1235_v34, %v1240_v33 }
 0x4b6   : > { %v1243_v36 = vpack.c.bf16 %v1242_v35, %v1242_v35 }
 0x4b8   : > { %1329 = vmatmul.bf16.vlgmr.msrb.gmra.mxu1 %v1243_v36 }
 0x4c4   : > { %v1529_v37 = vpop.permute.xlu1 %1528 }
 0x4c5   : > { %v1531_v38 = vmax.f32 %v1524_v24, %v1529_v37 }
 0x4c7   : > { %v1535_v39 = vmax.f32 %v1531_v38, %v1533_v31  ;;  %v4512_v38 = vld [vmem:[%s5794_s17 + $0x58] sm:$0xff] }
 0x4c8   : > { %1739 = vmatpush.bf16.msra.mxu3 %v4512_v38 }
 0x4c9   : > { %v1537_v40 = vrot.slane %v1535_v39, 7  ;;  %v1540_v41 = vrot.slane %v1535_v39, 1 }
 0x4cb   : > { %v1539_v42 = vsel %vm864_vm0, %v1535_v39, %v1537_v40  ;;  %v1542_v44 = vsel %vm871_vm1, %v1540_v41, %v1535_v39  ;;  %v4510_v40 = vld [vmem:[%s5794_s17 + $0x48] sm:$0xff]  ;;  %v4509_v41 = vld [vmem:[%s5794_s17 + $0x40] sm:$0xff] }
 0x4cc   : > { %v1543_v43 = vmax.f32 %v1539_v42, %v1535_v39  ;;  %v4511_v39 = vld [vmem:[%s5794_s17 + $0x50] sm:$0xff]  ;;  %v4508_v42 = vld [vmem:[%s5794_s17 + $0x38] sm:$0xff] }
 0x4cd   : > { %1740 = vmatpush.bf16.msra.mxu3 %v4511_v39 }
 0x4ce   : > { %v1544_v45 = vmax.f32 %v1543_v43, %v1542_v44  ;;  %v4507_v43 = vld [vmem:[%s5794_s17 + $0x30] sm:$0xff] }
 0x4d0   : > { %1564 = vmatpush.msra.mxu2 %v1544_v45 }
 0x4d1   : > { %3847 = vmatmul.msk.f32.vlgmr.msra.gmra.mxu2 %vm1545_vm4, %v1495_v46  ;;  %1741 = vmatpush.bf16.msra.mxu3 %v4510_v40 }
 0x4d5   : > { %1742 = vmatpush.bf16.msra.mxu3 %v4509_v41 }
 0x4d9   : > { %1743 = vmatpush.bf16.msra.mxu3 %v4508_v42 }
 0x4dd   : > { %1744 = vmatpush.bf16.msra.mxu3 %v4507_v43  ;;  %v4527_v43 = vld [vmem:[%s5796_s19 + $0x10] sm:$0xff] }
 0x4de   : > { %2063 = vmatpush.bf16.msrb.mxu1 %v4527_v43  ;;  %v4533_v43 = vld [vmem:[%s5796_s19 + $0x40] sm:$0xff] }
 0x535   : > { %v1330_v53 = vpop.f32.mrf.mxu1 }
 0x536   : > { %v1331_v54 = vadd.f32 %v1330_v53, %v1245_v51 }
 0x538   : > { %v1344_v56 = vadd.f32 %v1343_v26, %v1331_v54  ;;  %v3873_v26 = vld [vmem:[%s5795_s18 + $0x4] sm:$0x7] }
 0x539   : > { %v1662_v28 = vperm.slane %v3873_v26, 0  ;;  %v1664_v31 = vperm.slane %v3873_v26, 1  ;;  %v1697_v51 = vperm.slane %v3873_v26, 2 }
 0x53a   : > { %v1350_v58 = vmul.f32 %v1349_v55, %v1344_v56  ;;  %v1753_v55 = vperm.slane %v5152_v52, 0 }
 0x53c   : > { %v1352_v59 = vadd.f32 %v1351_v57, %v1350_v58  ;;  %v1755_v57 = vperm.slane %v5152_v52, 1 }
 0x53d   : > { %v1332_v60 = vpop.f32.mrf.mxu1 }
 0x53e   : > { %v5083_v61 = vmax.f32 %v1352_v59, 0.0 }
 0x540   : > { %v1383_v63 = vrot.slane %v5083_v61, 1 }
 0x542   : > { %v1385_v1 = vsel %vm871_vm1, %v1383_v63, 0.0 }
 0x543   : > { %v1391_v2 = vpack.c.bf16 %v1385_v1, %v1385_v1  ;;  %v4518_v1 = vld [vmem:[%s5794_s17 + $0x88] sm:$0xff] }
 0x544   : > { %1830 = vmatpush.bf16.msrb.mxu2 %v4518_v1 }
 0x545   : > { %3845 = vmatmul.msk.bf16.vlgmr.msrb.gmra.mxu3 %vm946_vm3, %v1391_v2  ;;  %v4517_v2 = vld [vmem:[%s5794_s17 + $0x80] sm:$0xff] }
 0x548   : > { %1831 = vmatpush.bf16.msrb.mxu2 %v4517_v2 }
 0x54c   : > { %1832 = vmatpush.bf16.msrb.mxu2 %v4516_v3 }
 0x550   : > { %1833 = vmatpush.bf16.msrb.mxu2 %v4515_v4  ;;  %v4530_v4 = vld [vmem:[%s5796_s19 + $0x28] sm:$0xff] }
 0x554   : > { %v5100_v7 = vpop.f32.mrf.mxu2 }
 0x555   : > { %v1571_v9 = vmul.f32 %v1570_v5, %v5100_v7  ;;  %v4514_v5 = vld [vmem:[%s5794_s17 + $0x68] sm:$0xff] }
 0x556   : > { %1834 = vmatpush.bf16.msrb.mxu2 %v4514_v5  ;;  %v4529_v5 = vld [vmem:[%s5796_s19 + $0x20] sm:$0xff] }
 0x557   : > { %v1573_v10 = vadd.f32 %v1572_v6, %v1571_v9  ;;  %v4513_v6 = vld [vmem:[%s5794_s17 + $0x60] sm:$0xff]  ;;  %v1935_v9 = vld [vmem:[%s5838_s1 + $0x10] sm:$0xff] }
 0x559   : > { %v1574_v11 = vmax.f32 %v1573_v10, 0.0  ;;  %v1934_v10 = vld [vmem:[%s5838_s1 + $0x8] sm:$0xff] }
 0x55a   : > { %1835 = vmatpush.bf16.msrb.mxu2 %v4513_v6  ;;  %v4528_v6 = vld [vmem:[%s5796_s19 + $0x18] sm:$0xff] }
 0x55b   : > { %1595 = vrot.lane.b32.xlu0 %v1574_v11, %s5813_s27  ;;  %v1591_v13 = vrot.slane %v1574_v11, 1  ;;  %v1588_v19 = vrot.slane %v1574_v11, 7  ;;  %v1933_v11 = vld [vmem:[%s5838_s1] sm:$0xff] }
 0x55d   : > { %v1594_v14 = vsel %vm1593_vm5, %v1591_v13, 0.0  ;;  %v1590_v8 = vsel %vm864_vm0, 0.0, %v1588_v19 }
 0x55e   : > { %1599 = vrot.lane.b32.xlu1 %v1594_v14, %s5811_s0 }
 0x5c8   : > { %v5115_v18 = vpop.f32.mrf.mxu3 }
 0x5cd   : > { %v1596_v20 = vpop.permute.xlu0 %1595 }
 0x5ce   : > { %v1603_v21 = vsel %vm1602_vm6, %v1590_v8, %v1596_v20 }
 0x5d0   : > { %v1600_v22 = vpop.permute.xlu1 %1599  ;;  %v1492_v23 = vpop.f32.mrf.mxu3 }
 0x5d1   : > { %v1604_v24 = vsel %vm946_vm3, %v1603_v21, %v1600_v22 }
 0x5d2   : > { %v1605_v25 = vpack.c.bf16 %v1604_v24, %v1604_v24 }
 0x5d4   : > { %3872 = vmatmul.msk.bf16.vlgmr.msra.gmra.mxu1 %vm1643_vm7, %v1605_v25 }
 0x651   : > { %v1656_v29 = vpop.f32.mrf.mxu1 }
 0x652   : > { %v1657_v30 = vadd.f32 %v1656_v29, %v1606_v27 }
 0x654   : > { %v1663_v32 = vmul.f32 %v1662_v28, %v1657_v30 }
 0x656   : > { %v1665_v33 = vadd.f32 %v1664_v31, %v1663_v32 }
 0x658   : > { %v1666_v34 = vmax.f32 %v1665_v33, 0.0  ;;  %v1932_v33 = vld [vmem:[%s5840_s26] sm:$0x3]  ;;  %s4637_s26 = smov 120  }
 0x659   : > { %v1658_v35 = vpop.f32.mrf.mxu1 }
 0x65a   : > { %1687 = vrot.lane.b32.xlu2 %v1666_v34, %s5813_s27  ;;  %v1684_v36 = vrot.slane %v1666_v34, 1  ;;  %v1681_v44 = vrot.slane %v1666_v34, 7  ;;  %v2006_v34 = vld [vmem:[%s5797_s20] sm:$0x7] }
 0x65b   : > { %v2007_v35 = vperm.slane %v2006_v34, 0 }
 0x65c   : > { %v1686_v37 = vsel %vm1593_vm5, %v1684_v36, 0.0  ;;  %v1683_v46 = vsel %vm864_vm0, 0.0, %v1681_v44  ;;  %v2009_v36 = vperm.slane %v2006_v34, 1  ;;  %v4526_v44 = vld [vmem:[%s5796_s19 + $0x8] sm:$0xff] }
 0x65d   : > { %1691 = vrot.lane.b32.xlu0 %v1686_v37, %s5811_s0  ;;  %2064 = vmatpush.bf16.msrb.mxu1 %v4526_v44  ;;  %v4492_v44 = vld [vmem:[%s5792_s15 + $0x138] sm:$0xff] }
 0x6b4   : > { %v1688_v45 = vpop.permute.xlu2 %1687 }
 0x6b5   : > { %v1694_v47 = vsel %vm1602_vm6, %v1683_v46, %v1688_v45  ;;  %v4525_v45 = vld [vmem:[%s5796_s19] sm:$0xff] }
 0x6b6   : > { %2065 = vmatpush.bf16.msrb.mxu1 %v4525_v45  ;;  %v4532_v45 = vld [vmem:[%s5796_s19 + $0x38] sm:$0xff] }
 0x6cf   : > { %v1692_v48 = vpop.permute.xlu0 %1691 }
 0x6d0   : > { %v1695_v49 = vsel %vm946_vm3, %v1694_v47, %v1692_v48 }
 0x6d1   : > { %v1696_v50 = vpack.c.bf16 %v1695_v49, %v1695_v49 }
 0x6d3   : > { %3910 = vmatmul.msk.bf16.vlgmr.msra.gmra.mxu3 %vm1643_vm7, %v1696_v50 }
 0x756   : > { %v1746_v53 = vpop.f32.mrf.mxu3 }
 0x757   : > { %v1747_v54 = vadd.f32 %v1746_v53, %v1697_v51 }
 0x759   : > { %v5156_v56 = vadd.f32 %v1747_v54, %v5100_v7  ;;  %v1936_v7 = vld [vmem:[%s5838_s1 + $0x18] sm:$0xff]  ;;  %v4003_v54 = vld [vmem:[%s5797_s20 + $0x4] sm:$0x7] }
 0x75a   : > { %1952 = vmatpush.msra.mxu2 %v1936_v7 }
 0x75b   : > { %v1754_v58 = vmul.f32 %v1753_v55, %v5156_v56  ;;  %v2035_v55 = vperm.slane %v2006_v34, 2 }
 0x75c   : > { %1953 = vmatpush.msra.mxu2 %v1935_v9 }
 0x75d   : > { %v1756_v59 = vadd.f32 %v1755_v57, %v1754_v58  ;;  %v2073_v57 = vperm.slane %v4003_v54, 0 }
 0x75e   : > { %v1748_v60 = vpop.f32.mrf.mxu3  ;;  %1954 = vmatpush.msra.mxu2 %v1934_v10 }
 0x75f   : > { %v1757_v62 = vmax.f32 %v1756_v59, 0.0  ;;  %v2075_v60 = vperm.slane %v4003_v54, 1 }
 0x760   : > { %1955 = vmatpush.msra.mxu2 %v1933_v11 }
 0x761   : > { %1778 = vrot.lane.b32.xlu1 %v1757_v62, %s5813_s27  ;;  %v1775_v63 = vrot.slane %v1757_v62, 1  ;;  %v1772_v13 = vrot.slane %v1757_v62, 7 }
 0x763   : > { %v1777_v0 = vsel %vm1593_vm5, %v1775_v63, 0.0  ;;  %v1774_v15 = vsel %vm864_vm0, 0.0, %v1772_v13 }
 0x764   : > { %1782 = vrot.lane.b32.xlu2 %v1777_v0, %s5811_s0  ;;  %s5839_s0 = smov 96  }
 0x7be   : > { %v1783_v16 = vpop.permute.xlu2 %1782 }
 0x7d3   : > { %v1779_v14 = vpop.permute.xlu1 %1778 }
 0x7d4   : > { %v1785_v17 = vsel %vm1602_vm6, %v1774_v15, %v1779_v14 }
 0x7d5   : > { %v1786_v19 = vsel %vm946_vm3, %v1785_v17, %v1783_v16  ;;  %v2272_v16 = vld [vmem:[%s5841_s28 + $0x8] sm:$0xff]  ;;  %v2271_v17 = vld [vmem:[%s5841_s28] sm:$0xff] }
 0x7d6   : > { %v1787_v20 = vpack.c.bf16 %v1786_v19, %v1786_v19  ;;  %2290 = vmatpush.msra.mxu1 %v2272_v16  ;;  %v2102_v19 = vperm.slane %v4003_v54, 2 }
 0x7d8   : > { %3948 = vmatmul.msk.bf16.vlgmr.msrb.gmra.mxu2 %vm1643_vm7, %v1787_v20  ;;  %2291 = vmatpush.msra.mxu1 %v2271_v17 }
 0x7d9   : > { %2129 = vmatpush.bf16.msrb.mxu2 %v4530_v4 }
 0x7dd   : > { %2130 = vmatpush.bf16.msrb.mxu2 %v4529_v5 }
 0x7e1   : > { %2131 = vmatpush.bf16.msrb.mxu2 %v4528_v6 }
 0x7e8   : > { %3987 = vmatmul.msk.f32.vlgmr.msra.gmra.mxu2 %vm1602_vm6, %v5156_v56 }
 0x85b   : > { %v5199_v8 = vpop.f32.mrf.mxu2 }
 0x863   : > { %v1839_v21 = vpop.f32.mrf.mxu2 }
 0x86b   : > { %v1957_v22 = vpop.f32.mrf.mxu2 }
 0x86c   : > { %1965 = vrot.lane.b32.xlu1 %v1957_v22, %s5839_s0  ;;  %1961 = vrot.lane.b32.xlu0 %v1957_v22, %s4635_s2 }
 0x8de   : > { %v1962_v23 = vpop.permute.xlu0 %1961  ;;  %v1966_v25 = vpop.permute.xlu1 %1965 }
 0x8df   : > { %v1964_v24 = vmax.f32 %v1957_v22, %v1962_v23 }
 0x8e1   : > { %v1968_v26 = vmax.f32 %v1964_v24, %v1966_v25  ;;  %v5261_v24 = vld [vmem:[%s5797_s20 + $0x8] sm:$0x7]  ;;  %v4496_v25 = vld [vmem:[%s5792_s15 + $0x158] sm:$0xff] }
 0x8e2   : > { %1468 = vmatpush.bf16.msrb.mxu0 %v4496_v25 }
 0x8e3   : > { %v1970_v27 = vrot.slane %v1968_v26, 7  ;;  %v1973_v28 = vrot.slane %v1968_v26, 1 }
 0x8e5   : > { %v1972_v29 = vsel %vm864_vm0, %v1968_v26, %v1970_v27  ;;  %v1975_v31 = vsel %vm1593_vm5, %v1973_v28, %v1968_v26  ;;  %v2140_v27 = vperm.slane %v5261_v24, 0  ;;  %v4494_v28 = vld [vmem:[%s5792_s15 + $0x148] sm:$0xff] }
 0x8e6   : > { %v1976_v30 = vmax.f32 %v1972_v29, %v1968_v26  ;;  %v4495_v26 = vld [vmem:[%s5792_s15 + $0x150] sm:$0xff] }
 0x8e7   : > { %1469 = vmatpush.bf16.msrb.mxu0 %v4495_v26 }
 0x8e8   : > { %v1977_v32 = vmax.f32 %v1976_v30, %v1975_v31  ;;  %v2142_v30 = vperm.slane %v5261_v24, 1 }
 0x8ea   : > { %3988 = vmatpush.msk.msrb.mxu3 %vm1982_vm8, %v1977_v32  ;;  %v1788_v32 = vperm.slane %v5152_v52, 2 }
 0x8eb   : > { %3989 = vmatmul.msk.f32.vlgmr.msrb.gmra.mxu3 %vm1978_vm9, %v1932_v33  ;;  %1470 = vmatpush.bf16.msrb.mxu0 %v4494_v28  ;;  %v5279_v33 = vld [vmem:[%s5795_s18 + $0xc] sm:$0x7] }
 0x8ec   : > { %2196 = vmatpush.bf16.msra.mxu3 %v4533_v43 }
 0x8f0   : > { %2197 = vmatpush.bf16.msra.mxu3 %v4532_v45  ;;  %v5366_v45 = vld [vmem:[%s5799_s22 + $0x4] sm:$0x7] }
 0x96e   : > { %v2003_v37 = vpop.f32.mrf.mxu3 }
 0x96f   : > { %v2008_v38 = vmul.f32 %v2007_v35, %v2003_v37 }
 0x971   : > { %v2010_v39 = vadd.f32 %v2009_v36, %v2008_v38  ;;  %v1838_v36 = vadd.f32 %v5199_v8, %v1788_v32  ;;  %v4493_v8 = vld [vmem:[%s5792_s15 + $0x140] sm:$0xff] }
 0x972   : > { %1471 = vmatpush.bf16.msrb.mxu0 %v4493_v8 }
 0x973   : > { %v2011_v40 = vmax.f32 %v2010_v39, 0.0 }
 0x975   : > { %2025 = vrot.lane.b32.xlu2 %v2011_v40, %s5815_s9  ;;  %v2022_v41 = vrot.slane %v2011_v40, 1  ;;  %v2019_v46 = vrot.slane %v2011_v40, 7  ;;  %v1845_v40 = vperm.slane %v5279_v33, 1 }
 0x976   : > { %1472 = vmatpush.bf16.msrb.mxu0 %v4492_v44  ;;  %v4072_v44 = vld [vmem:[%s5798_s21 + $0x14] sm:$0xf] }
 0x977   : > { %v2024_v42 = vsel %vm864_vm0, %v2022_v41, 0.0  ;;  %v2021_v48 = vsel %vm864_vm0, 0.0, %v2019_v46  ;;  %v4491_v46 = vld [vmem:[%s5792_s15 + $0x130] sm:$0xff] }
 0x978   : > { %2029 = vrot.lane.b32.xlu0 %v2024_v42, %s5813_s27 }
 0x97a   : > { %1473 = vmatpush.bf16.msrb.mxu0 %v4491_v46  ;;  %v4523_v46 = vld [vmem:[%s5794_s17 + $0xb0] sm:$0xff] }
 0x9cf   : > { %v2026_v47 = vpop.permute.xlu2 %2025 }
 0x9d0   : > { %v2032_v49 = vsel %vm882_vm2, %v2021_v48, %v2026_v47  ;;  %v4531_v47 = vld [vmem:[%s5796_s19 + $0x30] sm:$0xff]  ;;  %v4490_v48 = vld [vmem:[%s5792_s15 + $0x128] sm:$0xff] }
 0x9d1   : > { %2198 = vmatpush.bf16.msra.mxu3 %v4531_v47  ;;  %1474 = vmatpush.bf16.msrb.mxu0 %v4490_v48  ;;  %v2386_v47 = vunpack.c.l.b16 %v4072_v44 }
 0x9ea   : > { %v2030_v50 = vpop.permute.xlu0 %2029 }
 0x9eb   : > { %v2033_v51 = vsel %vm1602_vm6, %v2032_v49, %v2030_v50  ;;  %v4489_v49 = vld [vmem:[%s5792_s15 + $0x120] sm:$0xff]  ;;  %v2323_v50 = vld [vmem:[%s5798_s21 + $0x8] sm:$0xf] }
 0x9ec   : > { %v2034_v53 = vpack.c.bf16 %v2033_v51, %v2033_v51  ;;  %1475 = vmatpush.bf16.msrb.mxu0 %v4489_v49  ;;  %v2336_v51 = vunpack.c.l.b16 %v2323_v50  ;;  %v2388_v49 = vpack.c.b16 %v2386_v47, %v2386_v47  ;;  %v4539_v47 = vld [vmem:[%s5798_s21 + $0x18] sm:$0xff] }
 0x9ee   : > { %4002 = vmatmul.msk.bf16.vlgmr.msrb.gmra.mxu1 %vm2054_vm10, %v2034_v53  ;;  %v2338_v53 = vpack.c.b16 %v2336_v51, %v2336_v51  ;;  %v2366_v51 = vrot.slane %v5366_v45, 1 }
 0x9f0   : > { %v2347_v54 = vsel %vm1982_vm8, %v2338_v53, 0  ;;  %v4522_v53 = vld [vmem:[%s5794_s17 + $0xa8] sm:$0xff] }
 0x9f1   : > { %2355 = vmatpush.bf16.msra.mxu2 %v2347_v54  ;;  %v2396_v54 = vsel %vm1982_vm8, %v2388_v49, 0 }
 0x9f2   : > { %2404 = vmatpush.bf16.msrb.mxu3 %v2396_v54 }
 0xa6b   : > { %v2067_v58 = vpop.f32.mrf.mxu1 }
 0xa6c   : > { %v2068_v59 = vadd.f32 %v2067_v58, %v2035_v55 }
 0xa6e   : > { %v2074_v62 = vmul.f32 %v2073_v57, %v2068_v59 }
 0xa70   : > { %v2076_v63 = vadd.f32 %v2075_v60, %v2074_v62 }
 0xa72   : > { %v2077_v0 = vmax.f32 %v2076_v63, 0.0 }
 0xa73   : > { %v2069_v1 = vpop.f32.mrf.mxu1 }
 0xa74   : > { %2092 = vrot.lane.b32.xlu1 %v2077_v0, %s5815_s9  ;;  %v2089_v2 = vrot.slane %v2077_v0, 1  ;;  %v2086_v7 = vrot.slane %v2077_v0, 7  ;;  %v2314_v1 = vld [vmem:[%s5799_s22] sm:$0x7] }
 0xa75   : > { %v2340_v43 = vrot.slane %v2314_v1, 2 }
 0xa76   : > { %v2091_v3 = vsel %vm864_vm0, %v2089_v2, 0.0  ;;  %v2088_v10 = vsel %vm864_vm0, 0.0, %v2086_v7 }
 0xa77   : > { %2096 = vrot.lane.b32.xlu2 %v2091_v3, %s5813_s27  ;;  %s5842_s27 = smov 32  }
 0xad1   : > { %v2097_v11 = vpop.permute.xlu2 %2096 }
 0xae6   : > { %v2093_v9 = vpop.permute.xlu1 %2092 }
 0xae7   : > { %v2099_v13 = vsel %vm882_vm2, %v2088_v10, %v2093_v9 }
 0xae8   : > { %v2100_v14 = vsel %vm1602_vm6, %v2099_v13, %v2097_v11  ;;  %v2317_v11 = vrot.slane %v2314_v1, 1 }
 0xae9   : > { %v2101_v15 = vpack.c.bf16 %v2100_v14, %v2100_v14  ;;  %v1380_v14 = vrot.slane %v5083_v61, 7 }
 0xaeb   : > { %4022 = vmatmul.msk.bf16.vlgmr.msrb.gmra.mxu2 %vm2054_vm10, %v2101_v15 }
 0xb6e   : > { %v2133_v20 = vpop.f32.mrf.mxu2 }
 0xb6f   : > { %v2134_v21 = vadd.f32 %v2133_v20, %v2102_v19  ;;  %v1382_v19 = vsel %vm864_vm0, 0.0, %v1380_v14 }
 0xb71   : > { %v5254_v22 = vadd.f32 %v2134_v21, %v2003_v37  ;;  %v1843_v37 = vperm.slane %v5279_v33, 0 }
 0xb73   : > { %4063 = vmatmul.msk.f32.vlgmr.msra.gmra.mxu1 %vm882_vm2, %v5254_v22  ;;  %v2141_v29 = vmul.f32 %v2140_v27, %v5254_v22  ;;  %v1844_v39 = vmul.f32 %v1843_v37, %v1838_v36 }
 0xb75   : > { %v2143_v31 = vadd.f32 %v2142_v30, %v2141_v29  ;;  %v1846_v41 = vadd.f32 %v1845_v40, %v1844_v39  ;;  %v5347_v29 = vld [vmem:[%s5797_s20 + $0xc] sm:$0x7]  ;;  %v2169_v30 = vperm.slane %v5261_v24, 2  ;;  %v4524_v24 = vld [vmem:[%s5794_s17 + $0xb8] sm:$0xff] }
 0xb76   : > { %v2135_v23 = vpop.f32.mrf.mxu2  ;;  %v2208_v36 = vperm.slane %v5347_v29, 1  ;;  %1920 = vmatpush.bf16.msra.mxu0 %v4524_v24 }
 0xb77   : > { %v2144_v35 = vmax.f32 %v2143_v31, 0.0  ;;  %v5288_v42 = vmax.f32 %v1846_v41, 0.0  ;;  %v2206_v31 = vperm.slane %v5347_v29, 0 }
 0xb79   : > { %v2156_v38 = vrot.slane %v2144_v35, 1  ;;  %v2153_v60 = vrot.slane %v2144_v35, 7 }
 0xb7a   : > { %1921 = vmatpush.bf16.msra.mxu0 %v4523_v46 }
 0xb7b   : > { %v2158_v52 = vsel %vm864_vm0, %v2156_v38, 0.0  ;;  %v2155_v3 = vsel %vm864_vm0, 0.0, %v2153_v60  ;;  %v1865_v60 = vrot.slane %v5288_v42, 1 }
 0xb7e   : > { %1922 = vmatpush.bf16.msra.mxu0 %v4522_v53 }
 0xbf0   : > { %v2293_v34 = vpop.f32.mrf.mxu1 }
 0xbf1   : > { %2301 = vrot.lane.b32.xlu1 %v2293_v34, %s4635_s2  ;;  %2297 = vrot.lane.b32.xlu0 %v2293_v34, %s4637_s26  ;;  %s5843_s2 = smov 64  }
 0xbf9   : > { %2159 = vrot.lane.b32.xlu0 %v2144_v35, %s5815_s9  ;;  %2163 = vrot.lane.b32.xlu1 %v2158_v52, %s5842_s27  ;;  %s5844_s9 = smov 16  }
 0xc01   : > { %1386 = vrot.lane.b32.xlu0 %v5083_v61, %s5843_s2  ;;  %1868 = vrot.lane.b32.xlu1 %v5288_v42, %s5842_s27  ;;  %v4537_v61 = vld [vmem:[%s5798_s21] sm:$0xff] }
 0xc02   : > { %2356 = vmatpush.bf16.msra.mxu2 %v4537_v61 }
 0xc63   : > { %v2302_v55 = vpop.permute.xlu1 %2301  ;;  %v2298_v57 = vpop.permute.xlu0 %2297 }
 0xc64   : > { %v2300_v58 = vmax.f32 %v2293_v34, %v2298_v57 }
 0xc66   : > { %v2304_v59 = vmax.f32 %v2300_v58, %v2302_v55 }
 0xc68   : > { %v2306_v62 = vrot.slane %v2304_v59, 7  ;;  %v2309_v63 = vrot.slane %v2304_v59, 1 }
 0xc6a   : > { %v2308_v0 = vsel %vm864_vm0, %v2304_v59, %v2306_v62  ;;  %v2311_v7 = vsel %vm864_vm0, %v2309_v63, %v2304_v59  ;;  %v1867_v62 = vsel %vm1593_vm5, %v1865_v60, 0.0  ;;  %v4521_v63 = vld [vmem:[%s5794_s17 + $0xa0] sm:$0xff] }
 0xc6b   : > { %v2160_v2 = vpop.permute.xlu0 %2159  ;;  %v2164_v4 = vpop.permute.xlu1 %2163  ;;  %v2312_v5 = vmax.f32 %v2308_v0, %v2304_v59  ;;  %v4538_v0 = vld [vmem:[%s5798_s21 + $0xc] sm:$0xff]  ;;  %1923 = vmatpush.bf16.msra.mxu0 %v4521_v63 }
 0xc6c   : > { %v2166_v6 = vsel %vm882_vm2, %v2155_v3, %v2160_v2  ;;  %2405 = vmatpush.bf16.msrb.mxu3 %v4538_v0  ;;  %v4519_v2 = vld [vmem:[%s5794_s17 + $0x90] sm:$0xff]  ;;  %v4536_v3 = vld [vmem:[%s5796_s19 + $0x58] sm:$0xff] }
 0xc6d   : > { %v2167_v9 = vsel %vm1602_vm6, %v2166_v6, %v2164_v4  ;;  %v5330_v10 = vmax.f32 %v2312_v5, %v2311_v7  ;;  %v4535_v4 = vld [vmem:[%s5796_s19 + $0x50] sm:$0xff]  ;;  %v4534_v5 = vld [vmem:[%s5796_s19 + $0x48] sm:$0xff] }
 0xc6e   : > { %v2168_v13 = vpack.c.bf16 %v2167_v9, %v2167_v9 }
 0xc6f   : > { %v2315_v15 = vmul.f32 %v2314_v1, %v5330_v10  ;;  %v4520_v1 = vld [vmem:[%s5794_s17 + $0x98] sm:$0xff] }
 0xc70   : > { %4042 = vmatmul.msk.bf16.vlgmr.msra.gmra.mxu3 %vm2054_vm10, %v2168_v13  ;;  %1924 = vmatpush.bf16.msra.mxu0 %v4520_v1 }
 0xc71   : > { %v2319_v16 = vadd.f32 %v2317_v11, %v2315_v15  ;;  %v1862_v11 = vrot.slane %v5288_v42, 7 }
 0xc73   : > { %v1387_v17 = vpop.permute.xlu0 %1386  ;;  %v2320_v20 = vmax.f32 %v2319_v16, 0.0  ;;  %v1869_v14 = vpop.permute.xlu1 %1868  ;;  %v1864_v15 = vsel %vm864_vm0, 0.0, %v1862_v11 }
 0xc74   : > { %v1389_v21 = vsel %vm946_vm3, %v1382_v19, %v1387_v17  ;;  %1925 = vmatpush.bf16.msra.mxu0 %v4519_v2  ;;  %v1875_v16 = vsel %vm1602_vm6, %v1864_v15, %v1869_v14 }
 0xc75   : > { %v1390_v23 = vpack.c.bf16 %v1389_v21, %v1389_v21  ;;  %2325 = vrot.lane.b32.xlu2 %v2320_v20, %s5819_s8 }
 0xc77   : > { %1476 = vmatmul.bf16.vlgmr.msrb.gmra.mxu0 %v1390_v23 }
 0xc78   : > { %2262 = vmatpush.bf16.msrb.mxu0 %v4536_v3  ;;  %v4540_v3 = vld [vmem:[%s5798_s21 + $0x24] sm:$0xff] }
 0xc7c   : > { %2263 = vmatpush.bf16.msrb.mxu0 %v4535_v4 }
 0xc80   : > { %2264 = vmatpush.bf16.msrb.mxu0 %v4534_v5 }
 0xccf   : > { %v2326_v25 = vpop.permute.xlu2 %2325 }
 0xcd0   : > { %v2328_v26 = vsel %vm1545_vm4, 0.0, %v2326_v25 }
 0xcd1   : > { %v2329_v27 = vsel %vm882_vm2, %v2328_v26, 0.0 }
 0xcd2   : > { %v2330_v28 = vpack.c.bf16 %v2329_v27, %v2329_v27 }
 0xcd4   : > { %4068 = vmatmul.msk.bf16.vlgmr.msra.gmra.mxu2 %vm2342_vm11, %v2330_v28  ;;  %v4081_v28 = vld [vmem:[%s5798_s21 + $0x20] sm:$0xf] }
 0xcf3   : > { %v2200_v32 = vpop.f32.mrf.mxu3 }
 0xcf4   : > { %v2201_v34 = vadd.f32 %v2200_v32, %v2169_v30  ;;  %v5351_v35 = vpop.f32.mrf.mxu0  ;;  %v2436_v30 = vunpack.c.l.b16 %v4081_v28  ;;  %v2390_v32 = vrot.slane %v5366_v45, 2 }
 0xcf6   : > { %v2207_v37 = vmul.f32 %v2206_v31, %v2201_v34  ;;  %v2438_v31 = vpack.c.b16 %v2436_v30, %v2436_v30 }
 0xcf8   : > { %v2209_v38 = vadd.f32 %v2208_v36, %v2207_v37  ;;  %v2446_v34 = vsel %vm1982_vm8, %v2438_v31, 0  ;;  %v4078_v37 = vld [vmem:[%s5799_s22 + $0x8] sm:$0x7] }
 0xcfa   : > { %v2210_v39 = vmax.f32 %v2209_v38, 0.0 }
 0xcfb   : > { %v2202_v40 = vpop.f32.mrf.mxu3 }
 0xcfc   : > { %2225 = vrot.lane.b32.xlu0 %v2210_v39, %s5844_s9  ;;  %v1479_v52 = vpop.f32.mrf.mxu0  ;;  %v2222_v41 = vrot.slane %v2210_v39, 1  ;;  %v2219_v21 = vrot.slane %v2210_v39, 7 }
 0xcfd   : > { %v2416_v52 = vrot.slane %v4078_v37, 1 }
 0xcfe   : > { %v2224_v8 = vsel %vm864_vm0, %v2222_v41, 0.0  ;;  %v2221_v25 = vsel %vm864_vm0, 0.0, %v2219_v21  ;;  %v4097_v21 = vld [vmem:[%s5797_s20 + $0x10] sm:$0x7] }
 0xcff   : > { %2229 = vrot.lane.b32.xlu1 %v2224_v8, %s5842_s27 }
 0xd57   : > { %v2358_v48 = vpop.f32.mrf.mxu2 }
 0xd58   : > { %v2359_v50 = vadd.f32 %v2358_v48, %v2340_v43 }
 0xd5a   : > { %v2364_v55 = vmul.f32 %v5366_v45, %v2359_v50 }
 0xd5c   : > { %v2368_v57 = vadd.f32 %v2366_v51, %v2364_v55  ;;  %v4090_v51 = vld [vmem:[%s5798_s21 + $0x2c] sm:$0xf] }
 0xd5d   : > { %v2485_v53 = vunpack.c.l.b16 %v4090_v51 }
 0xd5e   : > { %v2369_v58 = vmax.f32 %v2368_v57, 0.0  ;;  %v2440_v57 = vrot.slane %v4078_v37, 2 }
 0xd5f   : > { %v2360_v59 = vpop.f32.mrf.mxu2  ;;  %v2487_v54 = vpack.c.b16 %v2485_v53, %v2485_v53 }
 0xd60   : > { %2375 = vrot.lane.b32.xlu2 %v2369_v58, %s5819_s8  ;;  %v4087_v58 = vld [vmem:[%s5799_s22 + $0xc] sm:$0x7] }
 0xd61   : > { %v2495_v55 = vsel %vm1982_vm8, %v2487_v54, 0  ;;  %v2489_v11 = vrot.slane %v4087_v58, 2 }
 0xd62   : > { %2503 = vmatpush.bf16.msrb.mxu1 %v2495_v55 }
 0xd66   : > { %2504 = vmatpush.bf16.msrb.mxu1 %v4540_v3  ;;  %v2672_v3 = vld [vmem:[%s5847_s6 + $0x8] sm:$0xff] }
 0xd68   : > { %1872 = vrot.lane.b32.xlu2 %v1867_v62, %s5843_s2  ;;  %v2465_v62 = vrot.slane %v4087_v58, 1 }
 0xd6a   : > { %2691 = vmatpush.msra.mxu1 %v2672_v3 }
 0xd6e   : > { %v2226_v23 = vpop.permute.xlu0 %2225 }
 0xd6f   : > { %v2232_v42 = vsel %vm882_vm2, %v2221_v25, %v2226_v23 }
 0xd71   : > { %v2230_v61 = vpop.permute.xlu1 %2229 }
 0xd72   : > { %v2233_v26 = vsel %vm1602_vm6, %v2232_v42, %v2230_v61  ;;  %v2540_v42 = vperm.slane %v4097_v21, 0 }
 0xd73   : > { %v2234_v27 = vpack.c.bf16 %v2233_v26, %v2233_v26 }
 0xdba   : > { %v2376_v6 = vpop.permute.xlu2 %2375 }
 0xdbb   : > { %v2378_v7 = vsel %vm1545_vm4, 0.0, %v2376_v6 }
 0xdbc   : > { %v2379_v9 = vsel %vm882_vm2, %v2378_v7, 0.0 }
 0xdbd   : > { %v2380_v13 = vpack.c.bf16 %v2379_v9, %v2379_v9  ;;  %v2511_v9 = vld [vmem:[%s5846_s7] sm:$0xff] }
 0xdbe   : > { %2530 = vmatpush.msrb.mxu2 %v2511_v9 }
 0xdbf   : > { %4077 = vmatmul.msk.bf16.vlgmr.msrb.gmra.mxu3 %vm2342_vm11, %v2380_v13 }
 0xdc2   : > { %v1873_v17 = vpop.permute.xlu2 %1872 }
 0xdc3   : > { %v1876_v19 = vsel %vm946_vm3, %v1875_v16, %v1873_v17  ;;  %v2235_v17 = vperm.slane %v5347_v29, 2 }
 0xdc4   : > { %v1877_v20 = vpack.c.bf16 %v1876_v19, %v1876_v19 }
 0xdc6   : > { %3986 = vmatmul.msk.bf16.vlgmr.msra.gmra.mxu0 %vm1643_vm7, %v1877_v20 }
 0xdc7   : > { %2454 = vmatpush.bf16.msra.mxu0 %v2446_v34  ;;  %v4543_v34 = vld [vmem:[%s5796_s19 + $0x70] sm:$0xff] }
 0xdc8   : > { %2596 = vmatpush.bf16.msra.mxu3 %v4543_v34 }
 0xdcb   : > { %2455 = vmatpush.bf16.msra.mxu0 %v4539_v47 }
 0xdd6   : > { %4062 = vmatmul.msk.bf16.vlgmr.msrb.gmra.mxu0 %vm2054_vm10, %v2234_v27  ;;  %v2542_v27 = vperm.slane %v4097_v21, 1 }
 0xe42   : > { %v2407_v36 = vpop.f32.mrf.mxu3 }
 0xe43   : > { %v2408_v38 = vadd.f32 %v2407_v36, %v2390_v32  ;;  %v5422_v39 = vpop.f32.mrf.mxu0  ;;  %v4541_v36 = vld [vmem:[%s5796_s19 + $0x60] sm:$0xff] }
 0xe45   : > { %v2411_v40 = vadd.f32 %v2408_v38, %v5330_v10 }
 0xe47   : > { %v2414_v41 = vmul.f32 %v4078_v37, %v2411_v40 }
 0xe49   : > { %v2418_v8 = vadd.f32 %v2416_v52, %v2414_v41 }
 0xe4a   : > { %v2409_v24 = vpop.f32.mrf.mxu3 }
 0xe4b   : > { %v1929_v43 = vpop.f32.mrf.mxu0  ;;  %v2419_v44 = vmax.f32 %v2418_v8, 0.0 }
 0xe4c   : > { %v4546_v43 = vld [vmem:[%s5796_s19 + $0x88] sm:$0xff] }
 0xe4d   : > { %2425 = vrot.lane.b32.xlu2 %v2419_v44, %s5845_s3  ;;  %2662 = vmatpush.bf16.msrb.mxu0 %v4546_v43  ;;  %v4545_v44 = vld [vmem:[%s5796_s19 + $0x80] sm:$0xff] }
 0xe51   : > { %2663 = vmatpush.bf16.msrb.mxu0 %v4545_v44 }
 0xe53   : > { %v2266_v45 = vpop.f32.mrf.mxu0 }
 0xe54   : > { %v2267_v19 = vadd.f32 %v2266_v45, %v2235_v17  ;;  %v4117_v45 = vld [vmem:[%s5797_s20 + $0x14] sm:$0x7]  ;;  %v4140_v17 = vld [vmem:[%s5795_s18 + $0x10] sm:$0x7] }
 0xe55   : > { %v2606_v47 = vperm.slane %v4117_v45, 0 }
 0xe56   : > { %v2270_v23 = vadd.f32 %v2267_v19, %v5254_v22 }
 0xe5b   : > { %v2268_v46 = vpop.f32.mrf.mxu0 }
 0xe5c   : > { %v2569_v46 = vperm.slane %v4097_v21, 2 }
 0xea7   : > { %v2426_v48 = vpop.permute.xlu2 %2425 }
 0xea8   : > { %v2428_v49 = vsel %vm1545_vm4, 0.0, %v2426_v48 }
 0xea9   : > { %v2429_v10 = vsel %vm882_vm2, %v2428_v49, 0.0 }
 0xeaa   : > { %v2430_v50 = vpack.c.bf16 %v2429_v10, %v2429_v10  ;;  %v2608_v10 = vperm.slane %v4117_v45, 1 }
 0xeac   : > { %4086 = vmatmul.msk.bf16.vlgmr.msra.gmra.mxu0 %vm2342_vm11, %v2430_v50 }
 0xf29   : > { %v2457_v59 = vpop.f32.mrf.mxu0 }
 0xf2a   : > { %v2458_v60 = vadd.f32 %v2457_v59, %v2440_v57 }
 0xf2c   : > { %v2463_v63 = vmul.f32 %v4087_v58, %v2458_v60  ;;  %v4544_v58 = vld [vmem:[%s5796_s19 + $0x78] sm:$0xff] }
 0xf2d   : > { %2664 = vmatpush.bf16.msrb.mxu0 %v4544_v58  ;;  %v4553_v58 = vld [vmem:[%s5794_s17 + $0xf0] sm:$0xff] }
 0xf2e   : > { %v2467_v0 = vadd.f32 %v2465_v62, %v2463_v63 }
 0xf30   : > { %v2468_v1 = vmax.f32 %v2467_v0, 0.0 }
 0xf31   : > { %v2459_v2 = vpop.f32.mrf.mxu0 }
 0xf32   : > { %2474 = vrot.lane.b32.xlu0 %v2468_v1, %s5845_s3 }
 0xfa4   : > { %v2475_v4 = vpop.permute.xlu0 %2474 }
 0xfa5   : > { %v2477_v5 = vsel %vm1545_vm4, 0.0, %v2475_v4  ;;  %v2671_v4 = vld [vmem:[%s5847_s6] sm:$0xff] }
 0xfa6   : > { %v2478_v6 = vsel %vm882_vm2, %v2477_v5, 0.0  ;;  %2692 = vmatpush.msra.mxu1 %v2671_v4  ;;  %v2635_v5 = vperm.slane %v4117_v45, 2  ;;  %v2909_v4 = vld [vmem:[%s5788_s11 + $0x10] sm:$0xff] }
 0xfa7   : > { %v2479_v7 = vpack.c.bf16 %v2478_v6, %v2478_v6 }
 0xfa9   : > { %4095 = vmatmul.msk.bf16.vlgmr.msrb.gmra.mxu1 %vm2342_vm11, %v2479_v7 }
0x1026   : > { %v2506_v13 = vpop.f32.mrf.mxu1 }
0x1027   : > { %v2507_v14 = vadd.f32 %v2506_v13, %v2489_v11  ;;  %v2673_v13 = vld [vmem:[%s5787_s10] sm:$0xf] }
0x1029   : > { %v2510_v15 = vadd.f32 %v2507_v14, %v2411_v40 }
0x102b   : > { %4096 = vmatmul.msk.f32.vlgmr.msrb.gmra.mxu2 %vm1545_vm4, %v2510_v15  ;;  %v1878_v15 = vperm.slane %v5279_v33, 2 }
0x102e   : > { %v2508_v16 = vpop.f32.mrf.mxu1 }
0x102f   : > { %v1928_v16 = vadd.f32 %v5422_v39, %v1878_v15  ;;  %v2911_v15 = vld [vmem:[%s5789_s12] sm:$0xff] }
0x1031   : > { %v1931_v19 = vadd.f32 %v1928_v16, %v5156_v56 }
0x10ae   : > { %v2532_v20 = vpop.f32.mrf.mxu2 }
0x10af   : > { %v2535_v61 = vperm.slane %v2532_v20, 0 }
0x10b1   : > { %v2536_v25 = vadd.f32 %v2535_v61, %v2270_v23  ;;  %v2728_v23 = vperm.slane %v4140_v17, 0 }
0x10b3   : > { %v2537_v26 = vadd.f32 %v2536_v25, %v5254_v22  ;;  %v4542_v22 = vld [vmem:[%s5796_s19 + $0x68] sm:$0xff]  ;;  %v2730_v25 = vperm.slane %v4140_v17, 1 }
0x10b4   : > { %2597 = vmatpush.bf16.msra.mxu3 %v4542_v22 }
0x10b5   : > { %v2541_v28 = vmul.f32 %v2540_v42, %v2537_v26 }
0x10b7   : > { %v2543_v30 = vadd.f32 %v2542_v27, %v2541_v28  ;;  %v4552_v28 = vld [vmem:[%s5794_s17 + $0xe8] sm:$0xff] }
0x10b8   : > { %2598 = vmatpush.bf16.msra.mxu3 %v4541_v36 }
0x10b9   : > { %v2544_v31 = vmax.f32 %v2543_v30, 0.0  ;;  %v4550_v30 = vld [vmem:[%s5794_s17 + $0xd8] sm:$0xff] }
0x10bb   : > { %2559 = vrot.lane.b32.xlu1 %v2544_v31, %s5844_s9  ;;  %v2556_v29 = vrot.slane %v2544_v31, 1  ;;  %v2553_v37 = vrot.slane %v2544_v31, 7  ;;  %v4549_v31 = vld [vmem:[%s5794_s17 + $0xd0] sm:$0xff] }
0x10bc   : > { %2805 = vmatpush.bf16.msrb.mxu3 %v4552_v28  ;;  %v4219_v28 = vld [vmem:[%s5793_s16 + $0x10] sm:$0x7] }
0x10bd   : > { %v2558_v32 = vsel %vm864_vm0, %v2556_v29, 0.0  ;;  %v2555_v40 = vsel %vm864_vm0, 0.0, %v2553_v37  ;;  %v4548_v29 = vld [vmem:[%s5794_s17 + $0xc8] sm:$0xff] }
0x10be   : > { %2563 = vrot.lane.b32.xlu2 %v2558_v32, %s5842_s27  ;;  %v4547_v32 = vld [vmem:[%s5794_s17 + $0xc0] sm:$0xff] }
0x1118   : > { %v2564_v52 = vpop.permute.xlu2 %2563 }
0x112d   : > { %v2560_v38 = vpop.permute.xlu1 %2559 }
0x112e   : > { %v2566_v41 = vsel %vm882_vm2, %v2555_v40, %v2560_v38 }
0x112f   : > { %v2567_v8 = vsel %vm1602_vm6, %v2566_v41, %v2564_v52  ;;  %v4178_v41 = vld [vmem:[%s5795_s18 + $0x14] sm:$0x7] }
0x1130   : > { %v2568_v24 = vpack.c.bf16 %v2567_v8, %v2567_v8  ;;  %v2763_v8 = vperm.slane %v4140_v17, 2  ;;  %v2820_v45 = vperm.slane %v4178_v41, 1  ;;  %v4570_v17 = vld [vmem:[%s5792_s15 + $0x1d8] sm:$0xff] }
0x1132   : > { %4116 = vmatmul.msk.bf16.vlgmr.msra.gmra.mxu3 %vm2054_vm10, %v2568_v24  ;;  %v2818_v24 = vperm.slane %v4178_v41, 0 }
0x11b5   : > { %v2600_v48 = vpop.f32.mrf.mxu3 }
0x11b6   : > { %v2601_v49 = vadd.f32 %v2600_v48, %v2569_v46 }
0x11b8   : > { %v2607_v50 = vmul.f32 %v2606_v47, %v2601_v49 }
0x11ba   : > { %v2609_v51 = vadd.f32 %v2608_v10, %v2607_v50 }
0x11bc   : > { %v2610_v53 = vmax.f32 %v2609_v51, 0.0  ;;  %v4558_v51 = vld [vmem:[%s5794_s17 + $0x118] sm:$0xff] }
0x11bd   : > { %v2602_v54 = vpop.f32.mrf.mxu3  ;;  %2895 = vmatpush.bf16.msra.mxu0 %v4558_v51  ;;  %v4578_v51 = vld [vmem:[%s5792_s15 + $0x218] sm:$0xff] }
0x11be   : > { %2625 = vrot.lane.b32.xlu0 %v2610_v53, %s5844_s9  ;;  %v2622_v55 = vrot.slane %v2610_v53, 1  ;;  %v2619_v59 = vrot.slane %v2610_v53, 7  ;;  %v4557_v53 = vld [vmem:[%s5794_s17 + $0x110] sm:$0xff]  ;;  %v4556_v54 = vld [vmem:[%s5794_s17 + $0x108] sm:$0xff] }
0x11c0   : > { %v2624_v57 = vsel %vm864_vm0, %v2622_v55, 0.0  ;;  %v2621_v62 = vsel %vm864_vm0, 0.0, %v2619_v59  ;;  %v4555_v55 = vld [vmem:[%s5794_s17 + $0x100] sm:$0xff]  ;;  %v2910_v59 = vld [vmem:[%s5788_s11 + $0x18] sm:$0xff] }
0x11c1   : > { %2629 = vrot.lane.b32.xlu1 %v2624_v57, %s5842_s27  ;;  %2896 = vmatpush.bf16.msra.mxu0 %v4557_v53  ;;  %v4554_v57 = vld [vmem:[%s5794_s17 + $0xf8] sm:$0xff]  ;;  %v4577_v53 = vld [vmem:[%s5792_s15 + $0x210] sm:$0xff] }
0x11c2   : > { %2927 = vmatpush.msrb.mxu1 %v2910_v59  ;;  %v4574_v59 = vld [vmem:[%s5792_s15 + $0x1f8] sm:$0xff] }
0x11c4   : > { %2928 = vmatpush.msrb.mxu1 %v2909_v4  ;;  %v4572_v4 = vld [vmem:[%s5792_s15 + $0x1e8] sm:$0xff] }
0x11c5   : > { %2897 = vmatpush.bf16.msra.mxu0 %v4556_v54  ;;  %v4576_v54 = vld [vmem:[%s5792_s15 + $0x208] sm:$0xff] }
0x11c9   : > { %2898 = vmatpush.bf16.msra.mxu0 %v4555_v55  ;;  %v4575_v55 = vld [vmem:[%s5792_s15 + $0x200] sm:$0xff] }
0x11cd   : > { %2899 = vmatpush.bf16.msra.mxu0 %v4554_v57  ;;  %v3007_v57 = vperm.slane %v4219_v28, 2 }
0x11d1   : > { %2900 = vmatpush.bf16.msra.mxu0 %v4553_v58  ;;  %v4293_v58 = vld [vmem:[%s5793_s16 + $0x14] sm:$0x7] }
0x1230   : > { %v2626_v60 = vpop.permute.xlu0 %2625 }
0x1231   : > { %v2632_v63 = vsel %vm882_vm2, %v2621_v62, %v2626_v60 }
0x1233   : > { %v2630_v0 = vpop.permute.xlu1 %2629 }
0x1234   : > { %v2633_v1 = vsel %vm1602_vm6, %v2632_v63, %v2630_v0 }
0x1235   : > { %v2634_v2 = vpack.c.bf16 %v2633_v1, %v2633_v1 }
0x1237   : > { %4136 = vmatmul.msk.bf16.vlgmr.msrb.gmra.mxu0 %vm2054_vm10, %v2634_v2 }
0x12b4   : > { %v2666_v6 = vpop.f32.mrf.mxu0 }
0x12b5   : > { %v2667_v7 = vadd.f32 %v2666_v6, %v2635_v5  ;;  %v2908_v5 = vld [vmem:[%s5788_s11 + $0x8] sm:$0xff]  ;;  %v2907_v6 = vld [vmem:[%s5788_s11] sm:$0xff] }
0x12b6   : > { %2929 = vmatpush.msrb.mxu1 %v2908_v5 }
0x12b7   : > { %v2670_v9 = vadd.f32 %v2667_v7, %v2537_v26  ;;  %v2853_v7 = vperm.slane %v4178_v41, 2  ;;  %v4559_v41 = vld [vmem:[%s5792_s15 + $0x180] sm:$0xff] }
0x12b8   : > { %2930 = vmatpush.msrb.mxu1 %v2907_v6 }
0x12b9   : > { %4137 = vmatmul.msk.f32.vlgmr.msra.gmra.mxu1 %vm882_vm2, %v2670_v9 }
0x12bc   : > { %v2668_v11 = vpop.f32.mrf.mxu0 }
0x1336   : > { %v2694_v14 = vpop.f32.mrf.mxu1 }
0x1337   : > { %4138 = vmatpush.msk.msra.mxu2 %vm2701_vm12, %v2694_v14 }
0x1338   : > { %4139 = vmatmul.msk.f32.vlgmr.msra.gmra.mxu2 %vm2697_vm13, %v2673_v13 }
0x13bb   : > { %v2722_v20 = vpop.f32.mrf.mxu2 }
0x13bc   : > { %v2723_v21 = vadd.f32 %v2722_v20, %v1931_v19  ;;  %v4569_v19 = vld [vmem:[%s5792_s15 + $0x1d0] sm:$0xff]  ;;  %v4568_v20 = vld [vmem:[%s5792_s15 + $0x1c8] sm:$0xff] }
0x13be   : > { %v5508_v61 = vadd.f32 %v2723_v21, %v5156_v56  ;;  %v4551_v56 = vld [vmem:[%s5794_s17 + $0xe0] sm:$0xff] }
0x13bf   : > { %2806 = vmatpush.bf16.msrb.mxu3 %v4551_v56  ;;  %v4567_v21 = vld [vmem:[%s5792_s15 + $0x1c0] sm:$0xff]  ;;  %v4562_v56 = vld [vmem:[%s5792_s15 + $0x198] sm:$0xff] }
0x13c0   : > { %v2729_v42 = vmul.f32 %v2728_v23, %v5508_v61  ;;  %v4566_v23 = vld [vmem:[%s5792_s15 + $0x1b8] sm:$0xff] }
0x13c1   : > { %3083 = vmatpush.bf16.msra.mxu1 %v4566_v23 }
0x13c2   : > { %v2731_v26 = vadd.f32 %v2730_v25, %v2729_v42  ;;  %v4623_v25 = vld [vmem:[%s5793_s16 + $0xc] sm:$0x7] }
0x13c3   : > { %2807 = vmatpush.bf16.msrb.mxu3 %v4550_v30  ;;  %v1392_v42 = vperm.slane %v4623_v25, 2 }
0x13c4   : > { %v2732_v27 = vmax.f32 %v2731_v26, 0.0  ;;  %v4564_v26 = vld [vmem:[%s5792_s15 + $0x1a8] sm:$0xff] }
0x13c6   : > { %2753 = vrot.lane.b32.xlu2 %v2732_v27, %s5842_s27  ;;  %v2750_v33 = vrot.slane %v2732_v27, 1  ;;  %v2747_v34 = vrot.slane %v2732_v27, 7  ;;  %v1478_v27 = vadd.f32 %v5351_v35, %v1392_v42 }
0x13c7   : > { %2808 = vmatpush.bf16.msrb.mxu3 %v4549_v31 }
0x13c8   : > { %v2752_v39 = vsel %vm1593_vm5, %v2750_v33, 0.0  ;;  %v2749_v36 = vsel %vm864_vm0, 0.0, %v2747_v34  ;;  %v4563_v33 = vld [vmem:[%s5792_s15 + $0x1a0] sm:$0xff]  ;;  %v2966_v34 = vperm.slane %v4219_v28, 1 }
0x13c9   : > { %2757 = vrot.lane.b32.xlu0 %v2752_v39, %s5843_s2  ;;  %v1491_v39 = vadd.f32 %v5115_v18, %v1478_v27  ;;  %v4561_v18 = vld [vmem:[%s5792_s15 + $0x190] sm:$0xff]  ;;  %v3260_v27 = vld [vmem:[%s5790_s13 + $0x18] sm:$0xff] }
0x13cb   : > { %2809 = vmatpush.bf16.msrb.mxu3 %v4548_v29  ;;  %v1494_v31 = vadd.f32 %v1491_v39, %v5024_v12  ;;  %v2964_v29 = vperm.slane %v4219_v28, 0  ;;  %v3258_v39 = vld [vmem:[%s5790_s13 + $0x8] sm:$0xff]  ;;  %v3257_v28 = vld [vmem:[%s5790_s13] sm:$0xff] }
0x13cf   : > { %2810 = vmatpush.bf16.msrb.mxu3 %v4547_v32 }
0x13d3   : > { %3230 = vmatpush.bf16.msra.mxu3 %v4578_v51 }
0x13d7   : > { %3231 = vmatpush.bf16.msra.mxu3 %v4577_v53 }
0x13db   : > { %3232 = vmatpush.bf16.msra.mxu3 %v4576_v54 }
0x13df   : > { %3233 = vmatpush.bf16.msra.mxu3 %v4575_v55 }
0x13e3   : > { %3234 = vmatpush.bf16.msra.mxu3 %v4574_v59  ;;  %v4594_v59 = vld [vmem:[%s5800_s23 + $0x58] sm:$0xff] }
0x1420   : > { %v2754_v22 = vpop.permute.xlu2 %2753 }
0x1421   : > { %v2760_v37 = vsel %vm1602_vm6, %v2749_v36, %v2754_v22  ;;  %v4560_v36 = vld [vmem:[%s5792_s15 + $0x188] sm:$0xff] }
0x143b   : > { %v2758_v38 = vpop.permute.xlu0 %2757 }
0x143c   : > { %v2761_v40 = vsel %vm946_vm3, %v2760_v37, %v2758_v38 }
0x143d   : > { %v2762_v52 = vpack.c.bf16 %v2761_v40, %v2761_v40 }
0x143f   : > { %4177 = vmatmul.msk.bf16.vlgmr.msrb.gmra.mxu3 %vm1643_vm7, %v2762_v52 }
0x14c2   : > { %v2812_v43 = vpop.f32.mrf.mxu3 }
0x14c3   : > { %v2813_v44 = vadd.f32 %v2812_v43, %v2763_v8 }
0x14c5   : > { %v2819_v46 = vmul.f32 %v2818_v24, %v2813_v44 }
0x14c7   : > { %v2821_v47 = vadd.f32 %v2820_v45, %v2819_v46 }
0x14c9   : > { %v2822_v48 = vmax.f32 %v2821_v47, 0.0 }
0x14ca   : > { %v2814_v49 = vpop.f32.mrf.mxu3 }
0x14cb   : > { %2843 = vrot.lane.b32.xlu1 %v2822_v48, %s5842_s27  ;;  %v2840_v10 = vrot.slane %v2822_v48, 1  ;;  %v2837_v60 = vrot.slane %v2822_v48, 7  ;;  %v4582_v48 = vld [vmem:[%s5792_s15 + $0x238] sm:$0xff]  ;;  %v4581_v49 = vld [vmem:[%s5792_s15 + $0x230] sm:$0xff]  ;;  %s5848_s27 = sshll.u32 %s5851_s5, 3 }
0x14cc   : > { %3247 = vmatpush.bf16.msrb.mxu0 %v4582_v48  ;;  %s766_s9 = scalar_lea.vmem %s5802_s25, %s5848_s27 }
0x14cd   : > { %v2842_v50 = vsel %vm1593_vm5, %v2840_v10, 0.0  ;;  %v2839_v63 = vsel %vm864_vm0, 0.0, %v2837_v60  ;;  %v4580_v10 = vld [vmem:[%s5792_s15 + $0x228] sm:$0xff] }
0x14ce   : > { %2847 = vrot.lane.b32.xlu2 %v2842_v50, %s5843_s2  ;;  %v4579_v50 = vld [vmem:[%s5792_s15 + $0x220] sm:$0xff] }
0x14d0   : > { %3248 = vmatpush.bf16.msrb.mxu0 %v4581_v49 }
0x14d4   : > { %3249 = vmatpush.bf16.msrb.mxu0 %v4580_v10 }
0x14d8   : > { %3250 = vmatpush.bf16.msrb.mxu0 %v4579_v50 }
0x1528   : > { %v2848_v0 = vpop.permute.xlu2 %2847 }
0x153d   : > { %v2844_v62 = vpop.permute.xlu1 %2843 }
0x153e   : > { %v2850_v1 = vsel %vm1602_vm6, %v2839_v63, %v2844_v62  ;;  %v3111_v63 = vperm.slane %v4293_v58, 0 }
0x153f   : > { %v2851_v2 = vsel %vm946_vm3, %v2850_v1, %v2848_v0  ;;  %v4573_v0 = vld [vmem:[%s5792_s15 + $0x1f0] sm:$0xff] }
0x1540   : > { %v2852_v3 = vpack.c.bf16 %v2851_v2, %v2851_v2  ;;  %v3113_v2 = vperm.slane %v4293_v58, 1  ;;  %3235 = vmatpush.bf16.msra.mxu3 %v4573_v0 }
0x1542   : > { %4215 = vmatmul.msk.bf16.vlgmr.msra.gmra.mxu0 %vm1643_vm7, %v2852_v3 }
0x1544   : > { %3236 = vmatpush.bf16.msra.mxu3 %v4572_v4 }
0x15bf   : > { %v2902_v9 = vpop.f32.mrf.mxu0 }
0x15c0   : > { %v2903_v11 = vadd.f32 %v2902_v9, %v2853_v7 }
0x15c2   : > { %v2906_v13 = vadd.f32 %v2903_v11, %v5508_v61  ;;  %v4565_v61 = vld [vmem:[%s5792_s15 + $0x1b0] sm:$0xff] }
0x15c3   : > { %3084 = vmatpush.bf16.msra.mxu1 %v4565_v61 }
0x15c4   : > { %4216 = vmatmul.msk.f32.vlgmr.msrb.gmra.mxu1 %vm1602_vm6, %v2906_v13 }
0x15c7   : > { %v2904_v14 = vpop.f32.mrf.mxu0  ;;  %3085 = vmatpush.bf16.msra.mxu1 %v4564_v26 }
0x15c8   : > { %v4571_v14 = vld [vmem:[%s5792_s15 + $0x1e0] sm:$0xff] }
0x15c9   : > { %3237 = vmatpush.bf16.msra.mxu3 %v4571_v14 }
0x15cb   : > { %3086 = vmatpush.bf16.msra.mxu1 %v4563_v33  ;;  %v3259_v33 = vld [vmem:[%s5790_s13 + $0x10] sm:$0xff] }
0x15cf   : > { %3087 = vmatpush.bf16.msra.mxu1 %v4562_v56  ;;  %v3154_v56 = vperm.slane %v4293_v58, 2  ;;  %v4595_v58 = vld [vmem:[%s5800_s23 + $0x60] sm:$0xff] }
0x15d3   : > { %3088 = vmatpush.bf16.msra.mxu1 %v4561_v18 }
0x15d7   : > { %3089 = vmatpush.bf16.msra.mxu1 %v4560_v36  ;;  %v4588_v36 = vld [vmem:[%s5800_s23 + $0x28] sm:$0xff] }
0x15db   : > { %3090 = vmatpush.bf16.msra.mxu1 %v4559_v41  ;;  %v4584_v41 = vld [vmem:[%s5800_s23 + $0x8] sm:$0xff] }
0x1641   : > { %v2932_v16 = vpop.f32.mrf.mxu1 }
0x1642   : > { %4217 = vmatpush.msk.msrb.mxu2 %vm1982_vm8, %v2932_v16  ;;  %v3263_v16 = vld [vmem:[%s5790_s13 + $0x30] sm:$0xff] }
0x1643   : > { %4218 = vmatmul.msk.f32.vlgmr.msrb.gmra.mxu2 %vm1978_vm9, %v2911_v15  ;;  %v3264_v15 = vld [vmem:[%s5790_s13 + $0x38] sm:$0xff] }
0x1644   : > { %3100 = vmatpush.bf16.msra.mxu2 %v4570_v17  ;;  %v3262_v17 = vld [vmem:[%s5790_s13 + $0x28] sm:$0xff] }
0x1648   : > { %3101 = vmatpush.bf16.msra.mxu2 %v4569_v19 }
0x164c   : > { %3102 = vmatpush.bf16.msra.mxu2 %v4568_v20  ;;  %v3261_v20 = vld [vmem:[%s5790_s13 + $0x20] sm:$0xff] }
0x1650   : > { %3103 = vmatpush.bf16.msra.mxu2 %v4567_v21 }
0x1654   : > { %3278 = vmatpush.msrb.mxu2 %v3264_v15 }
0x1656   : > { %3279 = vmatpush.msrb.mxu2 %v3263_v16 }
0x1658   : > { %3280 = vmatpush.msrb.mxu2 %v3262_v17 }
0x165a   : > { %3281 = vmatpush.msrb.mxu2 %v3261_v20 }
0x165c   : > { %3282 = vmatpush.msrb.mxu2 %v3260_v27 }
0x165e   : > { %3283 = vmatpush.msrb.mxu2 %v3259_v33 }
0x1660   : > { %3284 = vmatpush.msrb.mxu2 %v3258_v39 }
0x1662   : > { %3285 = vmatpush.msrb.mxu2 %v3257_v28 }
0x16c6   : > { %v2958_v30 = vpop.f32.mrf.mxu2 }
0x16c7   : > { %v2959_v35 = vadd.f32 %v2958_v30, %v5024_v12 }
0x16c9   : > { %v5623_v32 = vadd.f32 %v2959_v35, %v1494_v31 }
0x16cb   : > { %v2965_v22 = vmul.f32 %v2964_v29, %v5623_v32 }
0x16cd   : > { %v2967_v37 = vadd.f32 %v2966_v34, %v2965_v22  ;;  %v4590_v34 = vld [vmem:[%s5800_s23 + $0x38] sm:$0xff]  ;;  %v4589_v22 = vld [vmem:[%s5800_s23 + $0x30] sm:$0xff] }
0x16ce   : > { %3394 = vmatpush.bf16.msra.mxu0 %v4590_v34 }
0x16cf   : > { %v2968_v38 = vmax.f32 %v2967_v37, 0.0  ;;  %v3265_v37 = vld [vmem:[%s5791_s14] sm:$0xff] }
0x16d1   : > { %3001 = vrot.lane.b32.xlu0 %v2968_v38, %s5843_s2  ;;  %v2998_v12 = vrot.slane %v2968_v38, 1  ;;  %v2995_v8 = vrot.slane %v2968_v38, 7 }
0x16d2   : > { %3395 = vmatpush.bf16.msra.mxu0 %v4589_v22 }
0x16d3   : > { %v3000_v40 = vsel %vm871_vm1, %v2998_v12, 0.0  ;;  %v2997_v43 = vsel %vm864_vm0, 0.0, %v2995_v8  ;;  %v3266_v12 = vld [vmem:[%s5791_s14 + $0x8] sm:$0xff]  ;;  %v4583_v8 = vld [vmem:[%s5800_s23] sm:$0xff] }
0x16d4   : > { %v3006_v52 = vpack.c.bf16 %v3000_v40, %v3000_v40  ;;  %v4586_v40 = vld [vmem:[%s5800_s23 + $0x18] sm:$0xff] }
0x16d6   : > { %4292 = vmatmul.msk.bf16.vlgmr.msra.gmra.mxu2 %vm946_vm3, %v3006_v52  ;;  %3396 = vmatpush.bf16.msra.mxu0 %v4588_v36  ;;  %v4585_v52 = vld [vmem:[%s5800_s23 + $0x10] sm:$0xff] }
0x1743   : > { %v3002_v24 = vpop.permute.xlu0 %3001 }
0x1744   : > { %v3004_v44 = vsel %vm946_vm3, %v2997_v43, %v3002_v24  ;;  %v4598_v24 = vld [vmem:[%s5800_s23 + $0x78] sm:$0xff]  ;;  %v4597_v43 = vld [vmem:[%s5800_s23 + $0x70] sm:$0xff] }
0x1745   : > { %v3005_v45 = vpack.c.bf16 %v3004_v44, %v3004_v44  ;;  %3485 = vmatpush.bf16.msrb.mxu1 %v4598_v24  ;;  %v4596_v44 = vld [vmem:[%s5800_s23 + $0x68] sm:$0xff] }
0x1747   : > { %3091 = vmatmul.bf16.vlgmr.msra.gmra.mxu1 %v3005_v45  ;;  %v3335_v45 = vld [vmem:[%s5801_s24] sm:$0x7] }
0x1748   : > { %v3339_v49 = vperm.slane %v3335_v45, 1  ;;  %v3345_v0 = vperm.slane %v3335_v45, 2 }
0x1749   : > { %3486 = vmatpush.bf16.msrb.mxu1 %v4597_v43 }
0x174d   : > { %3487 = vmatpush.bf16.msrb.mxu1 %v4596_v44 }
0x1751   : > { %3488 = vmatpush.bf16.msrb.mxu1 %v4595_v58 }
0x1755   : > { %3489 = vmatpush.bf16.msrb.mxu1 %v4594_v59 }
0x1759   : > { %v3105_v46 = vpop.f32.mrf.mxu2 }
0x1761   : > { %v3107_v47 = vpop.f32.mrf.mxu2 }
0x1762   : > { %v3336_v47 = vperm.slane %v3335_v45, 0 }
0x17c4   : > { %v3092_v60 = vpop.f32.mrf.mxu1 }
0x17c5   : > { %v3093_v62 = vadd.f32 %v3092_v60, %v3007_v57  ;;  %v4593_v60 = vld [vmem:[%s5800_s23 + $0x50] sm:$0xff] }
0x17c6   : > { %3490 = vmatpush.bf16.msrb.mxu1 %v4593_v60 }
0x17c7   : > { %v3106_v1 = vadd.f32 %v3105_v46, %v3093_v62  ;;  %v4592_v62 = vld [vmem:[%s5800_s23 + $0x48] sm:$0xff] }
0x17c9   : > { %v3112_v3 = vmul.f32 %v3111_v63, %v3106_v1  ;;  %v4591_v63 = vld [vmem:[%s5800_s23 + $0x40] sm:$0xff] }
0x17ca   : > { %3491 = vmatpush.bf16.msrb.mxu1 %v4592_v62 }
0x17cb   : > { %v3114_v5 = vadd.f32 %v3113_v2, %v3112_v3  ;;  %v4418_v2 = vld [vmem:[%s5801_s24 + $0x4] sm:$0x7] }
0x17cc   : > { %v3094_v6 = vpop.f32.mrf.mxu1  ;;  %v3427_v4 = vperm.slane %v4418_v2, 0 }
0x17cd   : > { %v3115_v7 = vmax.f32 %v3114_v5, 0.0  ;;  %v3430_v6 = vperm.slane %v4418_v2, 1 }
0x17ce   : > { %3492 = vmatpush.bf16.msrb.mxu1 %v4591_v63 }
0x17cf   : > { %3148 = vrot.lane.b32.xlu1 %v3115_v7, %s5843_s2  ;;  %v3145_v9 = vrot.slane %v3115_v7, 1  ;;  %v3142_v19 = vrot.slane %v3115_v7, 7 }
0x17d1   : > { %v3147_v11 = vsel %vm871_vm1, %v3145_v9, 0.0  ;;  %v3144_v23 = vsel %vm864_vm0, 0.0, %v3142_v19  ;;  %v3436_v19 = vperm.slane %v4418_v2, 2 }
0x17d2   : > { %v3153_v13 = vpack.c.bf16 %v3147_v11, %v3147_v11 }
0x17d4   : > { %4366 = vmatmul.msk.bf16.vlgmr.msrb.gmra.mxu0 %vm946_vm3, %v3153_v13 }
0x1841   : > { %v3149_v21 = vpop.permute.xlu1 %3148 }
0x1842   : > { %v3151_v61 = vsel %vm946_vm3, %v3144_v23, %v3149_v21 }
0x1843   : > { %v3152_v25 = vpack.c.bf16 %v3151_v61, %v3151_v61 }
0x1845   : > { %3238 = vmatmul.bf16.vlgmr.msra.gmra.mxu3 %v3152_v25 }
0x1851   : > { %v3252_v42 = vpop.f32.mrf.mxu0 }
0x1859   : > { %v3254_v26 = vpop.f32.mrf.mxu0 }
0x18c8   : > { %v3239_v30 = vpop.f32.mrf.mxu3 }
0x18c9   : > { %v3240_v31 = vadd.f32 %v3239_v30, %v3154_v56 }
0x18cb   : > { %v3253_v35 = vadd.f32 %v3252_v42, %v3240_v31 }
0x18cd   : > { %v3256_v29 = vadd.f32 %v3253_v35, %v5623_v32  ;;  %v4587_v32 = vld [vmem:[%s5800_s23 + $0x20] sm:$0xff] }
0x18ce   : > { %3397 = vmatpush.bf16.msra.mxu0 %v4587_v32 }
0x18cf   : > { %4367 = vmatmul.msk.f32.vlgmr.msrb.gmra.mxu2 %vm946_vm3, %v3256_v29 }
0x18d0   : > { %v3241_v18 = vpop.f32.mrf.mxu3 }
0x18d2   : > { %3398 = vmatpush.bf16.msra.mxu0 %v4586_v40 }
0x18d6   : > { %3399 = vmatpush.bf16.msra.mxu0 %v4585_v52 }
0x18da   : > { %3400 = vmatpush.bf16.msra.mxu0 %v4584_v41 }
0x18de   : > { %3401 = vmatpush.bf16.msra.mxu0 %v4583_v8 }
0x1952   : > { %v3287_v38 = vpop.f32.mrf.mxu2 }
0x1953   : > { %3311 = vmatpush.msra.mxu2 %v3287_v38 }
0x1954   : > { %4368 = vmatmul.msk.f32.vlgmr.msra.gmra.mxu2 %vm1545_vm4, %v3265_v37 }
0x195c   : > { %4369 = vmatmul.msk.f32.gmra.mxu2 %vm1545_vm4, %v3266_v12 }
0x19d7   : > { %v3313_v46 = vpop.f32.mrf.mxu2 }
0x19d8   : > { %v3337_v48 = vmul.f32 %v3336_v47, %v3313_v46 }
0x19da   : > { %v3340_v50 = vadd.f32 %v3339_v49, %v3337_v48 }
0x19dc   : > { %v3342_v54 = vmax.f32 %v3340_v50, 0.0 }
0x19df   : > { %v3316_v10 = vpop.f32.mrf.mxu2 }
0x19e0   : > { %v3338_v51 = vmul.f32 %v3336_v47, %v3316_v10 }
0x19e2   : > { %v3341_v53 = vadd.f32 %v3339_v49, %v3338_v51 }
0x19e4   : > { %v3343_v55 = vmax.f32 %v3341_v53, 0.0 }
0x19e6   : > { %v3344_v57 = vpack.c.bf16 %v3343_v55, %v3342_v54 }
0x19e8   : > { %3402 = vmatmul.bf16.vlgmr.msra.gmra.mxu0 %v3344_v57 }
0x1a65   : > { %v3403_v1 = vpop.f32.mrf.mxu0 }
0x1a66   : > { %v3404_v3 = vadd.f32 %v3403_v1, %v3345_v0 }
0x1a68   : > { %v3428_v5 = vmul.f32 %v3427_v4, %v3404_v3 }
0x1a6a   : > { %v3431_v11 = vadd.f32 %v3430_v6, %v3428_v5 }
0x1a6c   : > { %v3433_v15 = vmax.f32 %v3431_v11, 0.0 }
0x1a6d   : > { %v3405_v7 = vpop.f32.mrf.mxu0 }
0x1a6e   : > { %v3406_v9 = vadd.f32 %v3405_v7, %v3345_v0 }
0x1a70   : > { %v3429_v13 = vmul.f32 %v3427_v4, %v3406_v9 }
0x1a72   : > { %v3432_v14 = vadd.f32 %v3430_v6, %v3429_v13 }
0x1a74   : > { %v3434_v16 = vmax.f32 %v3432_v14, 0.0 }
0x1a76   : > { %v3435_v17 = vpack.c.bf16 %v3434_v16, %v3433_v15 }
0x1a78   : > { %3493 = vmatmul.bf16.vlgmr.msrb.gmra.mxu1 %v3435_v17 }
0x1af5   : > { %v3494_v20 = vpop.f32.mrf.mxu1 }
0x1af6   : > { %v3495_v21 = vadd.f32 %v3494_v20, %v3436_v19 }
0x1af8   : > { %v3499_v23 = vmul.f32 0.5, %v3495_v21 }
0x1afa   : > { %4619 = vtanh.f32 %v3499_v23 }
0x1afd   : > { %v3496_v61 = vpop.f32.mrf.mxu1 }
0x1afe   : > { %v3497_v25 = vadd.f32 %v3496_v61, %v3436_v19 }
0x1b00   : > { %v4620_v42 = vpop.eup %4619  ;;  %v3500_v26 = vmul.f32 0.5, %v3497_v25 }
0x1b01   : > { %v3503_v27 = vadd.f32 1.0, %v4620_v42 }
0x1b02   : > { %4621 = vtanh.f32 %v3500_v26 }
0x1b03   : > { %v3505_v33 = vmul.f32 0.5, %v3503_v27 }
0x1b05   : > { %3507 = vst [vmem:[%s766_s9] sm:$0xff] %v3505_v33 }
0x1b08   : > { %v4622_v39 = vpop.eup %4621 }
0x1b09   : > { %v3504_v28 = vadd.f32 1.0, %v4622_v39 }
0x1b0b   : > { %v3506_v56 = vmul.f32 0.5, %v3504_v28 }
0x1b0d   : > { %3508 = vst [vmem:[%s766_s9 + $0x8] sm:$0xff] %v3506_v56 }
0x1b0e PF: > { %s5849_s0 = sld [smem:[#allocation2_spill]] }
0x1b14   : > { %s35_s29 = sadd.s32 1, %s5849_s0  }
0x1b15   : > { %p32_p4 = scmp.ge.s32.totalorder %s35_s29, 8  }
0x1b17   :  { %34 = sbr.rel (!%p32_p4) target bundleno = 11 (0xb), region = 188 }

</bundles_post_ra>
